<compile_context>
chip_gen: v6e
topology: v6e:2x2x1
jax: 0.10.0
libtpu: 0.0.40
codegen_flags: <defaults>
</compile_context>

<pallas_src>
import functools

import jax
import jax.numpy as jnp
import numpy as np
from jax.experimental import pallas as pl
from jax.experimental.pallas import tpu as pltpu

# ----------------------------- problem sizes -------------------------------
B = 8       # batch
D = 32      # state dimension
H = 32      # odefunc hidden dimension (== D so W2 packs into the same slab)
T = 8       # number of output time points
N_SUB = 4   # fixed RK4 substeps per output interval


# ------------------------------ Pallas kernel ------------------------------
def ode_kernel(t_ref, x0_ref, w_ref, v_ref, out_ref, *, n_sub, n_steps, d, h):
    """Single grid-less invocation: whole trajectory computed in-kernel.

    w_ref: (3*d, h) slab = [W1_y ; W1_h ; W2]     (static, aligned slices)
    v_ref: (8, h)  slab = rows [wt ; b1 ; b2 ; 0...]
    """
    h0 = x0_ref[...]                         # (B, D) initial condition == h0
    w1_y = w_ref[0:d, :]                     # (D, H)
    w1_h = w_ref[d:2 * d, :]                 # (D, H)
    w2 = w_ref[2 * d:2 * d + h, :]           # (H, D)
    vec = v_ref[...]                         # (8, H)
    wt = vec[0:1, :]                         # (1, H)
    b1 = vec[1:2, :]                         # (1, H)
    b2 = vec[2:3, :]                         # (1, D)

    # --- one-time precomputes (off the serial chain) ------------------------
    # bias from the closed-over h0 (constant over the whole integration)
    bias_h = jnp.dot(h0, w1_h, preferred_element_type=jnp.float32) + b1  # (B,H)
    # collapsed stage matrix and bias in u-space (u = y @ W1_y)
    m = jnp.dot(w2, w1_y, preferred_element_type=jnp.float32)            # (H,H)
    c = jnp.dot(b2, w1_y, preferred_element_type=jnp.float32)            # (1,H)
    u = jnp.dot(h0, w1_y, preferred_element_type=jnp.float32)            # (B,H)

    # odeint returns the initial condition at t[0].
    out_ref[0] = h0
    y = h0

    # Static unroll of the T-1 output intervals (static stores, LLO overlap).
    for i in range(1, n_steps):
        t0 = t_ref[i - 1]
        t1 = t_ref[i]
        dt = (t1 - t0) * (1.0 / n_sub)
        half_dt = 0.5 * dt
        sixth_dt = dt * (1.0 / 6.0)

        # Per-interval hoisted bias tiles (JAX doesn't CSE broadcasts).
        wt_dt = dt * wt                       # (1,H)
        bc_half = half_dt * wt + half_dt * c  # (1,H) mid-stage bias increment
        c_full = dt * c                       # (1,H)
        bc_full = wt_dt + c_full              # (1,H) last-stage bias increment
        base = bias_h + t0 * wt               # (B,H)

        s_acc = None
        # Static unroll of the RK4 substeps.
        for k in range(n_sub):
            b_a = base if k == 0 else base + float(k) * wt_dt
            b_b = b_a + bc_half
            b_c = b_a + bc_full

            # critical chain: tanh -> @M -> tanh -> @M -> tanh -> @M -> tanh -> @M
            a1 = jnp.tanh(u + b_a)
            m1 = jnp.dot(a1, m, preferred_element_type=jnp.float32)
            a2 = jnp.tanh(u + half_dt * m1 + b_b)
            m2 = jnp.dot(a2, m, preferred_element_type=jnp.float32)
            a3 = jnp.tanh(u + half_dt * m2 + b_b)
            m3 = jnp.dot(a3, m, preferred_element_type=jnp.float32)
            a4 = jnp.tanh(u + dt * m3 + b_c)

            s_sub = a1 + 2.0 * (a2 + a3) + a4                      # (B,H)
            u = (u + sixth_dt * jnp.dot(s_sub, m,
                                        preferred_element_type=jnp.float32)
                 + c_full)
            s_acc = s_sub if k == 0 else s_acc + s_sub

        # Output reconstruction: one S @ W2 per interval, off the critical
        # path of the next interval's u-chain (independent dot, static store).
        y = (y + sixth_dt * jnp.dot(s_acc, w2,
                                    preferred_element_type=jnp.float32)
             + (float(n_sub) * dt) * b2)
        out_ref[i] = y


# ------------------------------ wrapper ------------------------------------
def ode_block_forward(x0, t, params):
    """Pallas equivalent of ODEBlock.forward(x0, t) -> (T, B, D)."""
    W1, wt, b1, W2, b2 = params
    assert D == H, "weight-slab packing below assumes D == H"

    # Layout plumbing (not compute hoisting): pack the 5 tiny parameter arrays
    # into two slabs so the kernel prologue is 2 DMAs instead of 7.
    w1_y, w1_h = W1[:D], W1[D:]
    w_slab = jnp.concatenate([w1_y, w1_h, W2], axis=0)          # (3*D, H)
    v_slab = (jnp.zeros((8, H), jnp.float32)
              .at[0].set(wt[0]).at[1].set(b1[0]).at[2].set(b2[0]))

    kernel = functools.partial(ode_kernel, n_sub=N_SUB, n_steps=T, d=D, h=H)
    return pl.pallas_call(
        kernel,
        out_shape=jax.ShapeDtypeStruct((T, B, D), jnp.float32),
        in_specs=[
            pl.BlockSpec(memory_space=pltpu.MemorySpace.SMEM),   # t (scalars)
            pl.BlockSpec(memory_space=pltpu.MemorySpace.VMEM),   # x0 / h0
            pl.BlockSpec(memory_space=pltpu.MemorySpace.VMEM),   # weight slab
            pl.BlockSpec(memory_space=pltpu.MemorySpace.VMEM),   # vec slab
        ],
        out_specs=pl.BlockSpec(memory_space=pltpu.MemorySpace.VMEM),
    )(t, x0, w_slab, v_slab)


# --------------------------- pure-JAX reference ----------------------------
def odefunc_ref(t_scalar, y, h0, params):
    W1, wt, b1, W2, b2 = params
    z = jnp.concatenate([y, h0], axis=-1) @ W1 + t_scalar * wt + b1
    return jnp.tanh(z) @ W2 + b2


def ode_block_ref(x0, t, params):
    ys = [x0]
    y = x0
    for i in range(1, t.shape[0]):
        t0, t1 = t[i - 1], t[i]
        dt = (t1 - t0) / float(N_SUB)
        for k in range(N_SUB):
            tk = t0 + dt * k
            k1 = odefunc_ref(tk, y, x0, params)
            k2 = odefunc_ref(tk + dt * 0.5, y + dt * 0.5 * k1, x0, params)
            k3 = odefunc_ref(tk + dt * 0.5, y + dt * 0.5 * k2, x0, params)
            k4 = odefunc_ref(tk + dt, y + dt * k3, x0, params)
            y = y + (dt / 6.0) * (k1 + 2.0 * k2 + 2.0 * k3 + k4)
        ys.append(y)
    return jnp.stack(ys, axis=0)


# ------------------------------- main ---------------------------------------
if __name__ == "__main__":
    key = jax.random.PRNGKey(0)
    k_x0, k_w1, k_wt, k_b1, k_w2, k_b2 = jax.random.split(key, 6)

    x0 = jax.random.normal(k_x0, (B, D), dtype=jnp.float32)
    t = jnp.linspace(0.0, 1.0, T, dtype=jnp.float32)

    scale = 0.1
    params = (
        scale * jax.random.normal(k_w1, (2 * D, H), dtype=jnp.float32),  # W1
        scale * jax.random.normal(k_wt, (1, H), dtype=jnp.float32),      # wt
        scale * jax.random.normal(k_b1, (1, H), dtype=jnp.float32),      # b1
        scale * jax.random.normal(k_w2, (H, D), dtype=jnp.float32),      # W2
        scale * jax.random.normal(k_b2, (1, D), dtype=jnp.float32),      # b2
    )

    out = ode_block_forward(x0, t, params)
    out = jax.block_until_ready(out)

    # Pin the reference's matmul precision so the 2e-4 check reflects the
    # algebraic restructuring, not an XLA bf16 downgrade of the reference.
    with jax.default_matmul_precision("highest"):
        ref = jax.block_until_ready(ode_block_ref(x0, t, params))

    np.testing.assert_allclose(np.asarray(out), np.asarray(ref),
                               rtol=2e-4, atol=2e-4)

    print("KERNEL_OK")
</pallas_src>

<mosaic_0001>
module attributes {stable_mosaic.version = 11 : i64} {
  func.func @ode_kernel(%arg0: memref<8xf32, #tpu.memory_space<smem>>, %arg1: memref<8x32xf32, #tpu.memory_space<vmem>>, %arg2: memref<96x32xf32, #tpu.memory_space<vmem>>, %arg3: memref<8x32xf32, #tpu.memory_space<vmem>>, %arg4: memref<8x8x32xf32, #tpu.memory_space<vmem>>) attributes {dimension_semantics = [], scalar_prefetch = 0 : i64, scratch_operands = 0 : i64, tpu.core_type = #tpu.core_type<tc>} {
    %c0 = arith.constant 0 : index
    %c0_0 = arith.constant 0 : index
    %0 = vector.load %arg1[%c0, %c0_0] : memref<8x32xf32, #tpu.memory_space<vmem>>, vector<8x32xf32>
    %c0_1 = arith.constant 0 : index
    %c0_2 = arith.constant 0 : index
    %1 = vector.load %arg2[%c0_1, %c0_2] : memref<96x32xf32, #tpu.memory_space<vmem>>, vector<32x32xf32>
    %c32 = arith.constant 32 : index
    %c0_3 = arith.constant 0 : index
    %2 = vector.load %arg2[%c32, %c0_3] : memref<96x32xf32, #tpu.memory_space<vmem>>, vector<32x32xf32>
    %c64 = arith.constant 64 : index
    %c0_4 = arith.constant 0 : index
    %3 = vector.load %arg2[%c64, %c0_4] : memref<96x32xf32, #tpu.memory_space<vmem>>, vector<32x32xf32>
    %c0_5 = arith.constant 0 : index
    %c0_6 = arith.constant 0 : index
    %4 = vector.load %arg3[%c0_5, %c0_6] : memref<8x32xf32, #tpu.memory_space<vmem>>, vector<8x32xf32>
    %5 = vector.extract_strided_slice %4 {offsets = [0, 0], sizes = [1, 32], strides = [1, 1]} : vector<8x32xf32> to vector<1x32xf32>
    %6 = vector.extract_strided_slice %4 {offsets = [1, 0], sizes = [1, 32], strides = [1, 1]} : vector<8x32xf32> to vector<1x32xf32>
    %7 = vector.extract_strided_slice %4 {offsets = [2, 0], sizes = [1, 32], strides = [1, 1]} : vector<8x32xf32> to vector<1x32xf32>
    %cst = arith.constant dense<0.000000e+00> : vector<8x32xf32>
    %8 = tpu.matmul %0, %2, %cst {dimension_numbers = #tpu.dot_dimension_numbers<[1], [0], [0], [1], [0, 0, 1, 1], [], []>} : vector<8x32xf32>, vector<32x32xf32>, vector<8x32xf32> -> vector<8x32xf32>
    %9 = vector.broadcast %6 : vector<1x32xf32> to vector<8x32xf32>
    %10 = arith.addf %8, %9 : vector<8x32xf32>
    %cst_7 = arith.constant dense<0.000000e+00> : vector<32x32xf32>
    %11 = tpu.matmul %3, %1, %cst_7 {dimension_numbers = #tpu.dot_dimension_numbers<[1], [0], [0], [1], [0, 0, 1, 1], [], []>} : vector<32x32xf32>, vector<32x32xf32>, vector<32x32xf32> -> vector<32x32xf32>
    %cst_8 = arith.constant dense<0.000000e+00> : vector<1x32xf32>
    %12 = tpu.matmul %7, %1, %cst_8 {dimension_numbers = #tpu.dot_dimension_numbers<[1], [0], [0], [1], [0, 0, 1, 1], [], []>} : vector<1x32xf32>, vector<32x32xf32>, vector<1x32xf32> -> vector<1x32xf32>
    %cst_9 = arith.constant dense<0.000000e+00> : vector<8x32xf32>
    %13 = tpu.matmul %0, %1, %cst_9 {dimension_numbers = #tpu.dot_dimension_numbers<[1], [0], [0], [1], [0, 0, 1, 1], [], []>} : vector<8x32xf32>, vector<32x32xf32>, vector<8x32xf32> -> vector<8x32xf32>
    %c0_10 = arith.constant 0 : index
    %c0_11 = arith.constant 0 : index
    %c0_12 = arith.constant 0 : index
    %14 = vector.load %arg4[%c0_10, %c0_11, %c0_12] : memref<8x8x32xf32, #tpu.memory_space<vmem>>, vector<1x8x32xf32>
    %15 = vector.shape_cast %14 : vector<1x8x32xf32> to vector<8x32xf32>
    %16 = vector.shape_cast %0 : vector<8x32xf32> to vector<1x8x32xf32>
    tpu.vector_store %arg4[%c0_10, %c0_11, %c0_12], %16 {strides = array<i32>} : memref<8x8x32xf32, #tpu.memory_space<vmem>>, vector<1x8x32xf32>,
    %c0_13 = arith.constant 0 : index
    %17 = memref.load %arg0[%c0_13] : memref<8xf32, #tpu.memory_space<smem>>
    %c1 = arith.constant 1 : index
    %18 = memref.load %arg0[%c1] : memref<8xf32, #tpu.memory_space<smem>>
    %19 = arith.subf %18, %17 : f32
    %cst_14 = arith.constant 2.500000e-01 : f32
    %20 = arith.mulf %19, %cst_14 : f32
    %cst_15 = arith.constant 5.000000e-01 : f32
    %21 = arith.mulf %cst_15, %20 : f32
    %cst_16 = arith.constant 0.166666672 : f32
    %22 = arith.mulf %20, %cst_16 : f32
    %23 = vector.broadcast %20 : f32 to vector<1x32xf32>
    %24 = arith.mulf %23, %5 : vector<1x32xf32>
    %25 = vector.broadcast %21 : f32 to vector<1x32xf32>
    %26 = arith.mulf %25, %5 : vector<1x32xf32>
    %27 = vector.broadcast %21 : f32 to vector<1x32xf32>
    %28 = arith.mulf %27, %12 : vector<1x32xf32>
    %29 = arith.addf %26, %28 : vector<1x32xf32>
    %30 = vector.broadcast %20 : f32 to vector<1x32xf32>
    %31 = arith.mulf %30, %12 : vector<1x32xf32>
    %32 = arith.addf %24, %31 : vector<1x32xf32>
    %33 = vector.broadcast %17 : f32 to vector<1x32xf32>
    %34 = arith.mulf %33, %5 : vector<1x32xf32>
    %35 = vector.broadcast %34 : vector<1x32xf32> to vector<8x32xf32>
    %36 = arith.addf %10, %35 : vector<8x32xf32>
    %37 = vector.broadcast %29 : vector<1x32xf32> to vector<8x32xf32>
    %38 = arith.addf %36, %37 : vector<8x32xf32>
    %39 = vector.broadcast %32 : vector<1x32xf32> to vector<8x32xf32>
    %40 = arith.addf %36, %39 : vector<8x32xf32>
    %41 = arith.addf %13, %36 : vector<8x32xf32>
    %42 = math.tanh %41 : vector<8x32xf32>
    %cst_17 = arith.constant dense<0.000000e+00> : vector<8x32xf32>
    %43 = tpu.matmul %42, %11, %cst_17 {dimension_numbers = #tpu.dot_dimension_numbers<[1], [0], [0], [1], [0, 0, 1, 1], [], []>} : vector<8x32xf32>, vector<32x32xf32>, vector<8x32xf32> -> vector<8x32xf32>
    %44 = vector.broadcast %21 : f32 to vector<8x32xf32>
    %45 = arith.mulf %44, %43 : vector<8x32xf32>
    %46 = arith.addf %13, %45 : vector<8x32xf32>
    %47 = arith.addf %46, %38 : vector<8x32xf32>
    %48 = math.tanh %47 : vector<8x32xf32>
    %cst_18 = arith.constant dense<0.000000e+00> : vector<8x32xf32>
    %49 = tpu.matmul %48, %11, %cst_18 {dimension_numbers = #tpu.dot_dimension_numbers<[1], [0], [0], [1], [0, 0, 1, 1], [], []>} : vector<8x32xf32>, vector<32x32xf32>, vector<8x32xf32> -> vector<8x32xf32>
    %50 = vector.broadcast %21 : f32 to vector<8x32xf32>
    %51 = arith.mulf %50, %49 : vector<8x32xf32>
    %52 = arith.addf %13, %51 : vector<8x32xf32>
    %53 = arith.addf %52, %38 : vector<8x32xf32>
    %54 = math.tanh %53 : vector<8x32xf32>
    %cst_19 = arith.constant dense<0.000000e+00> : vector<8x32xf32>
    %55 = tpu.matmul %54, %11, %cst_19 {dimension_numbers = #tpu.dot_dimension_numbers<[1], [0], [0], [1], [0, 0, 1, 1], [], []>} : vector<8x32xf32>, vector<32x32xf32>, vector<8x32xf32> -> vector<8x32xf32>
    %56 = vector.broadcast %20 : f32 to vector<8x32xf32>
    %57 = arith.mulf %56, %55 : vector<8x32xf32>
    %58 = arith.addf %13, %57 : vector<8x32xf32>
    %59 = arith.addf %58, %40 : vector<8x32xf32>
    %60 = math.tanh %59 : vector<8x32xf32>
    %61 = arith.addf %48, %54 : vector<8x32xf32>
    %cst_20 = arith.constant 2.000000e+00 : f32
    %62 = vector.broadcast %cst_20 : f32 to vector<8x32xf32>
    %63 = arith.mulf %62, %61 : vector<8x32xf32>
    %64 = arith.addf %42, %63 : vector<8x32xf32>
    %65 = arith.addf %64, %60 : vector<8x32xf32>
    %cst_21 = arith.constant dense<0.000000e+00> : vector<8x32xf32>
    %66 = tpu.matmul %65, %11, %cst_21 {dimension_numbers = #tpu.dot_dimension_numbers<[1], [0], [0], [1], [0, 0, 1, 1], [], []>} : vector<8x32xf32>, vector<32x32xf32>, vector<8x32xf32> -> vector<8x32xf32>
    %67 = vector.broadcast %22 : f32 to vector<8x32xf32>
    %68 = arith.mulf %67, %66 : vector<8x32xf32>
    %69 = arith.addf %13, %68 : vector<8x32xf32>
    %70 = vector.broadcast %31 : vector<1x32xf32> to vector<8x32xf32>
    %71 = arith.addf %69, %70 : vector<8x32xf32>
    %cst_22 = arith.constant 1.000000e+00 : f32
    %72 = vector.broadcast %cst_22 : f32 to vector<1x32xf32>
    %73 = arith.mulf %72, %24 : vector<1x32xf32>
    %74 = vector.broadcast %73 : vector<1x32xf32> to vector<8x32xf32>
    %75 = arith.addf %36, %74 : vector<8x32xf32>
    %76 = vector.broadcast %29 : vector<1x32xf32> to vector<8x32xf32>
    %77 = arith.addf %75, %76 : vector<8x32xf32>
    %78 = vector.broadcast %32 : vector<1x32xf32> to vector<8x32xf32>
    %79 = arith.addf %75, %78 : vector<8x32xf32>
    %80 = arith.addf %71, %75 : vector<8x32xf32>
    %81 = math.tanh %80 : vector<8x32xf32>
    %cst_23 = arith.constant dense<0.000000e+00> : vector<8x32xf32>
    %82 = tpu.matmul %81, %11, %cst_23 {dimension_numbers = #tpu.dot_dimension_numbers<[1], [0], [0], [1], [0, 0, 1, 1], [], []>} : vector<8x32xf32>, vector<32x32xf32>, vector<8x32xf32> -> vector<8x32xf32>
    %83 = vector.broadcast %21 : f32 to vector<8x32xf32>
    %84 = arith.mulf %83, %82 : vector<8x32xf32>
    %85 = arith.addf %71, %84 : vector<8x32xf32>
    %86 = arith.addf %85, %77 : vector<8x32xf32>
    %87 = math.tanh %86 : vector<8x32xf32>
    %cst_24 = arith.constant dense<0.000000e+00> : vector<8x32xf32>
    %88 = tpu.matmul %87, %11, %cst_24 {dimension_numbers = #tpu.dot_dimension_numbers<[1], [0], [0], [1], [0, 0, 1, 1], [], []>} : vector<8x32xf32>, vector<32x32xf32>, vector<8x32xf32> -> vector<8x32xf32>
    %89 = vector.broadcast %21 : f32 to vector<8x32xf32>
    %90 = arith.mulf %89, %88 : vector<8x32xf32>
    %91 = arith.addf %71, %90 : vector<8x32xf32>
    %92 = arith.addf %91, %77 : vector<8x32xf32>
    %93 = math.tanh %92 : vector<8x32xf32>
    %cst_25 = arith.constant dense<0.000000e+00> : vector<8x32xf32>
    %94 = tpu.matmul %93, %11, %cst_25 {dimension_numbers = #tpu.dot_dimension_numbers<[1], [0], [0], [1], [0, 0, 1, 1], [], []>} : vector<8x32xf32>, vector<32x32xf32>, vector<8x32xf32> -> vector<8x32xf32>
    %95 = vector.broadcast %20 : f32 to vector<8x32xf32>
    %96 = arith.mulf %95, %94 : vector<8x32xf32>
    %97 = arith.addf %71, %96 : vector<8x32xf32>
    %98 = arith.addf %97, %79 : vector<8x32xf32>
    %99 = math.tanh %98 : vector<8x32xf32>
    %100 = arith.addf %87, %93 : vector<8x32xf32>
    %cst_26 = arith.constant 2.000000e+00 : f32
    %101 = vector.broadcast %cst_26 : f32 to vector<8x32xf32>
    %102 = arith.mulf %101, %100 : vector<8x32xf32>
    %103 = arith.addf %81, %102 : vector<8x32xf32>
    %104 = arith.addf %103, %99 : vector<8x32xf32>
    %cst_27 = arith.constant dense<0.000000e+00> : vector<8x32xf32>
    %105 = tpu.matmul %104, %11, %cst_27 {dimension_numbers = #tpu.dot_dimension_numbers<[1], [0], [0], [1], [0, 0, 1, 1], [], []>} : vector<8x32xf32>, vector<32x32xf32>, vector<8x32xf32> -> vector<8x32xf32>
    %106 = vector.broadcast %22 : f32 to vector<8x32xf32>
    %107 = arith.mulf %106, %105 : vector<8x32xf32>
    %108 = arith.addf %71, %107 : vector<8x32xf32>
    %109 = vector.broadcast %31 : vector<1x32xf32> to vector<8x32xf32>
    %110 = arith.addf %108, %109 : vector<8x32xf32>
    %111 = arith.addf %65, %104 : vector<8x32xf32>
    %cst_28 = arith.constant 2.000000e+00 : f32
    %112 = vector.broadcast %cst_28 : f32 to vector<1x32xf32>
    %113 = arith.mulf %112, %24 : vector<1x32xf32>
    %114 = vector.broadcast %113 : vector<1x32xf32> to vector<8x32xf32>
    %115 = arith.addf %36, %114 : vector<8x32xf32>
    %116 = vector.broadcast %29 : vector<1x32xf32> to vector<8x32xf32>
    %117 = arith.addf %115, %116 : vector<8x32xf32>
    %118 = vector.broadcast %32 : vector<1x32xf32> to vector<8x32xf32>
    %119 = arith.addf %115, %118 : vector<8x32xf32>
    %120 = arith.addf %110, %115 : vector<8x32xf32>
    %121 = math.tanh %120 : vector<8x32xf32>
    %cst_29 = arith.constant dense<0.000000e+00> : vector<8x32xf32>
    %122 = tpu.matmul %121, %11, %cst_29 {dimension_numbers = #tpu.dot_dimension_numbers<[1], [0], [0], [1], [0, 0, 1, 1], [], []>} : vector<8x32xf32>, vector<32x32xf32>, vector<8x32xf32> -> vector<8x32xf32>
    %123 = vector.broadcast %21 : f32 to vector<8x32xf32>
    %124 = arith.mulf %123, %122 : vector<8x32xf32>
    %125 = arith.addf %110, %124 : vector<8x32xf32>
    %126 = arith.addf %125, %117 : vector<8x32xf32>
    %127 = math.tanh %126 : vector<8x32xf32>
    %cst_30 = arith.constant dense<0.000000e+00> : vector<8x32xf32>
    %128 = tpu.matmul %127, %11, %cst_30 {dimension_numbers = #tpu.dot_dimension_numbers<[1], [0], [0], [1], [0, 0, 1, 1], [], []>} : vector<8x32xf32>, vector<32x32xf32>, vector<8x32xf32> -> vector<8x32xf32>
    %129 = vector.broadcast %21 : f32 to vector<8x32xf32>
    %130 = arith.mulf %129, %128 : vector<8x32xf32>
    %131 = arith.addf %110, %130 : vector<8x32xf32>
    %132 = arith.addf %131, %117 : vector<8x32xf32>
    %133 = math.tanh %132 : vector<8x32xf32>
    %cst_31 = arith.constant dense<0.000000e+00> : vector<8x32xf32>
    %134 = tpu.matmul %133, %11, %cst_31 {dimension_numbers = #tpu.dot_dimension_numbers<[1], [0], [0], [1], [0, 0, 1, 1], [], []>} : vector<8x32xf32>, vector<32x32xf32>, vector<8x32xf32> -> vector<8x32xf32>
    %135 = vector.broadcast %20 : f32 to vector<8x32xf32>
    %136 = arith.mulf %135, %134 : vector<8x32xf32>
    %137 = arith.addf %110, %136 : vector<8x32xf32>
    %138 = arith.addf %137, %119 : vector<8x32xf32>
    %139 = math.tanh %138 : vector<8x32xf32>
    %140 = arith.addf %127, %133 : vector<8x32xf32>
    %cst_32 = arith.constant 2.000000e+00 : f32
    %141 = vector.broadcast %cst_32 : f32 to vector<8x32xf32>
    %142 = arith.mulf %141, %140 : vector<8x32xf32>
    %143 = arith.addf %121, %142 : vector<8x32xf32>
    %144 = arith.addf %143, %139 : vector<8x32xf32>
    %cst_33 = arith.constant dense<0.000000e+00> : vector<8x32xf32>
    %145 = tpu.matmul %144, %11, %cst_33 {dimension_numbers = #tpu.dot_dimension_numbers<[1], [0], [0], [1], [0, 0, 1, 1], [], []>} : vector<8x32xf32>, vector<32x32xf32>, vector<8x32xf32> -> vector<8x32xf32>
    %146 = vector.broadcast %22 : f32 to vector<8x32xf32>
    %147 = arith.mulf %146, %145 : vector<8x32xf32>
    %148 = arith.addf %110, %147 : vector<8x32xf32>
    %149 = vector.broadcast %31 : vector<1x32xf32> to vector<8x32xf32>
    %150 = arith.addf %148, %149 : vector<8x32xf32>
    %151 = arith.addf %111, %144 : vector<8x32xf32>
    %cst_34 = arith.constant 3.000000e+00 : f32
    %152 = vector.broadcast %cst_34 : f32 to vector<1x32xf32>
    %153 = arith.mulf %152, %24 : vector<1x32xf32>
    %154 = vector.broadcast %153 : vector<1x32xf32> to vector<8x32xf32>
    %155 = arith.addf %36, %154 : vector<8x32xf32>
    %156 = vector.broadcast %29 : vector<1x32xf32> to vector<8x32xf32>
    %157 = arith.addf %155, %156 : vector<8x32xf32>
    %158 = vector.broadcast %32 : vector<1x32xf32> to vector<8x32xf32>
    %159 = arith.addf %155, %158 : vector<8x32xf32>
    %160 = arith.addf %150, %155 : vector<8x32xf32>
    %161 = math.tanh %160 : vector<8x32xf32>
    %cst_35 = arith.constant dense<0.000000e+00> : vector<8x32xf32>
    %162 = tpu.matmul %161, %11, %cst_35 {dimension_numbers = #tpu.dot_dimension_numbers<[1], [0], [0], [1], [0, 0, 1, 1], [], []>} : vector<8x32xf32>, vector<32x32xf32>, vector<8x32xf32> -> vector<8x32xf32>
    %163 = vector.broadcast %21 : f32 to vector<8x32xf32>
    %164 = arith.mulf %163, %162 : vector<8x32xf32>
    %165 = arith.addf %150, %164 : vector<8x32xf32>
    %166 = arith.addf %165, %157 : vector<8x32xf32>
    %167 = math.tanh %166 : vector<8x32xf32>
    %cst_36 = arith.constant dense<0.000000e+00> : vector<8x32xf32>
    %168 = tpu.matmul %167, %11, %cst_36 {dimension_numbers = #tpu.dot_dimension_numbers<[1], [0], [0], [1], [0, 0, 1, 1], [], []>} : vector<8x32xf32>, vector<32x32xf32>, vector<8x32xf32> -> vector<8x32xf32>
    %169 = vector.broadcast %21 : f32 to vector<8x32xf32>
    %170 = arith.mulf %169, %168 : vector<8x32xf32>
    %171 = arith.addf %150, %170 : vector<8x32xf32>
    %172 = arith.addf %171, %157 : vector<8x32xf32>
    %173 = math.tanh %172 : vector<8x32xf32>
    %cst_37 = arith.constant dense<0.000000e+00> : vector<8x32xf32>
    %174 = tpu.matmul %173, %11, %cst_37 {dimension_numbers = #tpu.dot_dimension_numbers<[1], [0], [0], [1], [0, 0, 1, 1], [], []>} : vector<8x32xf32>, vector<32x32xf32>, vector<8x32xf32> -> vector<8x32xf32>
    %175 = vector.broadcast %20 : f32 to vector<8x32xf32>
    %176 = arith.mulf %175, %174 : vector<8x32xf32>
    %177 = arith.addf %150, %176 : vector<8x32xf32>
    %178 = arith.addf %177, %159 : vector<8x32xf32>
    %179 = math.tanh %178 : vector<8x32xf32>
    %180 = arith.addf %167, %173 : vector<8x32xf32>
    %cst_38 = arith.constant 2.000000e+00 : f32
    %181 = vector.broadcast %cst_38 : f32 to vector<8x32xf32>
    %182 = arith.mulf %181, %180 : vector<8x32xf32>
    %183 = arith.addf %161, %182 : vector<8x32xf32>
    %184 = arith.addf %183, %179 : vector<8x32xf32>
    %cst_39 = arith.constant dense<0.000000e+00> : vector<8x32xf32>
    %185 = tpu.matmul %184, %11, %cst_39 {dimension_numbers = #tpu.dot_dimension_numbers<[1], [0], [0], [1], [0, 0, 1, 1], [], []>} : vector<8x32xf32>, vector<32x32xf32>, vector<8x32xf32> -> vector<8x32xf32>
    %186 = vector.broadcast %22 : f32 to vector<8x32xf32>
    %187 = arith.mulf %186, %185 : vector<8x32xf32>
    %188 = arith.addf %150, %187 : vector<8x32xf32>
    %189 = vector.broadcast %31 : vector<1x32xf32> to vector<8x32xf32>
    %190 = arith.addf %188, %189 : vector<8x32xf32>
    %191 = arith.addf %151, %184 : vector<8x32xf32>
    %cst_40 = arith.constant dense<0.000000e+00> : vector<8x32xf32>
    %192 = tpu.matmul %191, %3, %cst_40 {dimension_numbers = #tpu.dot_dimension_numbers<[1], [0], [0], [1], [0, 0, 1, 1], [], []>} : vector<8x32xf32>, vector<32x32xf32>, vector<8x32xf32> -> vector<8x32xf32>
    %193 = vector.broadcast %22 : f32 to vector<8x32xf32>
    %194 = arith.mulf %193, %192 : vector<8x32xf32>
    %195 = arith.addf %0, %194 : vector<8x32xf32>
    %cst_41 = arith.constant 4.000000e+00 : f32
    %196 = arith.mulf %cst_41, %20 : f32
    %197 = vector.broadcast %196 : f32 to vector<1x32xf32>
    %198 = arith.mulf %197, %7 : vector<1x32xf32>
    %199 = vector.broadcast %198 : vector<1x32xf32> to vector<8x32xf32>
    %200 = arith.addf %195, %199 : vector<8x32xf32>
    %c1_42 = arith.constant 1 : index
    %c0_43 = arith.constant 0 : index
    %c0_44 = arith.constant 0 : index
    %201 = vector.load %arg4[%c1_42, %c0_43, %c0_44] : memref<8x8x32xf32, #tpu.memory_space<vmem>>, vector<1x8x32xf32>
    %202 = vector.shape_cast %201 : vector<1x8x32xf32> to vector<8x32xf32>
    %203 = vector.shape_cast %200 : vector<8x32xf32> to vector<1x8x32xf32>
    tpu.vector_store %arg4[%c1_42, %c0_43, %c0_44], %203 {strides = array<i32>} : memref<8x8x32xf32, #tpu.memory_space<vmem>>, vector<1x8x32xf32>,
    %c1_45 = arith.constant 1 : index
    %204 = memref.load %arg0[%c1_45] : memref<8xf32, #tpu.memory_space<smem>>
    %c2 = arith.constant 2 : index
    %205 = memref.load %arg0[%c2] : memref<8xf32, #tpu.memory_space<smem>>
    %206 = arith.subf %205, %204 : f32
    %cst_46 = arith.constant 2.500000e-01 : f32
    %207 = arith.mulf %206, %cst_46 : f32
    %cst_47 = arith.constant 5.000000e-01 : f32
    %208 = arith.mulf %cst_47, %207 : f32
    %cst_48 = arith.constant 0.166666672 : f32
    %209 = arith.mulf %207, %cst_48 : f32
    %210 = vector.broadcast %207 : f32 to vector<1x32xf32>
    %211 = arith.mulf %210, %5 : vector<1x32xf32>
    %212 = vector.broadcast %208 : f32 to vector<1x32xf32>
    %213 = arith.mulf %212, %5 : vector<1x32xf32>
    %214 = vector.broadcast %208 : f32 to vector<1x32xf32>
    %215 = arith.mulf %214, %12 : vector<1x32xf32>
    %216 = arith.addf %213, %215 : vector<1x32xf32>
    %217 = vector.broadcast %207 : f32 to vector<1x32xf32>
    %218 = arith.mulf %217, %12 : vector<1x32xf32>
    %219 = arith.addf %211, %218 : vector<1x32xf32>
    %220 = vector.broadcast %204 : f32 to vector<1x32xf32>
    %221 = arith.mulf %220, %5 : vector<1x32xf32>
    %222 = vector.broadcast %221 : vector<1x32xf32> to vector<8x32xf32>
    %223 = arith.addf %10, %222 : vector<8x32xf32>
    %224 = vector.broadcast %216 : vector<1x32xf32> to vector<8x32xf32>
    %225 = arith.addf %223, %224 : vector<8x32xf32>
    %226 = vector.broadcast %219 : vector<1x32xf32> to vector<8x32xf32>
    %227 = arith.addf %223, %226 : vector<8x32xf32>
    %228 = arith.addf %190, %223 : vector<8x32xf32>
    %229 = math.tanh %228 : vector<8x32xf32>
    %cst_49 = arith.constant dense<0.000000e+00> : vector<8x32xf32>
    %230 = tpu.matmul %229, %11, %cst_49 {dimension_numbers = #tpu.dot_dimension_numbers<[1], [0], [0], [1], [0, 0, 1, 1], [], []>} : vector<8x32xf32>, vector<32x32xf32>, vector<8x32xf32> -> vector<8x32xf32>
    %231 = vector.broadcast %208 : f32 to vector<8x32xf32>
    %232 = arith.mulf %231, %230 : vector<8x32xf32>
    %233 = arith.addf %190, %232 : vector<8x32xf32>
    %234 = arith.addf %233, %225 : vector<8x32xf32>
    %235 = math.tanh %234 : vector<8x32xf32>
    %cst_50 = arith.constant dense<0.000000e+00> : vector<8x32xf32>
    %236 = tpu.matmul %235, %11, %cst_50 {dimension_numbers = #tpu.dot_dimension_numbers<[1], [0], [0], [1], [0, 0, 1, 1], [], []>} : vector<8x32xf32>, vector<32x32xf32>, vector<8x32xf32> -> vector<8x32xf32>
    %237 = vector.broadcast %208 : f32 to vector<8x32xf32>
    %238 = arith.mulf %237, %236 : vector<8x32xf32>
    %239 = arith.addf %190, %238 : vector<8x32xf32>
    %240 = arith.addf %239, %225 : vector<8x32xf32>
    %241 = math.tanh %240 : vector<8x32xf32>
    %cst_51 = arith.constant dense<0.000000e+00> : vector<8x32xf32>
    %242 = tpu.matmul %241, %11, %cst_51 {dimension_numbers = #tpu.dot_dimension_numbers<[1], [0], [0], [1], [0, 0, 1, 1], [], []>} : vector<8x32xf32>, vector<32x32xf32>, vector<8x32xf32> -> vector<8x32xf32>
    %243 = vector.broadcast %207 : f32 to vector<8x32xf32>
    %244 = arith.mulf %243, %242 : vector<8x32xf32>
    %245 = arith.addf %190, %244 : vector<8x32xf32>
    %246 = arith.addf %245, %227 : vector<8x32xf32>
    %247 = math.tanh %246 : vector<8x32xf32>
    %248 = arith.addf %235, %241 : vector<8x32xf32>
    %cst_52 = arith.constant 2.000000e+00 : f32
    %249 = vector.broadcast %cst_52 : f32 to vector<8x32xf32>
    %250 = arith.mulf %249, %248 : vector<8x32xf32>
    %251 = arith.addf %229, %250 : vector<8x32xf32>
    %252 = arith.addf %251, %247 : vector<8x32xf32>
    %cst_53 = arith.constant dense<0.000000e+00> : vector<8x32xf32>
    %253 = tpu.matmul %252, %11, %cst_53 {dimension_numbers = #tpu.dot_dimension_numbers<[1], [0], [0], [1], [0, 0, 1, 1], [], []>} : vector<8x32xf32>, vector<32x32xf32>, vector<8x32xf32> -> vector<8x32xf32>
    %254 = vector.broadcast %209 : f32 to vector<8x32xf32>
    %255 = arith.mulf %254, %253 : vector<8x32xf32>
    %256 = arith.addf %190, %255 : vector<8x32xf32>
    %257 = vector.broadcast %218 : vector<1x32xf32> to vector<8x32xf32>
    %258 = arith.addf %256, %257 : vector<8x32xf32>
    %cst_54 = arith.constant 1.000000e+00 : f32
    %259 = vector.broadcast %cst_54 : f32 to vector<1x32xf32>
    %260 = arith.mulf %259, %211 : vector<1x32xf32>
    %261 = vector.broadcast %260 : vector<1x32xf32> to vector<8x32xf32>
    %262 = arith.addf %223, %261 : vector<8x32xf32>
    %263 = vector.broadcast %216 : vector<1x32xf32> to vector<8x32xf32>
    %264 = arith.addf %262, %263 : vector<8x32xf32>
    %265 = vector.broadcast %219 : vector<1x32xf32> to vector<8x32xf32>
    %266 = arith.addf %262, %265 : vector<8x32xf32>
    %267 = arith.addf %258, %262 : vector<8x32xf32>
    %268 = math.tanh %267 : vector<8x32xf32>
    %cst_55 = arith.constant dense<0.000000e+00> : vector<8x32xf32>
    %269 = tpu.matmul %268, %11, %cst_55 {dimension_numbers = #tpu.dot_dimension_numbers<[1], [0], [0], [1], [0, 0, 1, 1], [], []>} : vector<8x32xf32>, vector<32x32xf32>, vector<8x32xf32> -> vector<8x32xf32>
    %270 = vector.broadcast %208 : f32 to vector<8x32xf32>
    %271 = arith.mulf %270, %269 : vector<8x32xf32>
    %272 = arith.addf %258, %271 : vector<8x32xf32>
    %273 = arith.addf %272, %264 : vector<8x32xf32>
    %274 = math.tanh %273 : vector<8x32xf32>
    %cst_56 = arith.constant dense<0.000000e+00> : vector<8x32xf32>
    %275 = tpu.matmul %274, %11, %cst_56 {dimension_numbers = #tpu.dot_dimension_numbers<[1], [0], [0], [1], [0, 0, 1, 1], [], []>} : vector<8x32xf32>, vector<32x32xf32>, vector<8x32xf32> -> vector<8x32xf32>
    %276 = vector.broadcast %208 : f32 to vector<8x32xf32>
    %277 = arith.mulf %276, %275 : vector<8x32xf32>
    %278 = arith.addf %258, %277 : vector<8x32xf32>
    %279 = arith.addf %278, %264 : vector<8x32xf32>
    %280 = math.tanh %279 : vector<8x32xf32>
    %cst_57 = arith.constant dense<0.000000e+00> : vector<8x32xf32>
    %281 = tpu.matmul %280, %11, %cst_57 {dimension_numbers = #tpu.dot_dimension_numbers<[1], [0], [0], [1], [0, 0, 1, 1], [], []>} : vector<8x32xf32>, vector<32x32xf32>, vector<8x32xf32> -> vector<8x32xf32>
    %282 = vector.broadcast %207 : f32 to vector<8x32xf32>
    %283 = arith.mulf %282, %281 : vector<8x32xf32>
    %284 = arith.addf %258, %283 : vector<8x32xf32>
    %285 = arith.addf %284, %266 : vector<8x32xf32>
    %286 = math.tanh %285 : vector<8x32xf32>
    %287 = arith.addf %274, %280 : vector<8x32xf32>
    %cst_58 = arith.constant 2.000000e+00 : f32
    %288 = vector.broadcast %cst_58 : f32 to vector<8x32xf32>
    %289 = arith.mulf %288, %287 : vector<8x32xf32>
    %290 = arith.addf %268, %289 : vector<8x32xf32>
    %291 = arith.addf %290, %286 : vector<8x32xf32>
    %cst_59 = arith.constant dense<0.000000e+00> : vector<8x32xf32>
    %292 = tpu.matmul %291, %11, %cst_59 {dimension_numbers = #tpu.dot_dimension_numbers<[1], [0], [0], [1], [0, 0, 1, 1], [], []>} : vector<8x32xf32>, vector<32x32xf32>, vector<8x32xf32> -> vector<8x32xf32>
    %293 = vector.broadcast %209 : f32 to vector<8x32xf32>
    %294 = arith.mulf %293, %292 : vector<8x32xf32>
    %295 = arith.addf %258, %294 : vector<8x32xf32>
    %296 = vector.broadcast %218 : vector<1x32xf32> to vector<8x32xf32>
    %297 = arith.addf %295, %296 : vector<8x32xf32>
    %298 = arith.addf %252, %291 : vector<8x32xf32>
    %cst_60 = arith.constant 2.000000e+00 : f32
    %299 = vector.broadcast %cst_60 : f32 to vector<1x32xf32>
    %300 = arith.mulf %299, %211 : vector<1x32xf32>
    %301 = vector.broadcast %300 : vector<1x32xf32> to vector<8x32xf32>
    %302 = arith.addf %223, %301 : vector<8x32xf32>
    %303 = vector.broadcast %216 : vector<1x32xf32> to vector<8x32xf32>
    %304 = arith.addf %302, %303 : vector<8x32xf32>
    %305 = vector.broadcast %219 : vector<1x32xf32> to vector<8x32xf32>
    %306 = arith.addf %302, %305 : vector<8x32xf32>
    %307 = arith.addf %297, %302 : vector<8x32xf32>
    %308 = math.tanh %307 : vector<8x32xf32>
    %cst_61 = arith.constant dense<0.000000e+00> : vector<8x32xf32>
    %309 = tpu.matmul %308, %11, %cst_61 {dimension_numbers = #tpu.dot_dimension_numbers<[1], [0], [0], [1], [0, 0, 1, 1], [], []>} : vector<8x32xf32>, vector<32x32xf32>, vector<8x32xf32> -> vector<8x32xf32>
    %310 = vector.broadcast %208 : f32 to vector<8x32xf32>
    %311 = arith.mulf %310, %309 : vector<8x32xf32>
    %312 = arith.addf %297, %311 : vector<8x32xf32>
    %313 = arith.addf %312, %304 : vector<8x32xf32>
    %314 = math.tanh %313 : vector<8x32xf32>
    %cst_62 = arith.constant dense<0.000000e+00> : vector<8x32xf32>
    %315 = tpu.matmul %314, %11, %cst_62 {dimension_numbers = #tpu.dot_dimension_numbers<[1], [0], [0], [1], [0, 0, 1, 1], [], []>} : vector<8x32xf32>, vector<32x32xf32>, vector<8x32xf32> -> vector<8x32xf32>
    %316 = vector.broadcast %208 : f32 to vector<8x32xf32>
    %317 = arith.mulf %316, %315 : vector<8x32xf32>
    %318 = arith.addf %297, %317 : vector<8x32xf32>
    %319 = arith.addf %318, %304 : vector<8x32xf32>
    %320 = math.tanh %319 : vector<8x32xf32>
    %cst_63 = arith.constant dense<0.000000e+00> : vector<8x32xf32>
    %321 = tpu.matmul %320, %11, %cst_63 {dimension_numbers = #tpu.dot_dimension_numbers<[1], [0], [0], [1], [0, 0, 1, 1], [], []>} : vector<8x32xf32>, vector<32x32xf32>, vector<8x32xf32> -> vector<8x32xf32>
    %322 = vector.broadcast %207 : f32 to vector<8x32xf32>
    %323 = arith.mulf %322, %321 : vector<8x32xf32>
    %324 = arith.addf %297, %323 : vector<8x32xf32>
    %325 = arith.addf %324, %306 : vector<8x32xf32>
    %326 = math.tanh %325 : vector<8x32xf32>
    %327 = arith.addf %314, %320 : vector<8x32xf32>
    %cst_64 = arith.constant 2.000000e+00 : f32
    %328 = vector.broadcast %cst_64 : f32 to vector<8x32xf32>
    %329 = arith.mulf %328, %327 : vector<8x32xf32>
    %330 = arith.addf %308, %329 : vector<8x32xf32>
    %331 = arith.addf %330, %326 : vector<8x32xf32>
    %cst_65 = arith.constant dense<0.000000e+00> : vector<8x32xf32>
    %332 = tpu.matmul %331, %11, %cst_65 {dimension_numbers = #tpu.dot_dimension_numbers<[1], [0], [0], [1], [0, 0, 1, 1], [], []>} : vector<8x32xf32>, vector<32x32xf32>, vector<8x32xf32> -> vector<8x32xf32>
    %333 = vector.broadcast %209 : f32 to vector<8x32xf32>
    %334 = arith.mulf %333, %332 : vector<8x32xf32>
    %335 = arith.addf %297, %334 : vector<8x32xf32>
    %336 = vector.broadcast %218 : vector<1x32xf32> to vector<8x32xf32>
    %337 = arith.addf %335, %336 : vector<8x32xf32>
    %338 = arith.addf %298, %331 : vector<8x32xf32>
    %cst_66 = arith.constant 3.000000e+00 : f32
    %339 = vector.broadcast %cst_66 : f32 to vector<1x32xf32>
    %340 = arith.mulf %339, %211 : vector<1x32xf32>
    %341 = vector.broadcast %340 : vector<1x32xf32> to vector<8x32xf32>
    %342 = arith.addf %223, %341 : vector<8x32xf32>
    %343 = vector.broadcast %216 : vector<1x32xf32> to vector<8x32xf32>
    %344 = arith.addf %342, %343 : vector<8x32xf32>
    %345 = vector.broadcast %219 : vector<1x32xf32> to vector<8x32xf32>
    %346 = arith.addf %342, %345 : vector<8x32xf32>
    %347 = arith.addf %337, %342 : vector<8x32xf32>
    %348 = math.tanh %347 : vector<8x32xf32>
    %cst_67 = arith.constant dense<0.000000e+00> : vector<8x32xf32>
    %349 = tpu.matmul %348, %11, %cst_67 {dimension_numbers = #tpu.dot_dimension_numbers<[1], [0], [0], [1], [0, 0, 1, 1], [], []>} : vector<8x32xf32>, vector<32x32xf32>, vector<8x32xf32> -> vector<8x32xf32>
    %350 = vector.broadcast %208 : f32 to vector<8x32xf32>
    %351 = arith.mulf %350, %349 : vector<8x32xf32>
    %352 = arith.addf %337, %351 : vector<8x32xf32>
    %353 = arith.addf %352, %344 : vector<8x32xf32>
    %354 = math.tanh %353 : vector<8x32xf32>
    %cst_68 = arith.constant dense<0.000000e+00> : vector<8x32xf32>
    %355 = tpu.matmul %354, %11, %cst_68 {dimension_numbers = #tpu.dot_dimension_numbers<[1], [0], [0], [1], [0, 0, 1, 1], [], []>} : vector<8x32xf32>, vector<32x32xf32>, vector<8x32xf32> -> vector<8x32xf32>
    %356 = vector.broadcast %208 : f32 to vector<8x32xf32>
    %357 = arith.mulf %356, %355 : vector<8x32xf32>
    %358 = arith.addf %337, %357 : vector<8x32xf32>
    %359 = arith.addf %358, %344 : vector<8x32xf32>
    %360 = math.tanh %359 : vector<8x32xf32>
    %cst_69 = arith.constant dense<0.000000e+00> : vector<8x32xf32>
    %361 = tpu.matmul %360, %11, %cst_69 {dimension_numbers = #tpu.dot_dimension_numbers<[1], [0], [0], [1], [0, 0, 1, 1], [], []>} : vector<8x32xf32>, vector<32x32xf32>, vector<8x32xf32> -> vector<8x32xf32>
    %362 = vector.broadcast %207 : f32 to vector<8x32xf32>
    %363 = arith.mulf %362, %361 : vector<8x32xf32>
    %364 = arith.addf %337, %363 : vector<8x32xf32>
    %365 = arith.addf %364, %346 : vector<8x32xf32>
    %366 = math.tanh %365 : vector<8x32xf32>
    %367 = arith.addf %354, %360 : vector<8x32xf32>
    %cst_70 = arith.constant 2.000000e+00 : f32
    %368 = vector.broadcast %cst_70 : f32 to vector<8x32xf32>
    %369 = arith.mulf %368, %367 : vector<8x32xf32>
    %370 = arith.addf %348, %369 : vector<8x32xf32>
    %371 = arith.addf %370, %366 : vector<8x32xf32>
    %cst_71 = arith.constant dense<0.000000e+00> : vector<8x32xf32>
    %372 = tpu.matmul %371, %11, %cst_71 {dimension_numbers = #tpu.dot_dimension_numbers<[1], [0], [0], [1], [0, 0, 1, 1], [], []>} : vector<8x32xf32>, vector<32x32xf32>, vector<8x32xf32> -> vector<8x32xf32>
    %373 = vector.broadcast %209 : f32 to vector<8x32xf32>
    %374 = arith.mulf %373, %372 : vector<8x32xf32>
    %375 = arith.addf %337, %374 : vector<8x32xf32>
    %376 = vector.broadcast %218 : vector<1x32xf32> to vector<8x32xf32>
    %377 = arith.addf %375, %376 : vector<8x32xf32>
    %378 = arith.addf %338, %371 : vector<8x32xf32>
    %cst_72 = arith.constant dense<0.000000e+00> : vector<8x32xf32>
    %379 = tpu.matmul %378, %3, %cst_72 {dimension_numbers = #tpu.dot_dimension_numbers<[1], [0], [0], [1], [0, 0, 1, 1], [], []>} : vector<8x32xf32>, vector<32x32xf32>, vector<8x32xf32> -> vector<8x32xf32>
    %380 = vector.broadcast %209 : f32 to vector<8x32xf32>
    %381 = arith.mulf %380, %379 : vector<8x32xf32>
    %382 = arith.addf %200, %381 : vector<8x32xf32>
    %cst_73 = arith.constant 4.000000e+00 : f32
    %383 = arith.mulf %cst_73, %207 : f32
    %384 = vector.broadcast %383 : f32 to vector<1x32xf32>
    %385 = arith.mulf %384, %7 : vector<1x32xf32>
    %386 = vector.broadcast %385 : vector<1x32xf32> to vector<8x32xf32>
    %387 = arith.addf %382, %386 : vector<8x32xf32>
    %c2_74 = arith.constant 2 : index
    %c0_75 = arith.constant 0 : index
    %c0_76 = arith.constant 0 : index
    %388 = vector.load %arg4[%c2_74, %c0_75, %c0_76] : memref<8x8x32xf32, #tpu.memory_space<vmem>>, vector<1x8x32xf32>
    %389 = vector.shape_cast %388 : vector<1x8x32xf32> to vector<8x32xf32>
    %390 = vector.shape_cast %387 : vector<8x32xf32> to vector<1x8x32xf32>
    tpu.vector_store %arg4[%c2_74, %c0_75, %c0_76], %390 {strides = array<i32>} : memref<8x8x32xf32, #tpu.memory_space<vmem>>, vector<1x8x32xf32>,
    %c2_77 = arith.constant 2 : index
    %391 = memref.load %arg0[%c2_77] : memref<8xf32, #tpu.memory_space<smem>>
    %c3 = arith.constant 3 : index
    %392 = memref.load %arg0[%c3] : memref<8xf32, #tpu.memory_space<smem>>
    %393 = arith.subf %392, %391 : f32
    %cst_78 = arith.constant 2.500000e-01 : f32
    %394 = arith.mulf %393, %cst_78 : f32
    %cst_79 = arith.constant 5.000000e-01 : f32
    %395 = arith.mulf %cst_79, %394 : f32
    %cst_80 = arith.constant 0.166666672 : f32
    %396 = arith.mulf %394, %cst_80 : f32
    %397 = vector.broadcast %394 : f32 to vector<1x32xf32>
    %398 = arith.mulf %397, %5 : vector<1x32xf32>
    %399 = vector.broadcast %395 : f32 to vector<1x32xf32>
    %400 = arith.mulf %399, %5 : vector<1x32xf32>
    %401 = vector.broadcast %395 : f32 to vector<1x32xf32>
    %402 = arith.mulf %401, %12 : vector<1x32xf32>
    %403 = arith.addf %400, %402 : vector<1x32xf32>
    %404 = vector.broadcast %394 : f32 to vector<1x32xf32>
    %405 = arith.mulf %404, %12 : vector<1x32xf32>
    %406 = arith.addf %398, %405 : vector<1x32xf32>
    %407 = vector.broadcast %391 : f32 to vector<1x32xf32>
    %408 = arith.mulf %407, %5 : vector<1x32xf32>
    %409 = vector.broadcast %408 : vector<1x32xf32> to vector<8x32xf32>
    %410 = arith.addf %10, %409 : vector<8x32xf32>
    %411 = vector.broadcast %403 : vector<1x32xf32> to vector<8x32xf32>
    %412 = arith.addf %410, %411 : vector<8x32xf32>
    %413 = vector.broadcast %406 : vector<1x32xf32> to vector<8x32xf32>
    %414 = arith.addf %410, %413 : vector<8x32xf32>
    %415 = arith.addf %377, %410 : vector<8x32xf32>
    %416 = math.tanh %415 : vector<8x32xf32>
    %cst_81 = arith.constant dense<0.000000e+00> : vector<8x32xf32>
    %417 = tpu.matmul %416, %11, %cst_81 {dimension_numbers = #tpu.dot_dimension_numbers<[1], [0], [0], [1], [0, 0, 1, 1], [], []>} : vector<8x32xf32>, vector<32x32xf32>, vector<8x32xf32> -> vector<8x32xf32>
    %418 = vector.broadcast %395 : f32 to vector<8x32xf32>
    %419 = arith.mulf %418, %417 : vector<8x32xf32>
    %420 = arith.addf %377, %419 : vector<8x32xf32>
    %421 = arith.addf %420, %412 : vector<8x32xf32>
    %422 = math.tanh %421 : vector<8x32xf32>
    %cst_82 = arith.constant dense<0.000000e+00> : vector<8x32xf32>
    %423 = tpu.matmul %422, %11, %cst_82 {dimension_numbers = #tpu.dot_dimension_numbers<[1], [0], [0], [1], [0, 0, 1, 1], [], []>} : vector<8x32xf32>, vector<32x32xf32>, vector<8x32xf32> -> vector<8x32xf32>
    %424 = vector.broadcast %395 : f32 to vector<8x32xf32>
    %425 = arith.mulf %424, %423 : vector<8x32xf32>
    %426 = arith.addf %377, %425 : vector<8x32xf32>
    %427 = arith.addf %426, %412 : vector<8x32xf32>
    %428 = math.tanh %427 : vector<8x32xf32>
    %cst_83 = arith.constant dense<0.000000e+00> : vector<8x32xf32>
    %429 = tpu.matmul %428, %11, %cst_83 {dimension_numbers = #tpu.dot_dimension_numbers<[1], [0], [0], [1], [0, 0, 1, 1], [], []>} : vector<8x32xf32>, vector<32x32xf32>, vector<8x32xf32> -> vector<8x32xf32>
    %430 = vector.broadcast %394 : f32 to vector<8x32xf32>
    %431 = arith.mulf %430, %429 : vector<8x32xf32>
    %432 = arith.addf %377, %431 : vector<8x32xf32>
    %433 = arith.addf %432, %414 : vector<8x32xf32>
    %434 = math.tanh %433 : vector<8x32xf32>
    %435 = arith.addf %422, %428 : vector<8x32xf32>
    %cst_84 = arith.constant 2.000000e+00 : f32
    %436 = vector.broadcast %cst_84 : f32 to vector<8x32xf32>
    %437 = arith.mulf %436, %435 : vector<8x32xf32>
    %438 = arith.addf %416, %437 : vector<8x32xf32>
    %439 = arith.addf %438, %434 : vector<8x32xf32>
    %cst_85 = arith.constant dense<0.000000e+00> : vector<8x32xf32>
    %440 = tpu.matmul %439, %11, %cst_85 {dimension_numbers = #tpu.dot_dimension_numbers<[1], [0], [0], [1], [0, 0, 1, 1], [], []>} : vector<8x32xf32>, vector<32x32xf32>, vector<8x32xf32> -> vector<8x32xf32>
    %441 = vector.broadcast %396 : f32 to vector<8x32xf32>
    %442 = arith.mulf %441, %440 : vector<8x32xf32>
    %443 = arith.addf %377, %442 : vector<8x32xf32>
    %444 = vector.broadcast %405 : vector<1x32xf32> to vector<8x32xf32>
    %445 = arith.addf %443, %444 : vector<8x32xf32>
    %cst_86 = arith.constant 1.000000e+00 : f32
    %446 = vector.broadcast %cst_86 : f32 to vector<1x32xf32>
    %447 = arith.mulf %446, %398 : vector<1x32xf32>
    %448 = vector.broadcast %447 : vector<1x32xf32> to vector<8x32xf32>
    %449 = arith.addf %410, %448 : vector<8x32xf32>
    %450 = vector.broadcast %403 : vector<1x32xf32> to vector<8x32xf32>
    %451 = arith.addf %449, %450 : vector<8x32xf32>
    %452 = vector.broadcast %406 : vector<1x32xf32> to vector<8x32xf32>
    %453 = arith.addf %449, %452 : vector<8x32xf32>
    %454 = arith.addf %445, %449 : vector<8x32xf32>
    %455 = math.tanh %454 : vector<8x32xf32>
    %cst_87 = arith.constant dense<0.000000e+00> : vector<8x32xf32>
    %456 = tpu.matmul %455, %11, %cst_87 {dimension_numbers = #tpu.dot_dimension_numbers<[1], [0], [0], [1], [0, 0, 1, 1], [], []>} : vector<8x32xf32>, vector<32x32xf32>, vector<8x32xf32> -> vector<8x32xf32>
    %457 = vector.broadcast %395 : f32 to vector<8x32xf32>
    %458 = arith.mulf %457, %456 : vector<8x32xf32>
    %459 = arith.addf %445, %458 : vector<8x32xf32>
    %460 = arith.addf %459, %451 : vector<8x32xf32>
    %461 = math.tanh %460 : vector<8x32xf32>
    %cst_88 = arith.constant dense<0.000000e+00> : vector<8x32xf32>
    %462 = tpu.matmul %461, %11, %cst_88 {dimension_numbers = #tpu.dot_dimension_numbers<[1], [0], [0], [1], [0, 0, 1, 1], [], []>} : vector<8x32xf32>, vector<32x32xf32>, vector<8x32xf32> -> vector<8x32xf32>
    %463 = vector.broadcast %395 : f32 to vector<8x32xf32>
    %464 = arith.mulf %463, %462 : vector<8x32xf32>
    %465 = arith.addf %445, %464 : vector<8x32xf32>
    %466 = arith.addf %465, %451 : vector<8x32xf32>
    %467 = math.tanh %466 : vector<8x32xf32>
    %cst_89 = arith.constant dense<0.000000e+00> : vector<8x32xf32>
    %468 = tpu.matmul %467, %11, %cst_89 {dimension_numbers = #tpu.dot_dimension_numbers<[1], [0], [0], [1], [0, 0, 1, 1], [], []>} : vector<8x32xf32>, vector<32x32xf32>, vector<8x32xf32> -> vector<8x32xf32>
    %469 = vector.broadcast %394 : f32 to vector<8x32xf32>
    %470 = arith.mulf %469, %468 : vector<8x32xf32>
    %471 = arith.addf %445, %470 : vector<8x32xf32>
    %472 = arith.addf %471, %453 : vector<8x32xf32>
    %473 = math.tanh %472 : vector<8x32xf32>
    %474 = arith.addf %461, %467 : vector<8x32xf32>
    %cst_90 = arith.constant 2.000000e+00 : f32
    %475 = vector.broadcast %cst_90 : f32 to vector<8x32xf32>
    %476 = arith.mulf %475, %474 : vector<8x32xf32>
    %477 = arith.addf %455, %476 : vector<8x32xf32>
    %478 = arith.addf %477, %473 : vector<8x32xf32>
    %cst_91 = arith.constant dense<0.000000e+00> : vector<8x32xf32>
    %479 = tpu.matmul %478, %11, %cst_91 {dimension_numbers = #tpu.dot_dimension_numbers<[1], [0], [0], [1], [0, 0, 1, 1], [], []>} : vector<8x32xf32>, vector<32x32xf32>, vector<8x32xf32> -> vector<8x32xf32>
    %480 = vector.broadcast %396 : f32 to vector<8x32xf32>
    %481 = arith.mulf %480, %479 : vector<8x32xf32>
    %482 = arith.addf %445, %481 : vector<8x32xf32>
    %483 = vector.broadcast %405 : vector<1x32xf32> to vector<8x32xf32>
    %484 = arith.addf %482, %483 : vector<8x32xf32>
    %485 = arith.addf %439, %478 : vector<8x32xf32>
    %cst_92 = arith.constant 2.000000e+00 : f32
    %486 = vector.broadcast %cst_92 : f32 to vector<1x32xf32>
    %487 = arith.mulf %486, %398 : vector<1x32xf32>
    %488 = vector.broadcast %487 : vector<1x32xf32> to vector<8x32xf32>
    %489 = arith.addf %410, %488 : vector<8x32xf32>
    %490 = vector.broadcast %403 : vector<1x32xf32> to vector<8x32xf32>
    %491 = arith.addf %489, %490 : vector<8x32xf32>
    %492 = vector.broadcast %406 : vector<1x32xf32> to vector<8x32xf32>
    %493 = arith.addf %489, %492 : vector<8x32xf32>
    %494 = arith.addf %484, %489 : vector<8x32xf32>
    %495 = math.tanh %494 : vector<8x32xf32>
    %cst_93 = arith.constant dense<0.000000e+00> : vector<8x32xf32>
    %496 = tpu.matmul %495, %11, %cst_93 {dimension_numbers = #tpu.dot_dimension_numbers<[1], [0], [0], [1], [0, 0, 1, 1], [], []>} : vector<8x32xf32>, vector<32x32xf32>, vector<8x32xf32> -> vector<8x32xf32>
    %497 = vector.broadcast %395 : f32 to vector<8x32xf32>
    %498 = arith.mulf %497, %496 : vector<8x32xf32>
    %499 = arith.addf %484, %498 : vector<8x32xf32>
    %500 = arith.addf %499, %491 : vector<8x32xf32>
    %501 = math.tanh %500 : vector<8x32xf32>
    %cst_94 = arith.constant dense<0.000000e+00> : vector<8x32xf32>
    %502 = tpu.matmul %501, %11, %cst_94 {dimension_numbers = #tpu.dot_dimension_numbers<[1], [0], [0], [1], [0, 0, 1, 1], [], []>} : vector<8x32xf32>, vector<32x32xf32>, vector<8x32xf32> -> vector<8x32xf32>
    %503 = vector.broadcast %395 : f32 to vector<8x32xf32>
    %504 = arith.mulf %503, %502 : vector<8x32xf32>
    %505 = arith.addf %484, %504 : vector<8x32xf32>
    %506 = arith.addf %505, %491 : vector<8x32xf32>
    %507 = math.tanh %506 : vector<8x32xf32>
    %cst_95 = arith.constant dense<0.000000e+00> : vector<8x32xf32>
    %508 = tpu.matmul %507, %11, %cst_95 {dimension_numbers = #tpu.dot_dimension_numbers<[1], [0], [0], [1], [0, 0, 1, 1], [], []>} : vector<8x32xf32>, vector<32x32xf32>, vector<8x32xf32> -> vector<8x32xf32>
    %509 = vector.broadcast %394 : f32 to vector<8x32xf32>
    %510 = arith.mulf %509, %508 : vector<8x32xf32>
    %511 = arith.addf %484, %510 : vector<8x32xf32>
    %512 = arith.addf %511, %493 : vector<8x32xf32>
    %513 = math.tanh %512 : vector<8x32xf32>
    %514 = arith.addf %501, %507 : vector<8x32xf32>
    %cst_96 = arith.constant 2.000000e+00 : f32
    %515 = vector.broadcast %cst_96 : f32 to vector<8x32xf32>
    %516 = arith.mulf %515, %514 : vector<8x32xf32>
    %517 = arith.addf %495, %516 : vector<8x32xf32>
    %518 = arith.addf %517, %513 : vector<8x32xf32>
    %cst_97 = arith.constant dense<0.000000e+00> : vector<8x32xf32>
    %519 = tpu.matmul %518, %11, %cst_97 {dimension_numbers = #tpu.dot_dimension_numbers<[1], [0], [0], [1], [0, 0, 1, 1], [], []>} : vector<8x32xf32>, vector<32x32xf32>, vector<8x32xf32> -> vector<8x32xf32>
    %520 = vector.broadcast %396 : f32 to vector<8x32xf32>
    %521 = arith.mulf %520, %519 : vector<8x32xf32>
    %522 = arith.addf %484, %521 : vector<8x32xf32>
    %523 = vector.broadcast %405 : vector<1x32xf32> to vector<8x32xf32>
    %524 = arith.addf %522, %523 : vector<8x32xf32>
    %525 = arith.addf %485, %518 : vector<8x32xf32>
    %cst_98 = arith.constant 3.000000e+00 : f32
    %526 = vector.broadcast %cst_98 : f32 to vector<1x32xf32>
    %527 = arith.mulf %526, %398 : vector<1x32xf32>
    %528 = vector.broadcast %527 : vector<1x32xf32> to vector<8x32xf32>
    %529 = arith.addf %410, %528 : vector<8x32xf32>
    %530 = vector.broadcast %403 : vector<1x32xf32> to vector<8x32xf32>
    %531 = arith.addf %529, %530 : vector<8x32xf32>
    %532 = vector.broadcast %406 : vector<1x32xf32> to vector<8x32xf32>
    %533 = arith.addf %529, %532 : vector<8x32xf32>
    %534 = arith.addf %524, %529 : vector<8x32xf32>
    %535 = math.tanh %534 : vector<8x32xf32>
    %cst_99 = arith.constant dense<0.000000e+00> : vector<8x32xf32>
    %536 = tpu.matmul %535, %11, %cst_99 {dimension_numbers = #tpu.dot_dimension_numbers<[1], [0], [0], [1], [0, 0, 1, 1], [], []>} : vector<8x32xf32>, vector<32x32xf32>, vector<8x32xf32> -> vector<8x32xf32>
    %537 = vector.broadcast %395 : f32 to vector<8x32xf32>
    %538 = arith.mulf %537, %536 : vector<8x32xf32>
    %539 = arith.addf %524, %538 : vector<8x32xf32>
    %540 = arith.addf %539, %531 : vector<8x32xf32>
    %541 = math.tanh %540 : vector<8x32xf32>
    %cst_100 = arith.constant dense<0.000000e+00> : vector<8x32xf32>
    %542 = tpu.matmul %541, %11, %cst_100 {dimension_numbers = #tpu.dot_dimension_numbers<[1], [0], [0], [1], [0, 0, 1, 1], [], []>} : vector<8x32xf32>, vector<32x32xf32>, vector<8x32xf32> -> vector<8x32xf32>
    %543 = vector.broadcast %395 : f32 to vector<8x32xf32>
    %544 = arith.mulf %543, %542 : vector<8x32xf32>
    %545 = arith.addf %524, %544 : vector<8x32xf32>
    %546 = arith.addf %545, %531 : vector<8x32xf32>
    %547 = math.tanh %546 : vector<8x32xf32>
    %cst_101 = arith.constant dense<0.000000e+00> : vector<8x32xf32>
    %548 = tpu.matmul %547, %11, %cst_101 {dimension_numbers = #tpu.dot_dimension_numbers<[1], [0], [0], [1], [0, 0, 1, 1], [], []>} : vector<8x32xf32>, vector<32x32xf32>, vector<8x32xf32> -> vector<8x32xf32>
    %549 = vector.broadcast %394 : f32 to vector<8x32xf32>
    %550 = arith.mulf %549, %548 : vector<8x32xf32>
    %551 = arith.addf %524, %550 : vector<8x32xf32>
    %552 = arith.addf %551, %533 : vector<8x32xf32>
    %553 = math.tanh %552 : vector<8x32xf32>
    %554 = arith.addf %541, %547 : vector<8x32xf32>
    %cst_102 = arith.constant 2.000000e+00 : f32
    %555 = vector.broadcast %cst_102 : f32 to vector<8x32xf32>
    %556 = arith.mulf %555, %554 : vector<8x32xf32>
    %557 = arith.addf %535, %556 : vector<8x32xf32>
    %558 = arith.addf %557, %553 : vector<8x32xf32>
    %cst_103 = arith.constant dense<0.000000e+00> : vector<8x32xf32>
    %559 = tpu.matmul %558, %11, %cst_103 {dimension_numbers = #tpu.dot_dimension_numbers<[1], [0], [0], [1], [0, 0, 1, 1], [], []>} : vector<8x32xf32>, vector<32x32xf32>, vector<8x32xf32> -> vector<8x32xf32>
    %560 = vector.broadcast %396 : f32 to vector<8x32xf32>
    %561 = arith.mulf %560, %559 : vector<8x32xf32>
    %562 = arith.addf %524, %561 : vector<8x32xf32>
    %563 = vector.broadcast %405 : vector<1x32xf32> to vector<8x32xf32>
    %564 = arith.addf %562, %563 : vector<8x32xf32>
    %565 = arith.addf %525, %558 : vector<8x32xf32>
    %cst_104 = arith.constant dense<0.000000e+00> : vector<8x32xf32>
    %566 = tpu.matmul %565, %3, %cst_104 {dimension_numbers = #tpu.dot_dimension_numbers<[1], [0], [0], [1], [0, 0, 1, 1], [], []>} : vector<8x32xf32>, vector<32x32xf32>, vector<8x32xf32> -> vector<8x32xf32>
    %567 = vector.broadcast %396 : f32 to vector<8x32xf32>
    %568 = arith.mulf %567, %566 : vector<8x32xf32>
    %569 = arith.addf %387, %568 : vector<8x32xf32>
    %cst_105 = arith.constant 4.000000e+00 : f32
    %570 = arith.mulf %cst_105, %394 : f32
    %571 = vector.broadcast %570 : f32 to vector<1x32xf32>
    %572 = arith.mulf %571, %7 : vector<1x32xf32>
    %573 = vector.broadcast %572 : vector<1x32xf32> to vector<8x32xf32>
    %574 = arith.addf %569, %573 : vector<8x32xf32>
    %c3_106 = arith.constant 3 : index
    %c0_107 = arith.constant 0 : index
    %c0_108 = arith.constant 0 : index
    %575 = vector.load %arg4[%c3_106, %c0_107, %c0_108] : memref<8x8x32xf32, #tpu.memory_space<vmem>>, vector<1x8x32xf32>
    %576 = vector.shape_cast %575 : vector<1x8x32xf32> to vector<8x32xf32>
    %577 = vector.shape_cast %574 : vector<8x32xf32> to vector<1x8x32xf32>
    tpu.vector_store %arg4[%c3_106, %c0_107, %c0_108], %577 {strides = array<i32>} : memref<8x8x32xf32, #tpu.memory_space<vmem>>, vector<1x8x32xf32>,
    %c3_109 = arith.constant 3 : index
    %578 = memref.load %arg0[%c3_109] : memref<8xf32, #tpu.memory_space<smem>>
    %c4 = arith.constant 4 : index
    %579 = memref.load %arg0[%c4] : memref<8xf32, #tpu.memory_space<smem>>
    %580 = arith.subf %579, %578 : f32
    %cst_110 = arith.constant 2.500000e-01 : f32
    %581 = arith.mulf %580, %cst_110 : f32
    %cst_111 = arith.constant 5.000000e-01 : f32
    %582 = arith.mulf %cst_111, %581 : f32
    %cst_112 = arith.constant 0.166666672 : f32
    %583 = arith.mulf %581, %cst_112 : f32
    %584 = vector.broadcast %581 : f32 to vector<1x32xf32>
    %585 = arith.mulf %584, %5 : vector<1x32xf32>
    %586 = vector.broadcast %582 : f32 to vector<1x32xf32>
    %587 = arith.mulf %586, %5 : vector<1x32xf32>
    %588 = vector.broadcast %582 : f32 to vector<1x32xf32>
    %589 = arith.mulf %588, %12 : vector<1x32xf32>
    %590 = arith.addf %587, %589 : vector<1x32xf32>
    %591 = vector.broadcast %581 : f32 to vector<1x32xf32>
    %592 = arith.mulf %591, %12 : vector<1x32xf32>
    %593 = arith.addf %585, %592 : vector<1x32xf32>
    %594 = vector.broadcast %578 : f32 to vector<1x32xf32>
    %595 = arith.mulf %594, %5 : vector<1x32xf32>
    %596 = vector.broadcast %595 : vector<1x32xf32> to vector<8x32xf32>
    %597 = arith.addf %10, %596 : vector<8x32xf32>
    %598 = vector.broadcast %590 : vector<1x32xf32> to vector<8x32xf32>
    %599 = arith.addf %597, %598 : vector<8x32xf32>
    %600 = vector.broadcast %593 : vector<1x32xf32> to vector<8x32xf32>
    %601 = arith.addf %597, %600 : vector<8x32xf32>
    %602 = arith.addf %564, %597 : vector<8x32xf32>
    %603 = math.tanh %602 : vector<8x32xf32>
    %cst_113 = arith.constant dense<0.000000e+00> : vector<8x32xf32>
    %604 = tpu.matmul %603, %11, %cst_113 {dimension_numbers = #tpu.dot_dimension_numbers<[1], [0], [0], [1], [0, 0, 1, 1], [], []>} : vector<8x32xf32>, vector<32x32xf32>, vector<8x32xf32> -> vector<8x32xf32>
    %605 = vector.broadcast %582 : f32 to vector<8x32xf32>
    %606 = arith.mulf %605, %604 : vector<8x32xf32>
    %607 = arith.addf %564, %606 : vector<8x32xf32>
    %608 = arith.addf %607, %599 : vector<8x32xf32>
    %609 = math.tanh %608 : vector<8x32xf32>
    %cst_114 = arith.constant dense<0.000000e+00> : vector<8x32xf32>
    %610 = tpu.matmul %609, %11, %cst_114 {dimension_numbers = #tpu.dot_dimension_numbers<[1], [0], [0], [1], [0, 0, 1, 1], [], []>} : vector<8x32xf32>, vector<32x32xf32>, vector<8x32xf32> -> vector<8x32xf32>
    %611 = vector.broadcast %582 : f32 to vector<8x32xf32>
    %612 = arith.mulf %611, %610 : vector<8x32xf32>
    %613 = arith.addf %564, %612 : vector<8x32xf32>
    %614 = arith.addf %613, %599 : vector<8x32xf32>
    %615 = math.tanh %614 : vector<8x32xf32>
    %cst_115 = arith.constant dense<0.000000e+00> : vector<8x32xf32>
    %616 = tpu.matmul %615, %11, %cst_115 {dimension_numbers = #tpu.dot_dimension_numbers<[1], [0], [0], [1], [0, 0, 1, 1], [], []>} : vector<8x32xf32>, vector<32x32xf32>, vector<8x32xf32> -> vector<8x32xf32>
    %617 = vector.broadcast %581 : f32 to vector<8x32xf32>
    %618 = arith.mulf %617, %616 : vector<8x32xf32>
    %619 = arith.addf %564, %618 : vector<8x32xf32>
    %620 = arith.addf %619, %601 : vector<8x32xf32>
    %621 = math.tanh %620 : vector<8x32xf32>
    %622 = arith.addf %609, %615 : vector<8x32xf32>
    %cst_116 = arith.constant 2.000000e+00 : f32
    %623 = vector.broadcast %cst_116 : f32 to vector<8x32xf32>
    %624 = arith.mulf %623, %622 : vector<8x32xf32>
    %625 = arith.addf %603, %624 : vector<8x32xf32>
    %626 = arith.addf %625, %621 : vector<8x32xf32>
    %cst_117 = arith.constant dense<0.000000e+00> : vector<8x32xf32>
    %627 = tpu.matmul %626, %11, %cst_117 {dimension_numbers = #tpu.dot_dimension_numbers<[1], [0], [0], [1], [0, 0, 1, 1], [], []>} : vector<8x32xf32>, vector<32x32xf32>, vector<8x32xf32> -> vector<8x32xf32>
    %628 = vector.broadcast %583 : f32 to vector<8x32xf32>
    %629 = arith.mulf %628, %627 : vector<8x32xf32>
    %630 = arith.addf %564, %629 : vector<8x32xf32>
    %631 = vector.broadcast %592 : vector<1x32xf32> to vector<8x32xf32>
    %632 = arith.addf %630, %631 : vector<8x32xf32>
    %cst_118 = arith.constant 1.000000e+00 : f32
    %633 = vector.broadcast %cst_118 : f32 to vector<1x32xf32>
    %634 = arith.mulf %633, %585 : vector<1x32xf32>
    %635 = vector.broadcast %634 : vector<1x32xf32> to vector<8x32xf32>
    %636 = arith.addf %597, %635 : vector<8x32xf32>
    %637 = vector.broadcast %590 : vector<1x32xf32> to vector<8x32xf32>
    %638 = arith.addf %636, %637 : vector<8x32xf32>
    %639 = vector.broadcast %593 : vector<1x32xf32> to vector<8x32xf32>
    %640 = arith.addf %636, %639 : vector<8x32xf32>
    %641 = arith.addf %632, %636 : vector<8x32xf32>
    %642 = math.tanh %641 : vector<8x32xf32>
    %cst_119 = arith.constant dense<0.000000e+00> : vector<8x32xf32>
    %643 = tpu.matmul %642, %11, %cst_119 {dimension_numbers = #tpu.dot_dimension_numbers<[1], [0], [0], [1], [0, 0, 1, 1], [], []>} : vector<8x32xf32>, vector<32x32xf32>, vector<8x32xf32> -> vector<8x32xf32>
    %644 = vector.broadcast %582 : f32 to vector<8x32xf32>
    %645 = arith.mulf %644, %643 : vector<8x32xf32>
    %646 = arith.addf %632, %645 : vector<8x32xf32>
    %647 = arith.addf %646, %638 : vector<8x32xf32>
    %648 = math.tanh %647 : vector<8x32xf32>
    %cst_120 = arith.constant dense<0.000000e+00> : vector<8x32xf32>
    %649 = tpu.matmul %648, %11, %cst_120 {dimension_numbers = #tpu.dot_dimension_numbers<[1], [0], [0], [1], [0, 0, 1, 1], [], []>} : vector<8x32xf32>, vector<32x32xf32>, vector<8x32xf32> -> vector<8x32xf32>
    %650 = vector.broadcast %582 : f32 to vector<8x32xf32>
    %651 = arith.mulf %650, %649 : vector<8x32xf32>
    %652 = arith.addf %632, %651 : vector<8x32xf32>
    %653 = arith.addf %652, %638 : vector<8x32xf32>
    %654 = math.tanh %653 : vector<8x32xf32>
    %cst_121 = arith.constant dense<0.000000e+00> : vector<8x32xf32>
    %655 = tpu.matmul %654, %11, %cst_121 {dimension_numbers = #tpu.dot_dimension_numbers<[1], [0], [0], [1], [0, 0, 1, 1], [], []>} : vector<8x32xf32>, vector<32x32xf32>, vector<8x32xf32> -> vector<8x32xf32>
    %656 = vector.broadcast %581 : f32 to vector<8x32xf32>
    %657 = arith.mulf %656, %655 : vector<8x32xf32>
    %658 = arith.addf %632, %657 : vector<8x32xf32>
    %659 = arith.addf %658, %640 : vector<8x32xf32>
    %660 = math.tanh %659 : vector<8x32xf32>
    %661 = arith.addf %648, %654 : vector<8x32xf32>
    %cst_122 = arith.constant 2.000000e+00 : f32
    %662 = vector.broadcast %cst_122 : f32 to vector<8x32xf32>
    %663 = arith.mulf %662, %661 : vector<8x32xf32>
    %664 = arith.addf %642, %663 : vector<8x32xf32>
    %665 = arith.addf %664, %660 : vector<8x32xf32>
    %cst_123 = arith.constant dense<0.000000e+00> : vector<8x32xf32>
    %666 = tpu.matmul %665, %11, %cst_123 {dimension_numbers = #tpu.dot_dimension_numbers<[1], [0], [0], [1], [0, 0, 1, 1], [], []>} : vector<8x32xf32>, vector<32x32xf32>, vector<8x32xf32> -> vector<8x32xf32>
    %667 = vector.broadcast %583 : f32 to vector<8x32xf32>
    %668 = arith.mulf %667, %666 : vector<8x32xf32>
    %669 = arith.addf %632, %668 : vector<8x32xf32>
    %670 = vector.broadcast %592 : vector<1x32xf32> to vector<8x32xf32>
    %671 = arith.addf %669, %670 : vector<8x32xf32>
    %672 = arith.addf %626, %665 : vector<8x32xf32>
    %cst_124 = arith.constant 2.000000e+00 : f32
    %673 = vector.broadcast %cst_124 : f32 to vector<1x32xf32>
    %674 = arith.mulf %673, %585 : vector<1x32xf32>
    %675 = vector.broadcast %674 : vector<1x32xf32> to vector<8x32xf32>
    %676 = arith.addf %597, %675 : vector<8x32xf32>
    %677 = vector.broadcast %590 : vector<1x32xf32> to vector<8x32xf32>
    %678 = arith.addf %676, %677 : vector<8x32xf32>
    %679 = vector.broadcast %593 : vector<1x32xf32> to vector<8x32xf32>
    %680 = arith.addf %676, %679 : vector<8x32xf32>
    %681 = arith.addf %671, %676 : vector<8x32xf32>
    %682 = math.tanh %681 : vector<8x32xf32>
    %cst_125 = arith.constant dense<0.000000e+00> : vector<8x32xf32>
    %683 = tpu.matmul %682, %11, %cst_125 {dimension_numbers = #tpu.dot_dimension_numbers<[1], [0], [0], [1], [0, 0, 1, 1], [], []>} : vector<8x32xf32>, vector<32x32xf32>, vector<8x32xf32> -> vector<8x32xf32>
    %684 = vector.broadcast %582 : f32 to vector<8x32xf32>
    %685 = arith.mulf %684, %683 : vector<8x32xf32>
    %686 = arith.addf %671, %685 : vector<8x32xf32>
    %687 = arith.addf %686, %678 : vector<8x32xf32>
    %688 = math.tanh %687 : vector<8x32xf32>
    %cst_126 = arith.constant dense<0.000000e+00> : vector<8x32xf32>
    %689 = tpu.matmul %688, %11, %cst_126 {dimension_numbers = #tpu.dot_dimension_numbers<[1], [0], [0], [1], [0, 0, 1, 1], [], []>} : vector<8x32xf32>, vector<32x32xf32>, vector<8x32xf32> -> vector<8x32xf32>
    %690 = vector.broadcast %582 : f32 to vector<8x32xf32>
    %691 = arith.mulf %690, %689 : vector<8x32xf32>
    %692 = arith.addf %671, %691 : vector<8x32xf32>
    %693 = arith.addf %692, %678 : vector<8x32xf32>
    %694 = math.tanh %693 : vector<8x32xf32>
    %cst_127 = arith.constant dense<0.000000e+00> : vector<8x32xf32>
    %695 = tpu.matmul %694, %11, %cst_127 {dimension_numbers = #tpu.dot_dimension_numbers<[1], [0], [0], [1], [0, 0, 1, 1], [], []>} : vector<8x32xf32>, vector<32x32xf32>, vector<8x32xf32> -> vector<8x32xf32>
    %696 = vector.broadcast %581 : f32 to vector<8x32xf32>
    %697 = arith.mulf %696, %695 : vector<8x32xf32>
    %698 = arith.addf %671, %697 : vector<8x32xf32>
    %699 = arith.addf %698, %680 : vector<8x32xf32>
    %700 = math.tanh %699 : vector<8x32xf32>
    %701 = arith.addf %688, %694 : vector<8x32xf32>
    %cst_128 = arith.constant 2.000000e+00 : f32
    %702 = vector.broadcast %cst_128 : f32 to vector<8x32xf32>
    %703 = arith.mulf %702, %701 : vector<8x32xf32>
    %704 = arith.addf %682, %703 : vector<8x32xf32>
    %705 = arith.addf %704, %700 : vector<8x32xf32>
    %cst_129 = arith.constant dense<0.000000e+00> : vector<8x32xf32>
    %706 = tpu.matmul %705, %11, %cst_129 {dimension_numbers = #tpu.dot_dimension_numbers<[1], [0], [0], [1], [0, 0, 1, 1], [], []>} : vector<8x32xf32>, vector<32x32xf32>, vector<8x32xf32> -> vector<8x32xf32>
    %707 = vector.broadcast %583 : f32 to vector<8x32xf32>
    %708 = arith.mulf %707, %706 : vector<8x32xf32>
    %709 = arith.addf %671, %708 : vector<8x32xf32>
    %710 = vector.broadcast %592 : vector<1x32xf32> to vector<8x32xf32>
    %711 = arith.addf %709, %710 : vector<8x32xf32>
    %712 = arith.addf %672, %705 : vector<8x32xf32>
    %cst_130 = arith.constant 3.000000e+00 : f32
    %713 = vector.broadcast %cst_130 : f32 to vector<1x32xf32>
    %714 = arith.mulf %713, %585 : vector<1x32xf32>
    %715 = vector.broadcast %714 : vector<1x32xf32> to vector<8x32xf32>
    %716 = arith.addf %597, %715 : vector<8x32xf32>
    %717 = vector.broadcast %590 : vector<1x32xf32> to vector<8x32xf32>
    %718 = arith.addf %716, %717 : vector<8x32xf32>
    %719 = vector.broadcast %593 : vector<1x32xf32> to vector<8x32xf32>
    %720 = arith.addf %716, %719 : vector<8x32xf32>
    %721 = arith.addf %711, %716 : vector<8x32xf32>
    %722 = math.tanh %721 : vector<8x32xf32>
    %cst_131 = arith.constant dense<0.000000e+00> : vector<8x32xf32>
    %723 = tpu.matmul %722, %11, %cst_131 {dimension_numbers = #tpu.dot_dimension_numbers<[1], [0], [0], [1], [0, 0, 1, 1], [], []>} : vector<8x32xf32>, vector<32x32xf32>, vector<8x32xf32> -> vector<8x32xf32>
    %724 = vector.broadcast %582 : f32 to vector<8x32xf32>
    %725 = arith.mulf %724, %723 : vector<8x32xf32>
    %726 = arith.addf %711, %725 : vector<8x32xf32>
    %727 = arith.addf %726, %718 : vector<8x32xf32>
    %728 = math.tanh %727 : vector<8x32xf32>
    %cst_132 = arith.constant dense<0.000000e+00> : vector<8x32xf32>
    %729 = tpu.matmul %728, %11, %cst_132 {dimension_numbers = #tpu.dot_dimension_numbers<[1], [0], [0], [1], [0, 0, 1, 1], [], []>} : vector<8x32xf32>, vector<32x32xf32>, vector<8x32xf32> -> vector<8x32xf32>
    %730 = vector.broadcast %582 : f32 to vector<8x32xf32>
    %731 = arith.mulf %730, %729 : vector<8x32xf32>
    %732 = arith.addf %711, %731 : vector<8x32xf32>
    %733 = arith.addf %732, %718 : vector<8x32xf32>
    %734 = math.tanh %733 : vector<8x32xf32>
    %cst_133 = arith.constant dense<0.000000e+00> : vector<8x32xf32>
    %735 = tpu.matmul %734, %11, %cst_133 {dimension_numbers = #tpu.dot_dimension_numbers<[1], [0], [0], [1], [0, 0, 1, 1], [], []>} : vector<8x32xf32>, vector<32x32xf32>, vector<8x32xf32> -> vector<8x32xf32>
    %736 = vector.broadcast %581 : f32 to vector<8x32xf32>
    %737 = arith.mulf %736, %735 : vector<8x32xf32>
    %738 = arith.addf %711, %737 : vector<8x32xf32>
    %739 = arith.addf %738, %720 : vector<8x32xf32>
    %740 = math.tanh %739 : vector<8x32xf32>
    %741 = arith.addf %728, %734 : vector<8x32xf32>
    %cst_134 = arith.constant 2.000000e+00 : f32
    %742 = vector.broadcast %cst_134 : f32 to vector<8x32xf32>
    %743 = arith.mulf %742, %741 : vector<8x32xf32>
    %744 = arith.addf %722, %743 : vector<8x32xf32>
    %745 = arith.addf %744, %740 : vector<8x32xf32>
    %cst_135 = arith.constant dense<0.000000e+00> : vector<8x32xf32>
    %746 = tpu.matmul %745, %11, %cst_135 {dimension_numbers = #tpu.dot_dimension_numbers<[1], [0], [0], [1], [0, 0, 1, 1], [], []>} : vector<8x32xf32>, vector<32x32xf32>, vector<8x32xf32> -> vector<8x32xf32>
    %747 = vector.broadcast %583 : f32 to vector<8x32xf32>
    %748 = arith.mulf %747, %746 : vector<8x32xf32>
    %749 = arith.addf %711, %748 : vector<8x32xf32>
    %750 = vector.broadcast %592 : vector<1x32xf32> to vector<8x32xf32>
    %751 = arith.addf %749, %750 : vector<8x32xf32>
    %752 = arith.addf %712, %745 : vector<8x32xf32>
    %cst_136 = arith.constant dense<0.000000e+00> : vector<8x32xf32>
    %753 = tpu.matmul %752, %3, %cst_136 {dimension_numbers = #tpu.dot_dimension_numbers<[1], [0], [0], [1], [0, 0, 1, 1], [], []>} : vector<8x32xf32>, vector<32x32xf32>, vector<8x32xf32> -> vector<8x32xf32>
    %754 = vector.broadcast %583 : f32 to vector<8x32xf32>
    %755 = arith.mulf %754, %753 : vector<8x32xf32>
    %756 = arith.addf %574, %755 : vector<8x32xf32>
    %cst_137 = arith.constant 4.000000e+00 : f32
    %757 = arith.mulf %cst_137, %581 : f32
    %758 = vector.broadcast %757 : f32 to vector<1x32xf32>
    %759 = arith.mulf %758, %7 : vector<1x32xf32>
    %760 = vector.broadcast %759 : vector<1x32xf32> to vector<8x32xf32>
    %761 = arith.addf %756, %760 : vector<8x32xf32>
    %c4_138 = arith.constant 4 : index
    %c0_139 = arith.constant 0 : index
    %c0_140 = arith.constant 0 : index
    %762 = vector.load %arg4[%c4_138, %c0_139, %c0_140] : memref<8x8x32xf32, #tpu.memory_space<vmem>>, vector<1x8x32xf32>
    %763 = vector.shape_cast %762 : vector<1x8x32xf32> to vector<8x32xf32>
    %764 = vector.shape_cast %761 : vector<8x32xf32> to vector<1x8x32xf32>
    tpu.vector_store %arg4[%c4_138, %c0_139, %c0_140], %764 {strides = array<i32>} : memref<8x8x32xf32, #tpu.memory_space<vmem>>, vector<1x8x32xf32>,
    %c4_141 = arith.constant 4 : index
    %765 = memref.load %arg0[%c4_141] : memref<8xf32, #tpu.memory_space<smem>>
    %c5 = arith.constant 5 : index
    %766 = memref.load %arg0[%c5] : memref<8xf32, #tpu.memory_space<smem>>
    %767 = arith.subf %766, %765 : f32
    %cst_142 = arith.constant 2.500000e-01 : f32
    %768 = arith.mulf %767, %cst_142 : f32
    %cst_143 = arith.constant 5.000000e-01 : f32
    %769 = arith.mulf %cst_143, %768 : f32
    %cst_144 = arith.constant 0.166666672 : f32
    %770 = arith.mulf %768, %cst_144 : f32
    %771 = vector.broadcast %768 : f32 to vector<1x32xf32>
    %772 = arith.mulf %771, %5 : vector<1x32xf32>
    %773 = vector.broadcast %769 : f32 to vector<1x32xf32>
    %774 = arith.mulf %773, %5 : vector<1x32xf32>
    %775 = vector.broadcast %769 : f32 to vector<1x32xf32>
    %776 = arith.mulf %775, %12 : vector<1x32xf32>
    %777 = arith.addf %774, %776 : vector<1x32xf32>
    %778 = vector.broadcast %768 : f32 to vector<1x32xf32>
    %779 = arith.mulf %778, %12 : vector<1x32xf32>
    %780 = arith.addf %772, %779 : vector<1x32xf32>
    %781 = vector.broadcast %765 : f32 to vector<1x32xf32>
    %782 = arith.mulf %781, %5 : vector<1x32xf32>
    %783 = vector.broadcast %782 : vector<1x32xf32> to vector<8x32xf32>
    %784 = arith.addf %10, %783 : vector<8x32xf32>
    %785 = vector.broadcast %777 : vector<1x32xf32> to vector<8x32xf32>
    %786 = arith.addf %784, %785 : vector<8x32xf32>
    %787 = vector.broadcast %780 : vector<1x32xf32> to vector<8x32xf32>
    %788 = arith.addf %784, %787 : vector<8x32xf32>
    %789 = arith.addf %751, %784 : vector<8x32xf32>
    %790 = math.tanh %789 : vector<8x32xf32>
    %cst_145 = arith.constant dense<0.000000e+00> : vector<8x32xf32>
    %791 = tpu.matmul %790, %11, %cst_145 {dimension_numbers = #tpu.dot_dimension_numbers<[1], [0], [0], [1], [0, 0, 1, 1], [], []>} : vector<8x32xf32>, vector<32x32xf32>, vector<8x32xf32> -> vector<8x32xf32>
    %792 = vector.broadcast %769 : f32 to vector<8x32xf32>
    %793 = arith.mulf %792, %791 : vector<8x32xf32>
    %794 = arith.addf %751, %793 : vector<8x32xf32>
    %795 = arith.addf %794, %786 : vector<8x32xf32>
    %796 = math.tanh %795 : vector<8x32xf32>
    %cst_146 = arith.constant dense<0.000000e+00> : vector<8x32xf32>
    %797 = tpu.matmul %796, %11, %cst_146 {dimension_numbers = #tpu.dot_dimension_numbers<[1], [0], [0], [1], [0, 0, 1, 1], [], []>} : vector<8x32xf32>, vector<32x32xf32>, vector<8x32xf32> -> vector<8x32xf32>
    %798 = vector.broadcast %769 : f32 to vector<8x32xf32>
    %799 = arith.mulf %798, %797 : vector<8x32xf32>
    %800 = arith.addf %751, %799 : vector<8x32xf32>
    %801 = arith.addf %800, %786 : vector<8x32xf32>
    %802 = math.tanh %801 : vector<8x32xf32>
    %cst_147 = arith.constant dense<0.000000e+00> : vector<8x32xf32>
    %803 = tpu.matmul %802, %11, %cst_147 {dimension_numbers = #tpu.dot_dimension_numbers<[1], [0], [0], [1], [0, 0, 1, 1], [], []>} : vector<8x32xf32>, vector<32x32xf32>, vector<8x32xf32> -> vector<8x32xf32>
    %804 = vector.broadcast %768 : f32 to vector<8x32xf32>
    %805 = arith.mulf %804, %803 : vector<8x32xf32>
    %806 = arith.addf %751, %805 : vector<8x32xf32>
    %807 = arith.addf %806, %788 : vector<8x32xf32>
    %808 = math.tanh %807 : vector<8x32xf32>
    %809 = arith.addf %796, %802 : vector<8x32xf32>
    %cst_148 = arith.constant 2.000000e+00 : f32
    %810 = vector.broadcast %cst_148 : f32 to vector<8x32xf32>
    %811 = arith.mulf %810, %809 : vector<8x32xf32>
    %812 = arith.addf %790, %811 : vector<8x32xf32>
    %813 = arith.addf %812, %808 : vector<8x32xf32>
    %cst_149 = arith.constant dense<0.000000e+00> : vector<8x32xf32>
    %814 = tpu.matmul %813, %11, %cst_149 {dimension_numbers = #tpu.dot_dimension_numbers<[1], [0], [0], [1], [0, 0, 1, 1], [], []>} : vector<8x32xf32>, vector<32x32xf32>, vector<8x32xf32> -> vector<8x32xf32>
    %815 = vector.broadcast %770 : f32 to vector<8x32xf32>
    %816 = arith.mulf %815, %814 : vector<8x32xf32>
    %817 = arith.addf %751, %816 : vector<8x32xf32>
    %818 = vector.broadcast %779 : vector<1x32xf32> to vector<8x32xf32>
    %819 = arith.addf %817, %818 : vector<8x32xf32>
    %cst_150 = arith.constant 1.000000e+00 : f32
    %820 = vector.broadcast %cst_150 : f32 to vector<1x32xf32>
    %821 = arith.mulf %820, %772 : vector<1x32xf32>
    %822 = vector.broadcast %821 : vector<1x32xf32> to vector<8x32xf32>
    %823 = arith.addf %784, %822 : vector<8x32xf32>
    %824 = vector.broadcast %777 : vector<1x32xf32> to vector<8x32xf32>
    %825 = arith.addf %823, %824 : vector<8x32xf32>
    %826 = vector.broadcast %780 : vector<1x32xf32> to vector<8x32xf32>
    %827 = arith.addf %823, %826 : vector<8x32xf32>
    %828 = arith.addf %819, %823 : vector<8x32xf32>
    %829 = math.tanh %828 : vector<8x32xf32>
    %cst_151 = arith.constant dense<0.000000e+00> : vector<8x32xf32>
    %830 = tpu.matmul %829, %11, %cst_151 {dimension_numbers = #tpu.dot_dimension_numbers<[1], [0], [0], [1], [0, 0, 1, 1], [], []>} : vector<8x32xf32>, vector<32x32xf32>, vector<8x32xf32> -> vector<8x32xf32>
    %831 = vector.broadcast %769 : f32 to vector<8x32xf32>
    %832 = arith.mulf %831, %830 : vector<8x32xf32>
    %833 = arith.addf %819, %832 : vector<8x32xf32>
    %834 = arith.addf %833, %825 : vector<8x32xf32>
    %835 = math.tanh %834 : vector<8x32xf32>
    %cst_152 = arith.constant dense<0.000000e+00> : vector<8x32xf32>
    %836 = tpu.matmul %835, %11, %cst_152 {dimension_numbers = #tpu.dot_dimension_numbers<[1], [0], [0], [1], [0, 0, 1, 1], [], []>} : vector<8x32xf32>, vector<32x32xf32>, vector<8x32xf32> -> vector<8x32xf32>
    %837 = vector.broadcast %769 : f32 to vector<8x32xf32>
    %838 = arith.mulf %837, %836 : vector<8x32xf32>
    %839 = arith.addf %819, %838 : vector<8x32xf32>
    %840 = arith.addf %839, %825 : vector<8x32xf32>
    %841 = math.tanh %840 : vector<8x32xf32>
    %cst_153 = arith.constant dense<0.000000e+00> : vector<8x32xf32>
    %842 = tpu.matmul %841, %11, %cst_153 {dimension_numbers = #tpu.dot_dimension_numbers<[1], [0], [0], [1], [0, 0, 1, 1], [], []>} : vector<8x32xf32>, vector<32x32xf32>, vector<8x32xf32> -> vector<8x32xf32>
    %843 = vector.broadcast %768 : f32 to vector<8x32xf32>
    %844 = arith.mulf %843, %842 : vector<8x32xf32>
    %845 = arith.addf %819, %844 : vector<8x32xf32>
    %846 = arith.addf %845, %827 : vector<8x32xf32>
    %847 = math.tanh %846 : vector<8x32xf32>
    %848 = arith.addf %835, %841 : vector<8x32xf32>
    %cst_154 = arith.constant 2.000000e+00 : f32
    %849 = vector.broadcast %cst_154 : f32 to vector<8x32xf32>
    %850 = arith.mulf %849, %848 : vector<8x32xf32>
    %851 = arith.addf %829, %850 : vector<8x32xf32>
    %852 = arith.addf %851, %847 : vector<8x32xf32>
    %cst_155 = arith.constant dense<0.000000e+00> : vector<8x32xf32>
    %853 = tpu.matmul %852, %11, %cst_155 {dimension_numbers = #tpu.dot_dimension_numbers<[1], [0], [0], [1], [0, 0, 1, 1], [], []>} : vector<8x32xf32>, vector<32x32xf32>, vector<8x32xf32> -> vector<8x32xf32>
    %854 = vector.broadcast %770 : f32 to vector<8x32xf32>
    %855 = arith.mulf %854, %853 : vector<8x32xf32>
    %856 = arith.addf %819, %855 : vector<8x32xf32>
    %857 = vector.broadcast %779 : vector<1x32xf32> to vector<8x32xf32>
    %858 = arith.addf %856, %857 : vector<8x32xf32>
    %859 = arith.addf %813, %852 : vector<8x32xf32>
    %cst_156 = arith.constant 2.000000e+00 : f32
    %860 = vector.broadcast %cst_156 : f32 to vector<1x32xf32>
    %861 = arith.mulf %860, %772 : vector<1x32xf32>
    %862 = vector.broadcast %861 : vector<1x32xf32> to vector<8x32xf32>
    %863 = arith.addf %784, %862 : vector<8x32xf32>
    %864 = vector.broadcast %777 : vector<1x32xf32> to vector<8x32xf32>
    %865 = arith.addf %863, %864 : vector<8x32xf32>
    %866 = vector.broadcast %780 : vector<1x32xf32> to vector<8x32xf32>
    %867 = arith.addf %863, %866 : vector<8x32xf32>
    %868 = arith.addf %858, %863 : vector<8x32xf32>
    %869 = math.tanh %868 : vector<8x32xf32>
    %cst_157 = arith.constant dense<0.000000e+00> : vector<8x32xf32>
    %870 = tpu.matmul %869, %11, %cst_157 {dimension_numbers = #tpu.dot_dimension_numbers<[1], [0], [0], [1], [0, 0, 1, 1], [], []>} : vector<8x32xf32>, vector<32x32xf32>, vector<8x32xf32> -> vector<8x32xf32>
    %871 = vector.broadcast %769 : f32 to vector<8x32xf32>
    %872 = arith.mulf %871, %870 : vector<8x32xf32>
    %873 = arith.addf %858, %872 : vector<8x32xf32>
    %874 = arith.addf %873, %865 : vector<8x32xf32>
    %875 = math.tanh %874 : vector<8x32xf32>
    %cst_158 = arith.constant dense<0.000000e+00> : vector<8x32xf32>
    %876 = tpu.matmul %875, %11, %cst_158 {dimension_numbers = #tpu.dot_dimension_numbers<[1], [0], [0], [1], [0, 0, 1, 1], [], []>} : vector<8x32xf32>, vector<32x32xf32>, vector<8x32xf32> -> vector<8x32xf32>
    %877 = vector.broadcast %769 : f32 to vector<8x32xf32>
    %878 = arith.mulf %877, %876 : vector<8x32xf32>
    %879 = arith.addf %858, %878 : vector<8x32xf32>
    %880 = arith.addf %879, %865 : vector<8x32xf32>
    %881 = math.tanh %880 : vector<8x32xf32>
    %cst_159 = arith.constant dense<0.000000e+00> : vector<8x32xf32>
    %882 = tpu.matmul %881, %11, %cst_159 {dimension_numbers = #tpu.dot_dimension_numbers<[1], [0], [0], [1], [0, 0, 1, 1], [], []>} : vector<8x32xf32>, vector<32x32xf32>, vector<8x32xf32> -> vector<8x32xf32>
    %883 = vector.broadcast %768 : f32 to vector<8x32xf32>
    %884 = arith.mulf %883, %882 : vector<8x32xf32>
    %885 = arith.addf %858, %884 : vector<8x32xf32>
    %886 = arith.addf %885, %867 : vector<8x32xf32>
    %887 = math.tanh %886 : vector<8x32xf32>
    %888 = arith.addf %875, %881 : vector<8x32xf32>
    %cst_160 = arith.constant 2.000000e+00 : f32
    %889 = vector.broadcast %cst_160 : f32 to vector<8x32xf32>
    %890 = arith.mulf %889, %888 : vector<8x32xf32>
    %891 = arith.addf %869, %890 : vector<8x32xf32>
    %892 = arith.addf %891, %887 : vector<8x32xf32>
    %cst_161 = arith.constant dense<0.000000e+00> : vector<8x32xf32>
    %893 = tpu.matmul %892, %11, %cst_161 {dimension_numbers = #tpu.dot_dimension_numbers<[1], [0], [0], [1], [0, 0, 1, 1], [], []>} : vector<8x32xf32>, vector<32x32xf32>, vector<8x32xf32> -> vector<8x32xf32>
    %894 = vector.broadcast %770 : f32 to vector<8x32xf32>
    %895 = arith.mulf %894, %893 : vector<8x32xf32>
    %896 = arith.addf %858, %895 : vector<8x32xf32>
    %897 = vector.broadcast %779 : vector<1x32xf32> to vector<8x32xf32>
    %898 = arith.addf %896, %897 : vector<8x32xf32>
    %899 = arith.addf %859, %892 : vector<8x32xf32>
    %cst_162 = arith.constant 3.000000e+00 : f32
    %900 = vector.broadcast %cst_162 : f32 to vector<1x32xf32>
    %901 = arith.mulf %900, %772 : vector<1x32xf32>
    %902 = vector.broadcast %901 : vector<1x32xf32> to vector<8x32xf32>
    %903 = arith.addf %784, %902 : vector<8x32xf32>
    %904 = vector.broadcast %777 : vector<1x32xf32> to vector<8x32xf32>
    %905 = arith.addf %903, %904 : vector<8x32xf32>
    %906 = vector.broadcast %780 : vector<1x32xf32> to vector<8x32xf32>
    %907 = arith.addf %903, %906 : vector<8x32xf32>
    %908 = arith.addf %898, %903 : vector<8x32xf32>
    %909 = math.tanh %908 : vector<8x32xf32>
    %cst_163 = arith.constant dense<0.000000e+00> : vector<8x32xf32>
    %910 = tpu.matmul %909, %11, %cst_163 {dimension_numbers = #tpu.dot_dimension_numbers<[1], [0], [0], [1], [0, 0, 1, 1], [], []>} : vector<8x32xf32>, vector<32x32xf32>, vector<8x32xf32> -> vector<8x32xf32>
    %911 = vector.broadcast %769 : f32 to vector<8x32xf32>
    %912 = arith.mulf %911, %910 : vector<8x32xf32>
    %913 = arith.addf %898, %912 : vector<8x32xf32>
    %914 = arith.addf %913, %905 : vector<8x32xf32>
    %915 = math.tanh %914 : vector<8x32xf32>
    %cst_164 = arith.constant dense<0.000000e+00> : vector<8x32xf32>
    %916 = tpu.matmul %915, %11, %cst_164 {dimension_numbers = #tpu.dot_dimension_numbers<[1], [0], [0], [1], [0, 0, 1, 1], [], []>} : vector<8x32xf32>, vector<32x32xf32>, vector<8x32xf32> -> vector<8x32xf32>
    %917 = vector.broadcast %769 : f32 to vector<8x32xf32>
    %918 = arith.mulf %917, %916 : vector<8x32xf32>
    %919 = arith.addf %898, %918 : vector<8x32xf32>
    %920 = arith.addf %919, %905 : vector<8x32xf32>
    %921 = math.tanh %920 : vector<8x32xf32>
    %cst_165 = arith.constant dense<0.000000e+00> : vector<8x32xf32>
    %922 = tpu.matmul %921, %11, %cst_165 {dimension_numbers = #tpu.dot_dimension_numbers<[1], [0], [0], [1], [0, 0, 1, 1], [], []>} : vector<8x32xf32>, vector<32x32xf32>, vector<8x32xf32> -> vector<8x32xf32>
    %923 = vector.broadcast %768 : f32 to vector<8x32xf32>
    %924 = arith.mulf %923, %922 : vector<8x32xf32>
    %925 = arith.addf %898, %924 : vector<8x32xf32>
    %926 = arith.addf %925, %907 : vector<8x32xf32>
    %927 = math.tanh %926 : vector<8x32xf32>
    %928 = arith.addf %915, %921 : vector<8x32xf32>
    %cst_166 = arith.constant 2.000000e+00 : f32
    %929 = vector.broadcast %cst_166 : f32 to vector<8x32xf32>
    %930 = arith.mulf %929, %928 : vector<8x32xf32>
    %931 = arith.addf %909, %930 : vector<8x32xf32>
    %932 = arith.addf %931, %927 : vector<8x32xf32>
    %cst_167 = arith.constant dense<0.000000e+00> : vector<8x32xf32>
    %933 = tpu.matmul %932, %11, %cst_167 {dimension_numbers = #tpu.dot_dimension_numbers<[1], [0], [0], [1], [0, 0, 1, 1], [], []>} : vector<8x32xf32>, vector<32x32xf32>, vector<8x32xf32> -> vector<8x32xf32>
    %934 = vector.broadcast %770 : f32 to vector<8x32xf32>
    %935 = arith.mulf %934, %933 : vector<8x32xf32>
    %936 = arith.addf %898, %935 : vector<8x32xf32>
    %937 = vector.broadcast %779 : vector<1x32xf32> to vector<8x32xf32>
    %938 = arith.addf %936, %937 : vector<8x32xf32>
    %939 = arith.addf %899, %932 : vector<8x32xf32>
    %cst_168 = arith.constant dense<0.000000e+00> : vector<8x32xf32>
    %940 = tpu.matmul %939, %3, %cst_168 {dimension_numbers = #tpu.dot_dimension_numbers<[1], [0], [0], [1], [0, 0, 1, 1], [], []>} : vector<8x32xf32>, vector<32x32xf32>, vector<8x32xf32> -> vector<8x32xf32>
    %941 = vector.broadcast %770 : f32 to vector<8x32xf32>
    %942 = arith.mulf %941, %940 : vector<8x32xf32>
    %943 = arith.addf %761, %942 : vector<8x32xf32>
    %cst_169 = arith.constant 4.000000e+00 : f32
    %944 = arith.mulf %cst_169, %768 : f32
    %945 = vector.broadcast %944 : f32 to vector<1x32xf32>
    %946 = arith.mulf %945, %7 : vector<1x32xf32>
    %947 = vector.broadcast %946 : vector<1x32xf32> to vector<8x32xf32>
    %948 = arith.addf %943, %947 : vector<8x32xf32>
    %c5_170 = arith.constant 5 : index
    %c0_171 = arith.constant 0 : index
    %c0_172 = arith.constant 0 : index
    %949 = vector.load %arg4[%c5_170, %c0_171, %c0_172] : memref<8x8x32xf32, #tpu.memory_space<vmem>>, vector<1x8x32xf32>
    %950 = vector.shape_cast %949 : vector<1x8x32xf32> to vector<8x32xf32>
    %951 = vector.shape_cast %948 : vector<8x32xf32> to vector<1x8x32xf32>
    tpu.vector_store %arg4[%c5_170, %c0_171, %c0_172], %951 {strides = array<i32>} : memref<8x8x32xf32, #tpu.memory_space<vmem>>, vector<1x8x32xf32>,
    %c5_173 = arith.constant 5 : index
    %952 = memref.load %arg0[%c5_173] : memref<8xf32, #tpu.memory_space<smem>>
    %c6 = arith.constant 6 : index
    %953 = memref.load %arg0[%c6] : memref<8xf32, #tpu.memory_space<smem>>
    %954 = arith.subf %953, %952 : f32
    %cst_174 = arith.constant 2.500000e-01 : f32
    %955 = arith.mulf %954, %cst_174 : f32
    %cst_175 = arith.constant 5.000000e-01 : f32
    %956 = arith.mulf %cst_175, %955 : f32
    %cst_176 = arith.constant 0.166666672 : f32
    %957 = arith.mulf %955, %cst_176 : f32
    %958 = vector.broadcast %955 : f32 to vector<1x32xf32>
    %959 = arith.mulf %958, %5 : vector<1x32xf32>
    %960 = vector.broadcast %956 : f32 to vector<1x32xf32>
    %961 = arith.mulf %960, %5 : vector<1x32xf32>
    %962 = vector.broadcast %956 : f32 to vector<1x32xf32>
    %963 = arith.mulf %962, %12 : vector<1x32xf32>
    %964 = arith.addf %961, %963 : vector<1x32xf32>
    %965 = vector.broadcast %955 : f32 to vector<1x32xf32>
    %966 = arith.mulf %965, %12 : vector<1x32xf32>
    %967 = arith.addf %959, %966 : vector<1x32xf32>
    %968 = vector.broadcast %952 : f32 to vector<1x32xf32>
    %969 = arith.mulf %968, %5 : vector<1x32xf32>
    %970 = vector.broadcast %969 : vector<1x32xf32> to vector<8x32xf32>
    %971 = arith.addf %10, %970 : vector<8x32xf32>
    %972 = vector.broadcast %964 : vector<1x32xf32> to vector<8x32xf32>
    %973 = arith.addf %971, %972 : vector<8x32xf32>
    %974 = vector.broadcast %967 : vector<1x32xf32> to vector<8x32xf32>
    %975 = arith.addf %971, %974 : vector<8x32xf32>
    %976 = arith.addf %938, %971 : vector<8x32xf32>
    %977 = math.tanh %976 : vector<8x32xf32>
    %cst_177 = arith.constant dense<0.000000e+00> : vector<8x32xf32>
    %978 = tpu.matmul %977, %11, %cst_177 {dimension_numbers = #tpu.dot_dimension_numbers<[1], [0], [0], [1], [0, 0, 1, 1], [], []>} : vector<8x32xf32>, vector<32x32xf32>, vector<8x32xf32> -> vector<8x32xf32>
    %979 = vector.broadcast %956 : f32 to vector<8x32xf32>
    %980 = arith.mulf %979, %978 : vector<8x32xf32>
    %981 = arith.addf %938, %980 : vector<8x32xf32>
    %982 = arith.addf %981, %973 : vector<8x32xf32>
    %983 = math.tanh %982 : vector<8x32xf32>
    %cst_178 = arith.constant dense<0.000000e+00> : vector<8x32xf32>
    %984 = tpu.matmul %983, %11, %cst_178 {dimension_numbers = #tpu.dot_dimension_numbers<[1], [0], [0], [1], [0, 0, 1, 1], [], []>} : vector<8x32xf32>, vector<32x32xf32>, vector<8x32xf32> -> vector<8x32xf32>
    %985 = vector.broadcast %956 : f32 to vector<8x32xf32>
    %986 = arith.mulf %985, %984 : vector<8x32xf32>
    %987 = arith.addf %938, %986 : vector<8x32xf32>
    %988 = arith.addf %987, %973 : vector<8x32xf32>
    %989 = math.tanh %988 : vector<8x32xf32>
    %cst_179 = arith.constant dense<0.000000e+00> : vector<8x32xf32>
    %990 = tpu.matmul %989, %11, %cst_179 {dimension_numbers = #tpu.dot_dimension_numbers<[1], [0], [0], [1], [0, 0, 1, 1], [], []>} : vector<8x32xf32>, vector<32x32xf32>, vector<8x32xf32> -> vector<8x32xf32>
    %991 = vector.broadcast %955 : f32 to vector<8x32xf32>
    %992 = arith.mulf %991, %990 : vector<8x32xf32>
    %993 = arith.addf %938, %992 : vector<8x32xf32>
    %994 = arith.addf %993, %975 : vector<8x32xf32>
    %995 = math.tanh %994 : vector<8x32xf32>
    %996 = arith.addf %983, %989 : vector<8x32xf32>
    %cst_180 = arith.constant 2.000000e+00 : f32
    %997 = vector.broadcast %cst_180 : f32 to vector<8x32xf32>
    %998 = arith.mulf %997, %996 : vector<8x32xf32>
    %999 = arith.addf %977, %998 : vector<8x32xf32>
    %1000 = arith.addf %999, %995 : vector<8x32xf32>
    %cst_181 = arith.constant dense<0.000000e+00> : vector<8x32xf32>
    %1001 = tpu.matmul %1000, %11, %cst_181 {dimension_numbers = #tpu.dot_dimension_numbers<[1], [0], [0], [1], [0, 0, 1, 1], [], []>} : vector<8x32xf32>, vector<32x32xf32>, vector<8x32xf32> -> vector<8x32xf32>
    %1002 = vector.broadcast %957 : f32 to vector<8x32xf32>
    %1003 = arith.mulf %1002, %1001 : vector<8x32xf32>
    %1004 = arith.addf %938, %1003 : vector<8x32xf32>
    %1005 = vector.broadcast %966 : vector<1x32xf32> to vector<8x32xf32>
    %1006 = arith.addf %1004, %1005 : vector<8x32xf32>
    %cst_182 = arith.constant 1.000000e+00 : f32
    %1007 = vector.broadcast %cst_182 : f32 to vector<1x32xf32>
    %1008 = arith.mulf %1007, %959 : vector<1x32xf32>
    %1009 = vector.broadcast %1008 : vector<1x32xf32> to vector<8x32xf32>
    %1010 = arith.addf %971, %1009 : vector<8x32xf32>
    %1011 = vector.broadcast %964 : vector<1x32xf32> to vector<8x32xf32>
    %1012 = arith.addf %1010, %1011 : vector<8x32xf32>
    %1013 = vector.broadcast %967 : vector<1x32xf32> to vector<8x32xf32>
    %1014 = arith.addf %1010, %1013 : vector<8x32xf32>
    %1015 = arith.addf %1006, %1010 : vector<8x32xf32>
    %1016 = math.tanh %1015 : vector<8x32xf32>
    %cst_183 = arith.constant dense<0.000000e+00> : vector<8x32xf32>
    %1017 = tpu.matmul %1016, %11, %cst_183 {dimension_numbers = #tpu.dot_dimension_numbers<[1], [0], [0], [1], [0, 0, 1, 1], [], []>} : vector<8x32xf32>, vector<32x32xf32>, vector<8x32xf32> -> vector<8x32xf32>
    %1018 = vector.broadcast %956 : f32 to vector<8x32xf32>
    %1019 = arith.mulf %1018, %1017 : vector<8x32xf32>
    %1020 = arith.addf %1006, %1019 : vector<8x32xf32>
    %1021 = arith.addf %1020, %1012 : vector<8x32xf32>
    %1022 = math.tanh %1021 : vector<8x32xf32>
    %cst_184 = arith.constant dense<0.000000e+00> : vector<8x32xf32>
    %1023 = tpu.matmul %1022, %11, %cst_184 {dimension_numbers = #tpu.dot_dimension_numbers<[1], [0], [0], [1], [0, 0, 1, 1], [], []>} : vector<8x32xf32>, vector<32x32xf32>, vector<8x32xf32> -> vector<8x32xf32>
    %1024 = vector.broadcast %956 : f32 to vector<8x32xf32>
    %1025 = arith.mulf %1024, %1023 : vector<8x32xf32>
    %1026 = arith.addf %1006, %1025 : vector<8x32xf32>
    %1027 = arith.addf %1026, %1012 : vector<8x32xf32>
    %1028 = math.tanh %1027 : vector<8x32xf32>
    %cst_185 = arith.constant dense<0.000000e+00> : vector<8x32xf32>
    %1029 = tpu.matmul %1028, %11, %cst_185 {dimension_numbers = #tpu.dot_dimension_numbers<[1], [0], [0], [1], [0, 0, 1, 1], [], []>} : vector<8x32xf32>, vector<32x32xf32>, vector<8x32xf32> -> vector<8x32xf32>
    %1030 = vector.broadcast %955 : f32 to vector<8x32xf32>
    %1031 = arith.mulf %1030, %1029 : vector<8x32xf32>
    %1032 = arith.addf %1006, %1031 : vector<8x32xf32>
    %1033 = arith.addf %1032, %1014 : vector<8x32xf32>
    %1034 = math.tanh %1033 : vector<8x32xf32>
    %1035 = arith.addf %1022, %1028 : vector<8x32xf32>
    %cst_186 = arith.constant 2.000000e+00 : f32
    %1036 = vector.broadcast %cst_186 : f32 to vector<8x32xf32>
    %1037 = arith.mulf %1036, %1035 : vector<8x32xf32>
    %1038 = arith.addf %1016, %1037 : vector<8x32xf32>
    %1039 = arith.addf %1038, %1034 : vector<8x32xf32>
    %cst_187 = arith.constant dense<0.000000e+00> : vector<8x32xf32>
    %1040 = tpu.matmul %1039, %11, %cst_187 {dimension_numbers = #tpu.dot_dimension_numbers<[1], [0], [0], [1], [0, 0, 1, 1], [], []>} : vector<8x32xf32>, vector<32x32xf32>, vector<8x32xf32> -> vector<8x32xf32>
    %1041 = vector.broadcast %957 : f32 to vector<8x32xf32>
    %1042 = arith.mulf %1041, %1040 : vector<8x32xf32>
    %1043 = arith.addf %1006, %1042 : vector<8x32xf32>
    %1044 = vector.broadcast %966 : vector<1x32xf32> to vector<8x32xf32>
    %1045 = arith.addf %1043, %1044 : vector<8x32xf32>
    %1046 = arith.addf %1000, %1039 : vector<8x32xf32>
    %cst_188 = arith.constant 2.000000e+00 : f32
    %1047 = vector.broadcast %cst_188 : f32 to vector<1x32xf32>
    %1048 = arith.mulf %1047, %959 : vector<1x32xf32>
    %1049 = vector.broadcast %1048 : vector<1x32xf32> to vector<8x32xf32>
    %1050 = arith.addf %971, %1049 : vector<8x32xf32>
    %1051 = vector.broadcast %964 : vector<1x32xf32> to vector<8x32xf32>
    %1052 = arith.addf %1050, %1051 : vector<8x32xf32>
    %1053 = vector.broadcast %967 : vector<1x32xf32> to vector<8x32xf32>
    %1054 = arith.addf %1050, %1053 : vector<8x32xf32>
    %1055 = arith.addf %1045, %1050 : vector<8x32xf32>
    %1056 = math.tanh %1055 : vector<8x32xf32>
    %cst_189 = arith.constant dense<0.000000e+00> : vector<8x32xf32>
    %1057 = tpu.matmul %1056, %11, %cst_189 {dimension_numbers = #tpu.dot_dimension_numbers<[1], [0], [0], [1], [0, 0, 1, 1], [], []>} : vector<8x32xf32>, vector<32x32xf32>, vector<8x32xf32> -> vector<8x32xf32>
    %1058 = vector.broadcast %956 : f32 to vector<8x32xf32>
    %1059 = arith.mulf %1058, %1057 : vector<8x32xf32>
    %1060 = arith.addf %1045, %1059 : vector<8x32xf32>
    %1061 = arith.addf %1060, %1052 : vector<8x32xf32>
    %1062 = math.tanh %1061 : vector<8x32xf32>
    %cst_190 = arith.constant dense<0.000000e+00> : vector<8x32xf32>
    %1063 = tpu.matmul %1062, %11, %cst_190 {dimension_numbers = #tpu.dot_dimension_numbers<[1], [0], [0], [1], [0, 0, 1, 1], [], []>} : vector<8x32xf32>, vector<32x32xf32>, vector<8x32xf32> -> vector<8x32xf32>
    %1064 = vector.broadcast %956 : f32 to vector<8x32xf32>
    %1065 = arith.mulf %1064, %1063 : vector<8x32xf32>
    %1066 = arith.addf %1045, %1065 : vector<8x32xf32>
    %1067 = arith.addf %1066, %1052 : vector<8x32xf32>
    %1068 = math.tanh %1067 : vector<8x32xf32>
    %cst_191 = arith.constant dense<0.000000e+00> : vector<8x32xf32>
    %1069 = tpu.matmul %1068, %11, %cst_191 {dimension_numbers = #tpu.dot_dimension_numbers<[1], [0], [0], [1], [0, 0, 1, 1], [], []>} : vector<8x32xf32>, vector<32x32xf32>, vector<8x32xf32> -> vector<8x32xf32>
    %1070 = vector.broadcast %955 : f32 to vector<8x32xf32>
    %1071 = arith.mulf %1070, %1069 : vector<8x32xf32>
    %1072 = arith.addf %1045, %1071 : vector<8x32xf32>
    %1073 = arith.addf %1072, %1054 : vector<8x32xf32>
    %1074 = math.tanh %1073 : vector<8x32xf32>
    %1075 = arith.addf %1062, %1068 : vector<8x32xf32>
    %cst_192 = arith.constant 2.000000e+00 : f32
    %1076 = vector.broadcast %cst_192 : f32 to vector<8x32xf32>
    %1077 = arith.mulf %1076, %1075 : vector<8x32xf32>
    %1078 = arith.addf %1056, %1077 : vector<8x32xf32>
    %1079 = arith.addf %1078, %1074 : vector<8x32xf32>
    %cst_193 = arith.constant dense<0.000000e+00> : vector<8x32xf32>
    %1080 = tpu.matmul %1079, %11, %cst_193 {dimension_numbers = #tpu.dot_dimension_numbers<[1], [0], [0], [1], [0, 0, 1, 1], [], []>} : vector<8x32xf32>, vector<32x32xf32>, vector<8x32xf32> -> vector<8x32xf32>
    %1081 = vector.broadcast %957 : f32 to vector<8x32xf32>
    %1082 = arith.mulf %1081, %1080 : vector<8x32xf32>
    %1083 = arith.addf %1045, %1082 : vector<8x32xf32>
    %1084 = vector.broadcast %966 : vector<1x32xf32> to vector<8x32xf32>
    %1085 = arith.addf %1083, %1084 : vector<8x32xf32>
    %1086 = arith.addf %1046, %1079 : vector<8x32xf32>
    %cst_194 = arith.constant 3.000000e+00 : f32
    %1087 = vector.broadcast %cst_194 : f32 to vector<1x32xf32>
    %1088 = arith.mulf %1087, %959 : vector<1x32xf32>
    %1089 = vector.broadcast %1088 : vector<1x32xf32> to vector<8x32xf32>
    %1090 = arith.addf %971, %1089 : vector<8x32xf32>
    %1091 = vector.broadcast %964 : vector<1x32xf32> to vector<8x32xf32>
    %1092 = arith.addf %1090, %1091 : vector<8x32xf32>
    %1093 = vector.broadcast %967 : vector<1x32xf32> to vector<8x32xf32>
    %1094 = arith.addf %1090, %1093 : vector<8x32xf32>
    %1095 = arith.addf %1085, %1090 : vector<8x32xf32>
    %1096 = math.tanh %1095 : vector<8x32xf32>
    %cst_195 = arith.constant dense<0.000000e+00> : vector<8x32xf32>
    %1097 = tpu.matmul %1096, %11, %cst_195 {dimension_numbers = #tpu.dot_dimension_numbers<[1], [0], [0], [1], [0, 0, 1, 1], [], []>} : vector<8x32xf32>, vector<32x32xf32>, vector<8x32xf32> -> vector<8x32xf32>
    %1098 = vector.broadcast %956 : f32 to vector<8x32xf32>
    %1099 = arith.mulf %1098, %1097 : vector<8x32xf32>
    %1100 = arith.addf %1085, %1099 : vector<8x32xf32>
    %1101 = arith.addf %1100, %1092 : vector<8x32xf32>
    %1102 = math.tanh %1101 : vector<8x32xf32>
    %cst_196 = arith.constant dense<0.000000e+00> : vector<8x32xf32>
    %1103 = tpu.matmul %1102, %11, %cst_196 {dimension_numbers = #tpu.dot_dimension_numbers<[1], [0], [0], [1], [0, 0, 1, 1], [], []>} : vector<8x32xf32>, vector<32x32xf32>, vector<8x32xf32> -> vector<8x32xf32>
    %1104 = vector.broadcast %956 : f32 to vector<8x32xf32>
    %1105 = arith.mulf %1104, %1103 : vector<8x32xf32>
    %1106 = arith.addf %1085, %1105 : vector<8x32xf32>
    %1107 = arith.addf %1106, %1092 : vector<8x32xf32>
    %1108 = math.tanh %1107 : vector<8x32xf32>
    %cst_197 = arith.constant dense<0.000000e+00> : vector<8x32xf32>
    %1109 = tpu.matmul %1108, %11, %cst_197 {dimension_numbers = #tpu.dot_dimension_numbers<[1], [0], [0], [1], [0, 0, 1, 1], [], []>} : vector<8x32xf32>, vector<32x32xf32>, vector<8x32xf32> -> vector<8x32xf32>
    %1110 = vector.broadcast %955 : f32 to vector<8x32xf32>
    %1111 = arith.mulf %1110, %1109 : vector<8x32xf32>
    %1112 = arith.addf %1085, %1111 : vector<8x32xf32>
    %1113 = arith.addf %1112, %1094 : vector<8x32xf32>
    %1114 = math.tanh %1113 : vector<8x32xf32>
    %1115 = arith.addf %1102, %1108 : vector<8x32xf32>
    %cst_198 = arith.constant 2.000000e+00 : f32
    %1116 = vector.broadcast %cst_198 : f32 to vector<8x32xf32>
    %1117 = arith.mulf %1116, %1115 : vector<8x32xf32>
    %1118 = arith.addf %1096, %1117 : vector<8x32xf32>
    %1119 = arith.addf %1118, %1114 : vector<8x32xf32>
    %cst_199 = arith.constant dense<0.000000e+00> : vector<8x32xf32>
    %1120 = tpu.matmul %1119, %11, %cst_199 {dimension_numbers = #tpu.dot_dimension_numbers<[1], [0], [0], [1], [0, 0, 1, 1], [], []>} : vector<8x32xf32>, vector<32x32xf32>, vector<8x32xf32> -> vector<8x32xf32>
    %1121 = vector.broadcast %957 : f32 to vector<8x32xf32>
    %1122 = arith.mulf %1121, %1120 : vector<8x32xf32>
    %1123 = arith.addf %1085, %1122 : vector<8x32xf32>
    %1124 = vector.broadcast %966 : vector<1x32xf32> to vector<8x32xf32>
    %1125 = arith.addf %1123, %1124 : vector<8x32xf32>
    %1126 = arith.addf %1086, %1119 : vector<8x32xf32>
    %cst_200 = arith.constant dense<0.000000e+00> : vector<8x32xf32>
    %1127 = tpu.matmul %1126, %3, %cst_200 {dimension_numbers = #tpu.dot_dimension_numbers<[1], [0], [0], [1], [0, 0, 1, 1], [], []>} : vector<8x32xf32>, vector<32x32xf32>, vector<8x32xf32> -> vector<8x32xf32>
    %1128 = vector.broadcast %957 : f32 to vector<8x32xf32>
    %1129 = arith.mulf %1128, %1127 : vector<8x32xf32>
    %1130 = arith.addf %948, %1129 : vector<8x32xf32>
    %cst_201 = arith.constant 4.000000e+00 : f32
    %1131 = arith.mulf %cst_201, %955 : f32
    %1132 = vector.broadcast %1131 : f32 to vector<1x32xf32>
    %1133 = arith.mulf %1132, %7 : vector<1x32xf32>
    %1134 = vector.broadcast %1133 : vector<1x32xf32> to vector<8x32xf32>
    %1135 = arith.addf %1130, %1134 : vector<8x32xf32>
    %c6_202 = arith.constant 6 : index
    %c0_203 = arith.constant 0 : index
    %c0_204 = arith.constant 0 : index
    %1136 = vector.load %arg4[%c6_202, %c0_203, %c0_204] : memref<8x8x32xf32, #tpu.memory_space<vmem>>, vector<1x8x32xf32>
    %1137 = vector.shape_cast %1136 : vector<1x8x32xf32> to vector<8x32xf32>
    %1138 = vector.shape_cast %1135 : vector<8x32xf32> to vector<1x8x32xf32>
    tpu.vector_store %arg4[%c6_202, %c0_203, %c0_204], %1138 {strides = array<i32>} : memref<8x8x32xf32, #tpu.memory_space<vmem>>, vector<1x8x32xf32>,
    %c6_205 = arith.constant 6 : index
    %1139 = memref.load %arg0[%c6_205] : memref<8xf32, #tpu.memory_space<smem>>
    %c7 = arith.constant 7 : index
    %1140 = memref.load %arg0[%c7] : memref<8xf32, #tpu.memory_space<smem>>
    %1141 = arith.subf %1140, %1139 : f32
    %cst_206 = arith.constant 2.500000e-01 : f32
    %1142 = arith.mulf %1141, %cst_206 : f32
    %cst_207 = arith.constant 5.000000e-01 : f32
    %1143 = arith.mulf %cst_207, %1142 : f32
    %cst_208 = arith.constant 0.166666672 : f32
    %1144 = arith.mulf %1142, %cst_208 : f32
    %1145 = vector.broadcast %1142 : f32 to vector<1x32xf32>
    %1146 = arith.mulf %1145, %5 : vector<1x32xf32>
    %1147 = vector.broadcast %1143 : f32 to vector<1x32xf32>
    %1148 = arith.mulf %1147, %5 : vector<1x32xf32>
    %1149 = vector.broadcast %1143 : f32 to vector<1x32xf32>
    %1150 = arith.mulf %1149, %12 : vector<1x32xf32>
    %1151 = arith.addf %1148, %1150 : vector<1x32xf32>
    %1152 = vector.broadcast %1142 : f32 to vector<1x32xf32>
    %1153 = arith.mulf %1152, %12 : vector<1x32xf32>
    %1154 = arith.addf %1146, %1153 : vector<1x32xf32>
    %1155 = vector.broadcast %1139 : f32 to vector<1x32xf32>
    %1156 = arith.mulf %1155, %5 : vector<1x32xf32>
    %1157 = vector.broadcast %1156 : vector<1x32xf32> to vector<8x32xf32>
    %1158 = arith.addf %10, %1157 : vector<8x32xf32>
    %1159 = vector.broadcast %1151 : vector<1x32xf32> to vector<8x32xf32>
    %1160 = arith.addf %1158, %1159 : vector<8x32xf32>
    %1161 = vector.broadcast %1154 : vector<1x32xf32> to vector<8x32xf32>
    %1162 = arith.addf %1158, %1161 : vector<8x32xf32>
    %1163 = arith.addf %1125, %1158 : vector<8x32xf32>
    %1164 = math.tanh %1163 : vector<8x32xf32>
    %cst_209 = arith.constant dense<0.000000e+00> : vector<8x32xf32>
    %1165 = tpu.matmul %1164, %11, %cst_209 {dimension_numbers = #tpu.dot_dimension_numbers<[1], [0], [0], [1], [0, 0, 1, 1], [], []>} : vector<8x32xf32>, vector<32x32xf32>, vector<8x32xf32> -> vector<8x32xf32>
    %1166 = vector.broadcast %1143 : f32 to vector<8x32xf32>
    %1167 = arith.mulf %1166, %1165 : vector<8x32xf32>
    %1168 = arith.addf %1125, %1167 : vector<8x32xf32>
    %1169 = arith.addf %1168, %1160 : vector<8x32xf32>
    %1170 = math.tanh %1169 : vector<8x32xf32>
    %cst_210 = arith.constant dense<0.000000e+00> : vector<8x32xf32>
    %1171 = tpu.matmul %1170, %11, %cst_210 {dimension_numbers = #tpu.dot_dimension_numbers<[1], [0], [0], [1], [0, 0, 1, 1], [], []>} : vector<8x32xf32>, vector<32x32xf32>, vector<8x32xf32> -> vector<8x32xf32>
    %1172 = vector.broadcast %1143 : f32 to vector<8x32xf32>
    %1173 = arith.mulf %1172, %1171 : vector<8x32xf32>
    %1174 = arith.addf %1125, %1173 : vector<8x32xf32>
    %1175 = arith.addf %1174, %1160 : vector<8x32xf32>
    %1176 = math.tanh %1175 : vector<8x32xf32>
    %cst_211 = arith.constant dense<0.000000e+00> : vector<8x32xf32>
    %1177 = tpu.matmul %1176, %11, %cst_211 {dimension_numbers = #tpu.dot_dimension_numbers<[1], [0], [0], [1], [0, 0, 1, 1], [], []>} : vector<8x32xf32>, vector<32x32xf32>, vector<8x32xf32> -> vector<8x32xf32>
    %1178 = vector.broadcast %1142 : f32 to vector<8x32xf32>
    %1179 = arith.mulf %1178, %1177 : vector<8x32xf32>
    %1180 = arith.addf %1125, %1179 : vector<8x32xf32>
    %1181 = arith.addf %1180, %1162 : vector<8x32xf32>
    %1182 = math.tanh %1181 : vector<8x32xf32>
    %1183 = arith.addf %1170, %1176 : vector<8x32xf32>
    %cst_212 = arith.constant 2.000000e+00 : f32
    %1184 = vector.broadcast %cst_212 : f32 to vector<8x32xf32>
    %1185 = arith.mulf %1184, %1183 : vector<8x32xf32>
    %1186 = arith.addf %1164, %1185 : vector<8x32xf32>
    %1187 = arith.addf %1186, %1182 : vector<8x32xf32>
    %cst_213 = arith.constant dense<0.000000e+00> : vector<8x32xf32>
    %1188 = tpu.matmul %1187, %11, %cst_213 {dimension_numbers = #tpu.dot_dimension_numbers<[1], [0], [0], [1], [0, 0, 1, 1], [], []>} : vector<8x32xf32>, vector<32x32xf32>, vector<8x32xf32> -> vector<8x32xf32>
    %1189 = vector.broadcast %1144 : f32 to vector<8x32xf32>
    %1190 = arith.mulf %1189, %1188 : vector<8x32xf32>
    %1191 = arith.addf %1125, %1190 : vector<8x32xf32>
    %1192 = vector.broadcast %1153 : vector<1x32xf32> to vector<8x32xf32>
    %1193 = arith.addf %1191, %1192 : vector<8x32xf32>
    %cst_214 = arith.constant 1.000000e+00 : f32
    %1194 = vector.broadcast %cst_214 : f32 to vector<1x32xf32>
    %1195 = arith.mulf %1194, %1146 : vector<1x32xf32>
    %1196 = vector.broadcast %1195 : vector<1x32xf32> to vector<8x32xf32>
    %1197 = arith.addf %1158, %1196 : vector<8x32xf32>
    %1198 = vector.broadcast %1151 : vector<1x32xf32> to vector<8x32xf32>
    %1199 = arith.addf %1197, %1198 : vector<8x32xf32>
    %1200 = vector.broadcast %1154 : vector<1x32xf32> to vector<8x32xf32>
    %1201 = arith.addf %1197, %1200 : vector<8x32xf32>
    %1202 = arith.addf %1193, %1197 : vector<8x32xf32>
    %1203 = math.tanh %1202 : vector<8x32xf32>
    %cst_215 = arith.constant dense<0.000000e+00> : vector<8x32xf32>
    %1204 = tpu.matmul %1203, %11, %cst_215 {dimension_numbers = #tpu.dot_dimension_numbers<[1], [0], [0], [1], [0, 0, 1, 1], [], []>} : vector<8x32xf32>, vector<32x32xf32>, vector<8x32xf32> -> vector<8x32xf32>
    %1205 = vector.broadcast %1143 : f32 to vector<8x32xf32>
    %1206 = arith.mulf %1205, %1204 : vector<8x32xf32>
    %1207 = arith.addf %1193, %1206 : vector<8x32xf32>
    %1208 = arith.addf %1207, %1199 : vector<8x32xf32>
    %1209 = math.tanh %1208 : vector<8x32xf32>
    %cst_216 = arith.constant dense<0.000000e+00> : vector<8x32xf32>
    %1210 = tpu.matmul %1209, %11, %cst_216 {dimension_numbers = #tpu.dot_dimension_numbers<[1], [0], [0], [1], [0, 0, 1, 1], [], []>} : vector<8x32xf32>, vector<32x32xf32>, vector<8x32xf32> -> vector<8x32xf32>
    %1211 = vector.broadcast %1143 : f32 to vector<8x32xf32>
    %1212 = arith.mulf %1211, %1210 : vector<8x32xf32>
    %1213 = arith.addf %1193, %1212 : vector<8x32xf32>
    %1214 = arith.addf %1213, %1199 : vector<8x32xf32>
    %1215 = math.tanh %1214 : vector<8x32xf32>
    %cst_217 = arith.constant dense<0.000000e+00> : vector<8x32xf32>
    %1216 = tpu.matmul %1215, %11, %cst_217 {dimension_numbers = #tpu.dot_dimension_numbers<[1], [0], [0], [1], [0, 0, 1, 1], [], []>} : vector<8x32xf32>, vector<32x32xf32>, vector<8x32xf32> -> vector<8x32xf32>
    %1217 = vector.broadcast %1142 : f32 to vector<8x32xf32>
    %1218 = arith.mulf %1217, %1216 : vector<8x32xf32>
    %1219 = arith.addf %1193, %1218 : vector<8x32xf32>
    %1220 = arith.addf %1219, %1201 : vector<8x32xf32>
    %1221 = math.tanh %1220 : vector<8x32xf32>
    %1222 = arith.addf %1209, %1215 : vector<8x32xf32>
    %cst_218 = arith.constant 2.000000e+00 : f32
    %1223 = vector.broadcast %cst_218 : f32 to vector<8x32xf32>
    %1224 = arith.mulf %1223, %1222 : vector<8x32xf32>
    %1225 = arith.addf %1203, %1224 : vector<8x32xf32>
    %1226 = arith.addf %1225, %1221 : vector<8x32xf32>
    %cst_219 = arith.constant dense<0.000000e+00> : vector<8x32xf32>
    %1227 = tpu.matmul %1226, %11, %cst_219 {dimension_numbers = #tpu.dot_dimension_numbers<[1], [0], [0], [1], [0, 0, 1, 1], [], []>} : vector<8x32xf32>, vector<32x32xf32>, vector<8x32xf32> -> vector<8x32xf32>
    %1228 = vector.broadcast %1144 : f32 to vector<8x32xf32>
    %1229 = arith.mulf %1228, %1227 : vector<8x32xf32>
    %1230 = arith.addf %1193, %1229 : vector<8x32xf32>
    %1231 = vector.broadcast %1153 : vector<1x32xf32> to vector<8x32xf32>
    %1232 = arith.addf %1230, %1231 : vector<8x32xf32>
    %1233 = arith.addf %1187, %1226 : vector<8x32xf32>
    %cst_220 = arith.constant 2.000000e+00 : f32
    %1234 = vector.broadcast %cst_220 : f32 to vector<1x32xf32>
    %1235 = arith.mulf %1234, %1146 : vector<1x32xf32>
    %1236 = vector.broadcast %1235 : vector<1x32xf32> to vector<8x32xf32>
    %1237 = arith.addf %1158, %1236 : vector<8x32xf32>
    %1238 = vector.broadcast %1151 : vector<1x32xf32> to vector<8x32xf32>
    %1239 = arith.addf %1237, %1238 : vector<8x32xf32>
    %1240 = vector.broadcast %1154 : vector<1x32xf32> to vector<8x32xf32>
    %1241 = arith.addf %1237, %1240 : vector<8x32xf32>
    %1242 = arith.addf %1232, %1237 : vector<8x32xf32>
    %1243 = math.tanh %1242 : vector<8x32xf32>
    %cst_221 = arith.constant dense<0.000000e+00> : vector<8x32xf32>
    %1244 = tpu.matmul %1243, %11, %cst_221 {dimension_numbers = #tpu.dot_dimension_numbers<[1], [0], [0], [1], [0, 0, 1, 1], [], []>} : vector<8x32xf32>, vector<32x32xf32>, vector<8x32xf32> -> vector<8x32xf32>
    %1245 = vector.broadcast %1143 : f32 to vector<8x32xf32>
    %1246 = arith.mulf %1245, %1244 : vector<8x32xf32>
    %1247 = arith.addf %1232, %1246 : vector<8x32xf32>
    %1248 = arith.addf %1247, %1239 : vector<8x32xf32>
    %1249 = math.tanh %1248 : vector<8x32xf32>
    %cst_222 = arith.constant dense<0.000000e+00> : vector<8x32xf32>
    %1250 = tpu.matmul %1249, %11, %cst_222 {dimension_numbers = #tpu.dot_dimension_numbers<[1], [0], [0], [1], [0, 0, 1, 1], [], []>} : vector<8x32xf32>, vector<32x32xf32>, vector<8x32xf32> -> vector<8x32xf32>
    %1251 = vector.broadcast %1143 : f32 to vector<8x32xf32>
    %1252 = arith.mulf %1251, %1250 : vector<8x32xf32>
    %1253 = arith.addf %1232, %1252 : vector<8x32xf32>
    %1254 = arith.addf %1253, %1239 : vector<8x32xf32>
    %1255 = math.tanh %1254 : vector<8x32xf32>
    %cst_223 = arith.constant dense<0.000000e+00> : vector<8x32xf32>
    %1256 = tpu.matmul %1255, %11, %cst_223 {dimension_numbers = #tpu.dot_dimension_numbers<[1], [0], [0], [1], [0, 0, 1, 1], [], []>} : vector<8x32xf32>, vector<32x32xf32>, vector<8x32xf32> -> vector<8x32xf32>
    %1257 = vector.broadcast %1142 : f32 to vector<8x32xf32>
    %1258 = arith.mulf %1257, %1256 : vector<8x32xf32>
    %1259 = arith.addf %1232, %1258 : vector<8x32xf32>
    %1260 = arith.addf %1259, %1241 : vector<8x32xf32>
    %1261 = math.tanh %1260 : vector<8x32xf32>
    %1262 = arith.addf %1249, %1255 : vector<8x32xf32>
    %cst_224 = arith.constant 2.000000e+00 : f32
    %1263 = vector.broadcast %cst_224 : f32 to vector<8x32xf32>
    %1264 = arith.mulf %1263, %1262 : vector<8x32xf32>
    %1265 = arith.addf %1243, %1264 : vector<8x32xf32>
    %1266 = arith.addf %1265, %1261 : vector<8x32xf32>
    %cst_225 = arith.constant dense<0.000000e+00> : vector<8x32xf32>
    %1267 = tpu.matmul %1266, %11, %cst_225 {dimension_numbers = #tpu.dot_dimension_numbers<[1], [0], [0], [1], [0, 0, 1, 1], [], []>} : vector<8x32xf32>, vector<32x32xf32>, vector<8x32xf32> -> vector<8x32xf32>
    %1268 = vector.broadcast %1144 : f32 to vector<8x32xf32>
    %1269 = arith.mulf %1268, %1267 : vector<8x32xf32>
    %1270 = arith.addf %1232, %1269 : vector<8x32xf32>
    %1271 = vector.broadcast %1153 : vector<1x32xf32> to vector<8x32xf32>
    %1272 = arith.addf %1270, %1271 : vector<8x32xf32>
    %1273 = arith.addf %1233, %1266 : vector<8x32xf32>
    %cst_226 = arith.constant 3.000000e+00 : f32
    %1274 = vector.broadcast %cst_226 : f32 to vector<1x32xf32>
    %1275 = arith.mulf %1274, %1146 : vector<1x32xf32>
    %1276 = vector.broadcast %1275 : vector<1x32xf32> to vector<8x32xf32>
    %1277 = arith.addf %1158, %1276 : vector<8x32xf32>
    %1278 = vector.broadcast %1151 : vector<1x32xf32> to vector<8x32xf32>
    %1279 = arith.addf %1277, %1278 : vector<8x32xf32>
    %1280 = vector.broadcast %1154 : vector<1x32xf32> to vector<8x32xf32>
    %1281 = arith.addf %1277, %1280 : vector<8x32xf32>
    %1282 = arith.addf %1272, %1277 : vector<8x32xf32>
    %1283 = math.tanh %1282 : vector<8x32xf32>
    %cst_227 = arith.constant dense<0.000000e+00> : vector<8x32xf32>
    %1284 = tpu.matmul %1283, %11, %cst_227 {dimension_numbers = #tpu.dot_dimension_numbers<[1], [0], [0], [1], [0, 0, 1, 1], [], []>} : vector<8x32xf32>, vector<32x32xf32>, vector<8x32xf32> -> vector<8x32xf32>
    %1285 = vector.broadcast %1143 : f32 to vector<8x32xf32>
    %1286 = arith.mulf %1285, %1284 : vector<8x32xf32>
    %1287 = arith.addf %1272, %1286 : vector<8x32xf32>
    %1288 = arith.addf %1287, %1279 : vector<8x32xf32>
    %1289 = math.tanh %1288 : vector<8x32xf32>
    %cst_228 = arith.constant dense<0.000000e+00> : vector<8x32xf32>
    %1290 = tpu.matmul %1289, %11, %cst_228 {dimension_numbers = #tpu.dot_dimension_numbers<[1], [0], [0], [1], [0, 0, 1, 1], [], []>} : vector<8x32xf32>, vector<32x32xf32>, vector<8x32xf32> -> vector<8x32xf32>
    %1291 = vector.broadcast %1143 : f32 to vector<8x32xf32>
    %1292 = arith.mulf %1291, %1290 : vector<8x32xf32>
    %1293 = arith.addf %1272, %1292 : vector<8x32xf32>
    %1294 = arith.addf %1293, %1279 : vector<8x32xf32>
    %1295 = math.tanh %1294 : vector<8x32xf32>
    %cst_229 = arith.constant dense<0.000000e+00> : vector<8x32xf32>
    %1296 = tpu.matmul %1295, %11, %cst_229 {dimension_numbers = #tpu.dot_dimension_numbers<[1], [0], [0], [1], [0, 0, 1, 1], [], []>} : vector<8x32xf32>, vector<32x32xf32>, vector<8x32xf32> -> vector<8x32xf32>
    %1297 = vector.broadcast %1142 : f32 to vector<8x32xf32>
    %1298 = arith.mulf %1297, %1296 : vector<8x32xf32>
    %1299 = arith.addf %1272, %1298 : vector<8x32xf32>
    %1300 = arith.addf %1299, %1281 : vector<8x32xf32>
    %1301 = math.tanh %1300 : vector<8x32xf32>
    %1302 = arith.addf %1289, %1295 : vector<8x32xf32>
    %cst_230 = arith.constant 2.000000e+00 : f32
    %1303 = vector.broadcast %cst_230 : f32 to vector<8x32xf32>
    %1304 = arith.mulf %1303, %1302 : vector<8x32xf32>
    %1305 = arith.addf %1283, %1304 : vector<8x32xf32>
    %1306 = arith.addf %1305, %1301 : vector<8x32xf32>
    %1307 = arith.addf %1273, %1306 : vector<8x32xf32>
    %cst_231 = arith.constant dense<0.000000e+00> : vector<8x32xf32>
    %1308 = tpu.matmul %1307, %3, %cst_231 {dimension_numbers = #tpu.dot_dimension_numbers<[1], [0], [0], [1], [0, 0, 1, 1], [], []>} : vector<8x32xf32>, vector<32x32xf32>, vector<8x32xf32> -> vector<8x32xf32>
    %1309 = vector.broadcast %1144 : f32 to vector<8x32xf32>
    %1310 = arith.mulf %1309, %1308 : vector<8x32xf32>
    %1311 = arith.addf %1135, %1310 : vector<8x32xf32>
    %cst_232 = arith.constant 4.000000e+00 : f32
    %1312 = arith.mulf %cst_232, %1142 : f32
    %1313 = vector.broadcast %1312 : f32 to vector<1x32xf32>
    %1314 = arith.mulf %1313, %7 : vector<1x32xf32>
    %1315 = vector.broadcast %1314 : vector<1x32xf32> to vector<8x32xf32>
    %1316 = arith.addf %1311, %1315 : vector<8x32xf32>
    %c7_233 = arith.constant 7 : index
    %c0_234 = arith.constant 0 : index
    %c0_235 = arith.constant 0 : index
    %1317 = vector.load %arg4[%c7_233, %c0_234, %c0_235] : memref<8x8x32xf32, #tpu.memory_space<vmem>>, vector<1x8x32xf32>
    %1318 = vector.shape_cast %1317 : vector<1x8x32xf32> to vector<8x32xf32>
    %1319 = vector.shape_cast %1316 : vector<8x32xf32> to vector<1x8x32xf32>
    tpu.vector_store %arg4[%c7_233, %c0_234, %c0_235], %1319 {strides = array<i32>} : memref<8x8x32xf32, #tpu.memory_space<vmem>>, vector<1x8x32xf32>,
    return
  }
}

</mosaic_0001>

<bundles_post_ra>
// kernel: tpu_custom_call.1
= control target key start
LH: loop header
LB: loop body
LE: loop exit
PB: predicated region body
PF: predicated region fallthrough
CT: control target
= control target key end

     0   :  { %9 = vsyncpa [#allocation4], 0  ;;  %s14902_s0 = inlined_call_operand.vmem [shape: f32[8], index: 0, kind: input, shape index: {}]   ;;  %s14903_s1 = inlined_call_operand.vmem [shape: f32[8,32], index: 1, kind: input, shape index: {}]   ;;  %s14904_s2 = inlined_call_operand.vmem [shape: f32[96,32], index: 2, kind: input, shape index: {}]   ;;  %s14905_s3 = inlined_call_operand.vmem [shape: f32[8,32], index: 3, kind: input, shape index: {}]   ;;  %s14906_s4 = inlined_call_operand.hbm [shape: f32[8,8,32], index: 4, kind: output, shape index: {}]  }
   0x1   :  { %10 = vsyncpa [#allocation3], 0  ;;  %s17_s17 = sshll.u32 %s14902_s0, 4  ;;  %s18_s17 = int_to_ptr.vmem [resolvable:$true] %s17_s17 }
   0x2   :  { %s12440_s18 = scalar_lea.vmem %s18_s17, 16  ;;  %p12445_p1 = scmp.lt.s32.totalorder %s18_s17, %s18_s17 }
   0x3   :  { %p12441_p0 = scmp.ne.s32.totalorder %s18_s17, %s12440_s18  ;;  %p12446_p2 = scmp.lt.s32.totalorder %s12440_s18, %s12440_s18 }
   0x5   :  { %p12447_p3 = por %p12446_p2, %p12445_p1 }
   0x7   :  { %p12448_p4 = pnand %p12447_p3, %p12441_p0 }
   0x9   :  { %12451 = shalt.err (!%p12448_p4)
}
   0xa   :  { %s12476_s19 = smov [#allocation2]  }
   0xb   :  { %20 = dma.vmem_to_smem %s18_s17, 16, %s12476_s19, [#allocation4]  }
   0xc   :  { %12472 = dma.done.wait [#allocation4], 16  }
   0xd   :  { %12473 = vsyncadd [#allocation4], 4294967280 }
   0xe   :  { %30 = sfence }
   0xf   :  { %v35_v0 = vld [vmem:[%s14904_s2 + $0x18] sm:$0xff]  ;;  %v34_v2 = vld [vmem:[%s14904_s2 + $0x10] sm:$0xff]  ;;  %v12477_v3 = vmov 0.0   ;;  %v33_v5 = vld [vmem:[%s14904_s2 + $0x8] sm:$0xff]  ;;  %vm49_vm0 = vcmask 261120   ;;  %vm12478_vm1 = vmmov 0   ;;  %v45_v16 = vlaneseq }
  0x10   :  { %v39_v1 = vld [vmem:[%s14904_s2 + $0x38] sm:$0xff]  ;;  %10850 = vmatprep.subr.mxu0 %v12477_v3  ;;  %10861 = vmatprep.subr.mxu1 %v35_v0  ;;  %v38_v4 = vld [vmem:[%s14904_s2 + $0x30] sm:$0xff]  ;;  %v37_v6 = vld [vmem:[%s14904_s2 + $0x28] sm:$0xff]  ;;  %s12604_s20 = sld [smem:[#allocation2 + $0x1]] }
  0x11   :  { %10851 = vmatpush3.msra.mxu0 %v39_v1  ;;  %10862 = vmatpush3.msra.mxu1 %v35_v0  ;;  %v12533_v7 = vld [vmem:[%s14903_s1] sm:$0xff]  ;;  %v12553_v11 = vld [vmem:[%s14904_s2 + $0x48] sm:$0xff]  ;;  %v12568_v12 = vld [vmem:[%s14904_s2 + $0x50] sm:$0xff]  ;;  %s12606_s21 = sld [smem:[#allocation2 + $0x2]]  ;;  %v12608_v17 = vshrl.u32 %v45_v16, 7 }
  0x12   :  { %10852 = vmatprep.subr.mxu0 %v12477_v3  ;;  %10863 = vmatprep.subr.mxu1 %v34_v2  ;;  %v32_v8 = vld [vmem:[%s14904_s2] sm:$0xff]  ;;  %364 = vst.msk [vmem:[#allocation5] sm:$0xff] %vm49_vm0, %v12533_v7  ;;  %v12575_v13 = vld [vmem:[%s14904_s2 + $0x58] sm:$0xff]  ;;  %s365_s22 = sld [smem:[#allocation2]] }
  0x13   :  { %10853 = vmatpush3.msra.mxu0 %v38_v4  ;;  %10864 = vmatpush3.msra.mxu1 %v34_v2  ;;  %v36_v9 = vld [vmem:[%s14904_s2 + $0x20] sm:$0xff]  ;;  %v47_v20 = vsub.s32 1, %v12608_v17  ;;  %v12614_v21 = vsub.s32 0, %v12608_v17  ;;  %s10144_s15 = sld [smem:[#allocation2 + $0x3]] }
  0x14   :  { %10854 = vmatprep.subr.mxu0 %v12477_v3  ;;  %10865 = vmatprep.subr.mxu1 %v33_v5  ;;  %v12547_v10 = vld [vmem:[%s14904_s2 + $0x40] sm:$0xff]  ;;  %s13945_s8 = sld [smem:[#allocation2 + $0x4]] }
  0x15   :  { %10855 = vmatpush3.msra.mxu0 %v37_v6  ;;  %10866 = vmatpush3.msra.mxu1 %v33_v5  ;;  %v12582_v14 = vld [vmem:[%s14905_s3] sm:$0xff]  ;;  %s10182_s11 = sld [smem:[#allocation2 + $0x5]] }
  0x16   :  { %10856 = vmatprep.subr.mxu0 %v12477_v3  ;;  %10867 = vmatprep.subr.mxu1 %v32_v8  ;;  %v221_v15 = vrot.slane %v12582_v14, 2  ;;  %v1778_v18 = vstv %s12604_s20  ;;  %v48_v25 = vrot.slane %v12582_v14, %v47_v20 }
  0x17   :  { %10857 = vmatpush3.msra.mxu0 %v36_v9  ;;  %10868 = vmatpush3.msra.mxu1 %v32_v8  ;;  %v3177_v19 = vstv %s12606_s21  ;;  %v1779_v22 = vmul.f32 %v1778_v18, %v12582_v14  ;;  %s1766_s27 = ssub.f32 %s12606_s21, %s12604_s20 }
  0x18   :  { %10869 = vmatprep.mubr.msk.f32.mxu1 %vm49_vm0, %v12547_v10  ;;  %10858 = vmatprep.mubr.msk.f32.mxu0 %vm12478_vm1, %v12477_v3  ;;  %v3178_v23 = vmul.f32 %v3177_v19, %v12582_v14  ;;  %v379_v24 = vstv %s365_s22  ;;  %s367_s23 = ssub.f32 %s12604_s20, %s365_s22 }
  0x19   :  { %10870 = vmatmul.mubr.msk.f32.vlgmr.msra.gmra.mxu1 %vm49_vm0, %v12553_v11  ;;  %10875 = vmatprep.subr.mxu0 %v12477_v3  ;;  %v380_v27 = vmul.f32 %v379_v24, %v12582_v14  ;;  %v1783_v28 = vrot.slane %v1779_v22, %v12614_v21  ;;  %s12990_s28 = smul.f32 0.25, %s1766_s27  ;;  %s3165_s16 = ssub.f32 %s10144_s15, %s12606_s21 }
  0x1a   :  { %10886 = vmatprep.subr.mxu1 %v12477_v3  ;;  %10859 = vmatmul.mubr.msk.f32.vlgmr.msra.gmra.mxu0 %vm49_vm0, %v12533_v7  ;;  %v3182_v29 = vrot.slane %v3178_v23, %v12614_v21  ;;  %s12625_s0 = smul.f32 0.25, %s367_s23  ;;  %s13606_s20 = sld [smem:[#allocation2 + $0x3]] }
  0x1b   :  { %10876 = vmatpush3.msra.mxu0 %v35_v0  ;;  %10887 = vmatpush3.msra.mxu1 %v35_v0  ;;  %v384_v34 = vrot.slane %v380_v27, %v12614_v21  ;;  %s1768_s29 = smul.f32 0.5, %s12990_s28  ;;  %s10163_s22 = sld [smem:[#allocation2 + $0x4]] }
  0x1c   :  { %10877 = vmatprep.subr.mxu0 %v12477_v3  ;;  %10888 = vmatprep.subr.mxu1 %v12477_v3  ;;  %s369_s24 = smul.f32 0.5, %s12625_s0  ;;  %v12717_v0 = vstv %s12625_s0 }
  0x1d   :  { %10872 = vmatprep.mubr.msk.f32.mxu1 %vm49_vm0, %v12568_v12  ;;  %10878 = vmatpush3.msra.mxu0 %v34_v2  ;;  %s370_s25 = smul.f32 0.16666667, %s12625_s0 }
  0x1e   :  { %10889 = vmatpush3.msra.mxu1 %v34_v2  ;;  %10879 = vmatprep.subr.mxu0 %v12477_v3  ;;  %v12643_v38 = vstv %s369_s24  ;;  %v12723_v2 = vmul.f32 %v12717_v0, %v12582_v14  ;;  %s1754_s26 = smul.f32 4.0, %s12625_s0 }
  0x1f   :  { %10873 = vmatmul.mubr.msk.f32.gmra.mxu1 %vm49_vm0, %v12575_v13  ;;  %10890 = vmatprep.subr.mxu1 %v12477_v3  ;;  %v374_v41 = vmul.f32 %v12643_v38, %v12582_v14  ;;  %s1769_s30 = smul.f32 0.16666667, %s12990_s28 }
  0x20   :  { %10880 = vmatpush3.msra.mxu0 %v33_v5  ;;  %10891 = vmatpush3.msra.mxu1 %v33_v5  ;;  %s3153_s12 = smul.f32 4.0, %s12990_s28 }
  0x21   :  { %10881 = vmatprep.subr.mxu0 %v12477_v3  ;;  %10892 = vmatprep.subr.mxu1 %v12477_v3  ;;  %s13326_s17 = smul.f32 0.25, %s3165_s16  ;;  %s4564_s23 = ssub.f32 %s10163_s22, %s13606_s20 }
  0x22   :  { %10882 = vmatpush3.msra.mxu0 %v32_v8  ;;  %10883 = vmatprep.mubr.msk.f32.mxu0 %vm12478_vm1, %v12477_v3  ;;  %s14269_s16 = sld [smem:[#allocation2 + $0x5]] }
  0x23   :  { %10893 = vmatpush3.msra.mxu1 %v32_v8  ;;  %10894 = vmatprep.mubr.msk.f32.mxu1 %vm12478_vm1, %v12477_v3  ;;  %s3167_s18 = smul.f32 0.5, %s13326_s17 }
  0x24   :  { %10884 = vmatmul.mubr.msk.f32.vlgmr.msra.gmra.mxu0 %vm49_vm0, %v221_v15  ;;  %10895 = vmatmul.mubr.msk.f32.vlgmr.msra.gmra.mxu1 %vm49_vm0, %v12533_v7  ;;  %s3168_s19 = smul.f32 0.16666667, %s13326_s17 }
  0x25   :  { %10897 = vmatprep.subr.mxu0 %v12477_v3  ;;  %10908 = vmatprep.subr.mxu1 %v12477_v3  ;;  %s4552_s21 = smul.f32 4.0, %s13326_s17 }
  0x26   :  { %10905 = vmatprep.mubr.msk.f32.mxu0 %vm12478_vm1, %v12477_v3  ;;  %10916 = vmatprep.mubr.msk.f32.mxu1 %vm12478_vm1, %v12477_v3  ;;  %s13645_s0 = smul.f32 0.25, %s4564_s23 }
  0x28   :  { %s4566_s24 = smul.f32 0.5, %s13645_s0 }
  0x29   :  { %s5951_s9 = smul.f32 4.0, %s13645_s0 }
  0xd9   :  { %v12620_v26 = vpop.f32.mrf.mxu1 }
  0xda   :  { %v119_v30 = vpop.f32.mrf.mxu0 }
  0xdb   :  { %v12627_v31 = vpop.f32.mrf.mxu1  ;;  %v12629_v32 = vadd.f32 %v119_v30, %v48_v25  ;;  %v12748_v25 = vstv %s370_s25  ;;  %s4567_s25 = smul.f32 0.16666667, %s13645_s0 }
  0xdc   :  { %v10860_v33 = vpop.f32.mrf.mxu0 }
  0xdd   :  { %v12634_v35 = vadd.f32 %v1783_v28, %v12629_v32  ;;  %v12637_v36 = vadd.f32 %v3182_v29, %v12629_v32  ;;  %v12646_v39 = vadd.f32 %v384_v34, %v12629_v32  ;;  %v717_v29 = vrot.slane %v12723_v2, %v12614_v21 }
  0xdf   :  { %v12639_v37 = vpop.f32.mrf.mxu1 }
  0xe0   :  { %10898 = vmatpush3.msra.mxu0 %v12639_v37  ;;  %10909 = vmatpush3.msra.mxu1 %v12639_v37 }
  0xe1   :  { %v12648_v40 = vpop.f32.mrf.mxu1  ;;  %10899 = vmatprep.subr.mxu0 %v12477_v3  ;;  %10910 = vmatprep.subr.mxu1 %v12477_v3 }
  0xe2   :  { %10900 = vmatpush3.msra.mxu0 %v12648_v40  ;;  %10911 = vmatpush3.msra.mxu1 %v12648_v40 }
  0xe3   :  { %10901 = vmatprep.subr.mxu0 %v12477_v3  ;;  %10912 = vmatprep.subr.mxu1 %v12477_v3 }
  0xe4   :  { %v12658_v42 = vpop.f32.mrf.mxu0  ;;  %v12660_v43 = vpop.f32.mrf.mxu1  ;;  %10902 = vmatpush3.msra.mxu0 %v12620_v26  ;;  %10913 = vmatpush3.msra.mxu1 %v12620_v26 }
  0xe5   :  { %v396_v44 = vadd.f32 %v12646_v39, %v12660_v43  ;;  %10903 = vmatprep.subr.mxu0 %v12477_v3  ;;  %10914 = vmatprep.subr.mxu1 %v12477_v3  ;;  %v375_v45 = vmul.f32 %v12643_v38, %v12658_v42  ;;  %v377_v1 = vmul.f32 %v12717_v0, %v12658_v42 }
  0xe6   :  { %v10896_v46 = vpop.f32.mrf.mxu1  ;;  %10904 = vmatpush3.msra.mxu0 %v12627_v31  ;;  %10915 = vmatpush3.msra.mxu1 %v12627_v31  ;;  %v10885_v47 = vpop.f32.mrf.mxu0 }
  0xe7   :  { %12201 = vtanh.f32 %v396_v44  ;;  %10919 = vmatprep.subr.mxu0 %v12477_v3  ;;  %v376_v48 = vadd.f32 %v375_v45, %v374_v41  ;;  %10930 = vmatprep.subr.mxu1 %v12477_v3  ;;  %v378_v4 = vadd.f32 %v377_v1, %v12723_v2  ;;  %v12755_v34 = vrot.slane %v377_v1, %v12614_v21 }
  0xe8   :  { %v718_v44 = vadd.f32 %v717_v29, %v12646_v39 }
  0xe9   :  { %v12675_v49 = vrot.slane %v376_v48, %v12614_v21  ;;  %v12727_v5 = vrot.slane %v378_v4, %v12614_v21 }
  0xeb   :  { %v390_v50 = vadd.f32 %v12675_v49, %v12646_v39  ;;  %v395_v15 = vadd.f32 %v12727_v5, %v12646_v39 }
  0xf4   :  { %v12202_v51 = vpop.eup %12201 }
  0xf5   :  { %10906 = vmatmul.mubr.msk.f32.vlgmr.msra.gmra.mxu0 %vm49_vm0, %v12202_v51 }
  0xf6   :  { %10920 = vmatpush3.msra.mxu0 %v12639_v37  ;;  %10927 = vmatprep.mubr.msk.f32.mxu0 %vm12478_vm1, %v12477_v3 }
  0xf7   :  { %10921 = vmatprep.subr.mxu0 %v12477_v3 }
  0xf8   :  { %10922 = vmatpush3.msra.mxu0 %v12648_v40 }
  0xf9   :  { %10923 = vmatprep.subr.mxu0 %v12477_v3 }
  0xfa   :  { %10924 = vmatpush3.msra.mxu0 %v12620_v26 }
  0xfb   :  { %10925 = vmatprep.subr.mxu0 %v12477_v3 }
  0xfc   :  { %10926 = vmatpush3.msra.mxu0 %v12627_v31 }
  0xfd   :  { %10941 = vmatprep.subr.mxu0 %v12477_v3 }
 0x1b5   :  { %v467_v52 = vpop.f32.mrf.mxu0 }
 0x1b6   :  { %v471_v53 = vmul.f32 %v467_v52, %v12643_v38 }
 0x1b7   :  { %v10907_v54 = vpop.f32.mrf.mxu0 }
 0x1b8   :  { %v472_v55 = vadd.f32 %v471_v53, %v12660_v43 }
 0x1ba   :  { %v473_v56 = vadd.f32 %v472_v55, %v390_v50 }
 0x1bc   :  { %12203 = vtanh.f32 %v473_v56 }
 0x1c9   :  { %v12204_v57 = vpop.eup %12203 }
 0x1ca   :  { %10917 = vmatmul.mubr.msk.f32.vlgmr.msra.gmra.mxu1 %vm49_vm0, %v12204_v57 }
 0x1cb   :  { %10931 = vmatpush3.msra.mxu1 %v12639_v37  ;;  %10938 = vmatprep.mubr.msk.f32.mxu1 %vm12478_vm1, %v12477_v3 }
 0x1cc   :  { %10932 = vmatprep.subr.mxu1 %v12477_v3 }
 0x1cd   :  { %10933 = vmatpush3.msra.mxu1 %v12648_v40 }
 0x1ce   :  { %10934 = vmatprep.subr.mxu1 %v12477_v3 }
 0x1cf   :  { %10935 = vmatpush3.msra.mxu1 %v12620_v26 }
 0x1d0   :  { %10936 = vmatprep.subr.mxu1 %v12477_v3 }
 0x1d1   :  { %10937 = vmatpush3.msra.mxu1 %v12627_v31 }
 0x1d2   :  { %10952 = vmatprep.subr.mxu1 %v12477_v3 }
 0x28a   :  { %v544_v58 = vpop.f32.mrf.mxu1 }
 0x28b   :  { %v548_v59 = vmul.f32 %v544_v58, %v12643_v38 }
 0x28c   :  { %v10918_v60 = vpop.f32.mrf.mxu1 }
 0x28d   :  { %v549_v61 = vadd.f32 %v548_v59, %v12660_v43 }
 0x28f   :  { %v550_v62 = vadd.f32 %v549_v61, %v390_v50  ;;  %v719_v50 = vadd.f32 %v718_v44, %v12675_v49 }
 0x291   :  { %12205 = vtanh.f32 %v550_v62 }
 0x29e   :  { %v12206_v63 = vpop.eup %12205 }
 0x29f   :  { %10928 = vmatmul.mubr.msk.f32.vlgmr.msra.gmra.mxu0 %vm49_vm0, %v12206_v63  ;;  %v629_v19 = vadd.f32 %v12206_v63, %v12204_v57  ;;  %v720_v63 = vadd.f32 %v718_v44, %v12727_v5 }
 0x2a0   :  { %10942 = vmatpush3.msra.mxu0 %v12639_v37  ;;  %10949 = vmatprep.mubr.msk.f32.mxu0 %vm12478_vm1, %v12477_v3 }
 0x2a1   :  { %10943 = vmatprep.subr.mxu0 %v12477_v3  ;;  %v630_v20 = vmul.f32 2.0, %v629_v19 }
 0x2a2   :  { %10944 = vmatpush3.msra.mxu0 %v12648_v40 }
 0x2a3   :  { %10945 = vmatprep.subr.mxu0 %v12477_v3  ;;  %v631_v22 = vadd.f32 %v12202_v51, %v630_v20 }
 0x2a4   :  { %10946 = vmatpush3.msra.mxu0 %v12620_v26 }
 0x2a5   :  { %10947 = vmatprep.subr.mxu0 %v12477_v3 }
 0x2a6   :  { %10948 = vmatpush3.msra.mxu0 %v12627_v31 }
 0x2a7   :  { %10963 = vmatprep.subr.mxu0 %v12477_v3 }
 0x35f   :  { %v621_v6 = vpop.f32.mrf.mxu0 }
 0x360   :  { %v625_v8 = vmul.f32 %v621_v6, %v12717_v0 }
 0x361   :  { %v10929_v9 = vpop.f32.mrf.mxu0 }
 0x362   :  { %v626_v16 = vadd.f32 %v625_v8, %v12660_v43 }
 0x364   :  { %v627_v18 = vadd.f32 %v626_v16, %v395_v15 }
 0x366   :  { %12207 = vtanh.f32 %v627_v18  ;;  %v1035_v18 = vmul.f32 2.0, %v12723_v2 }
 0x373   :  { %v12208_v23 = vpop.eup %12207 }
 0x374   :  { %v12733_v24 = vadd.f32 %v12208_v23, %v631_v22  ;;  %v1039_v22 = vrot.slane %v1035_v18, %v12614_v21 }
 0x376   :  { %10939 = vmatmul.mubr.msk.f32.vlgmr.msra.gmra.mxu1 %vm49_vm0, %v12733_v24  ;;  %v1040_v29 = vadd.f32 %v1039_v22, %v12646_v39 }
 0x377   :  { %10953 = vmatpush3.msra.mxu1 %v12639_v37  ;;  %10960 = vmatprep.mubr.msk.f32.mxu1 %vm12478_vm1, %v12477_v3 }
 0x378   :  { %10954 = vmatprep.subr.mxu1 %v12477_v3 }
 0x379   :  { %10955 = vmatpush3.msra.mxu1 %v12648_v40 }
 0x37a   :  { %10956 = vmatprep.subr.mxu1 %v12477_v3 }
 0x37b   :  { %10957 = vmatpush3.msra.mxu1 %v12620_v26 }
 0x37c   :  { %10958 = vmatprep.subr.mxu1 %v12477_v3 }
 0x37d   :  { %10959 = vmatpush3.msra.mxu1 %v12627_v31 }
 0x37e   :  { %10974 = vmatprep.subr.mxu1 %v12477_v3 }
 0x436   :  { %v702_v27 = vpop.f32.mrf.mxu1 }
 0x437   :  { %v707_v28 = vmul.f32 %v12748_v25, %v702_v27 }
 0x438   :  { %v10940_v30 = vpop.f32.mrf.mxu1 }
 0x439   :  { %v708_v33 = vadd.f32 %v707_v28, %v12660_v43 }
 0x43b   :  { %v12758_v41 = vadd.f32 %v12755_v34, %v708_v33 }
 0x43d   :  { %v721_v45 = vadd.f32 %v718_v44, %v12758_v41 }
 0x43f   :  { %12209 = vtanh.f32 %v721_v45 }
 0x44c   :  { %v12210_v46 = vpop.eup %12209 }
 0x44d   :  { %10950 = vmatmul.mubr.msk.f32.vlgmr.msra.gmra.mxu0 %vm49_vm0, %v12210_v46 }
 0x44e   :  { %10964 = vmatpush3.msra.mxu0 %v12639_v37  ;;  %10971 = vmatprep.mubr.msk.f32.mxu0 %vm12478_vm1, %v12477_v3 }
 0x44f   :  { %10965 = vmatprep.subr.mxu0 %v12477_v3 }
 0x450   :  { %10966 = vmatpush3.msra.mxu0 %v12648_v40 }
 0x451   :  { %10967 = vmatprep.subr.mxu0 %v12477_v3 }
 0x452   :  { %10968 = vmatpush3.msra.mxu0 %v12620_v26 }
 0x453   :  { %10969 = vmatprep.subr.mxu0 %v12477_v3 }
 0x454   :  { %10970 = vmatpush3.msra.mxu0 %v12627_v31 }
 0x455   :  { %10985 = vmatprep.subr.mxu0 %v12477_v3 }
 0x50d   :  { %v792_v43 = vpop.f32.mrf.mxu0 }
 0x50e   :  { %v796_v47 = vmul.f32 %v792_v43, %v12643_v38 }
 0x50f   :  { %v10951_v48 = vpop.f32.mrf.mxu0 }
 0x510   :  { %v797_v51 = vadd.f32 %v796_v47, %v12758_v41 }
 0x512   :  { %v798_v52 = vadd.f32 %v797_v51, %v719_v50 }
 0x514   :  { %12211 = vtanh.f32 %v798_v52 }
 0x521   :  { %v12212_v53 = vpop.eup %12211 }
 0x522   :  { %10961 = vmatmul.mubr.msk.f32.vlgmr.msra.gmra.mxu1 %vm49_vm0, %v12212_v53 }
 0x523   :  { %10975 = vmatpush3.msra.mxu1 %v12639_v37  ;;  %10982 = vmatprep.mubr.msk.f32.mxu1 %vm12478_vm1, %v12477_v3 }
 0x524   :  { %10976 = vmatprep.subr.mxu1 %v12477_v3 }
 0x525   :  { %10977 = vmatpush3.msra.mxu1 %v12648_v40 }
 0x526   :  { %10978 = vmatprep.subr.mxu1 %v12477_v3 }
 0x527   :  { %10979 = vmatpush3.msra.mxu1 %v12620_v26 }
 0x528   :  { %10980 = vmatprep.subr.mxu1 %v12477_v3 }
 0x529   :  { %10981 = vmatpush3.msra.mxu1 %v12627_v31 }
 0x52a   :  { %10996 = vmatprep.subr.mxu1 %v12477_v3 }
 0x5e2   :  { %v869_v54 = vpop.f32.mrf.mxu1 }
 0x5e3   :  { %v873_v55 = vmul.f32 %v869_v54, %v12643_v38 }
 0x5e4   :  { %v10962_v56 = vpop.f32.mrf.mxu1 }
 0x5e5   :  { %v874_v57 = vadd.f32 %v873_v55, %v12758_v41 }
 0x5e7   :  { %v875_v58 = vadd.f32 %v874_v57, %v719_v50 }
 0x5e9   :  { %12213 = vtanh.f32 %v875_v58 }
 0x5f6   :  { %v12214_v59 = vpop.eup %12213 }
 0x5f7   :  { %10972 = vmatmul.mubr.msk.f32.vlgmr.msra.gmra.mxu0 %vm49_vm0, %v12214_v59  ;;  %v954_v6 = vadd.f32 %v12214_v59, %v12212_v53  ;;  %v1042_v59 = vadd.f32 %v1040_v29, %v12727_v5 }
 0x5f8   :  { %10986 = vmatpush3.msra.mxu0 %v12639_v37  ;;  %10993 = vmatprep.mubr.msk.f32.mxu0 %vm12478_vm1, %v12477_v3 }
 0x5f9   :  { %10987 = vmatprep.subr.mxu0 %v12477_v3  ;;  %v955_v8 = vmul.f32 2.0, %v954_v6 }
 0x5fa   :  { %10988 = vmatpush3.msra.mxu0 %v12648_v40 }
 0x5fb   :  { %10989 = vmatprep.subr.mxu0 %v12477_v3  ;;  %v956_v9 = vadd.f32 %v12210_v46, %v955_v8  ;;  %v1041_v46 = vadd.f32 %v1040_v29, %v12675_v49 }
 0x5fc   :  { %10990 = vmatpush3.msra.mxu0 %v12620_v26 }
 0x5fd   :  { %10991 = vmatprep.subr.mxu0 %v12477_v3 }
 0x5fe   :  { %10992 = vmatpush3.msra.mxu0 %v12627_v31 }
 0x5ff   :  { %11007 = vmatprep.subr.mxu0 %v12477_v3 }
 0x6b7   :  { %v946_v60 = vpop.f32.mrf.mxu0 }
 0x6b8   :  { %v950_v61 = vmul.f32 %v946_v60, %v12717_v0 }
 0x6b9   :  { %v10973_v62 = vpop.f32.mrf.mxu0 }
 0x6ba   :  { %v951_v1 = vadd.f32 %v950_v61, %v12758_v41 }
 0x6bc   :  { %v952_v4 = vadd.f32 %v951_v1, %v720_v63 }
 0x6be   :  { %12215 = vtanh.f32 %v952_v4 }
 0x6cb   :  { %v12216_v15 = vpop.eup %12215 }
 0x6cc   :  { %v12803_v16 = vadd.f32 %v12216_v15, %v956_v9 }
 0x6ce   :  { %10983 = vmatmul.mubr.msk.f32.vlgmr.msra.gmra.mxu1 %vm49_vm0, %v12803_v16  ;;  %v1034_v6 = vadd.f32 %v12803_v16, %v12733_v24  ;;  %v1357_v24 = vmul.f32 3.0, %v12723_v2 }
 0x6cf   :  { %10997 = vmatpush3.msra.mxu1 %v12639_v37  ;;  %11004 = vmatprep.mubr.msk.f32.mxu1 %vm12478_vm1, %v12477_v3 }
 0x6d0   :  { %10998 = vmatprep.subr.mxu1 %v12477_v3  ;;  %v1361_v18 = vrot.slane %v1357_v24, %v12614_v21 }
 0x6d1   :  { %10999 = vmatpush3.msra.mxu1 %v12648_v40 }
 0x6d2   :  { %11000 = vmatprep.subr.mxu1 %v12477_v3 }
 0x6d3   :  { %11001 = vmatpush3.msra.mxu1 %v12620_v26 }
 0x6d4   :  { %11002 = vmatprep.subr.mxu1 %v12477_v3 }
 0x6d5   :  { %11003 = vmatpush3.msra.mxu1 %v12627_v31 }
 0x6d6   :  { %11018 = vmatprep.subr.mxu1 %v12477_v3 }
 0x78e   :  { %v1027_v19 = vpop.f32.mrf.mxu1 }
 0x78f   :  { %v1031_v20 = vmul.f32 %v1027_v19, %v12748_v25 }
 0x790   :  { %v10984_v23 = vpop.f32.mrf.mxu1 }
 0x791   :  { %v1032_v27 = vadd.f32 %v1031_v20, %v12758_v41  ;;  %v1362_v23 = vadd.f32 %v1361_v18, %v12646_v39 }
 0x793   :  { %v12822_v28 = vadd.f32 %v1032_v27, %v12755_v34 }
 0x795   :  { %v1043_v30 = vadd.f32 %v1040_v29, %v12822_v28 }
 0x797   :  { %12217 = vtanh.f32 %v1043_v30  ;;  %v1363_v30 = vadd.f32 %v1362_v23, %v12675_v49 }
 0x7a4   :  { %v12218_v33 = vpop.eup %12217 }
 0x7a5   :  { %10994 = vmatmul.mubr.msk.f32.vlgmr.msra.gmra.mxu0 %vm49_vm0, %v12218_v33 }
 0x7a6   :  { %11008 = vmatpush3.msra.mxu0 %v12639_v37  ;;  %11015 = vmatprep.mubr.msk.f32.mxu0 %vm12478_vm1, %v12477_v3 }
 0x7a7   :  { %11009 = vmatprep.subr.mxu0 %v12477_v3 }
 0x7a8   :  { %11010 = vmatpush3.msra.mxu0 %v12648_v40 }
 0x7a9   :  { %11011 = vmatprep.subr.mxu0 %v12477_v3 }
 0x7aa   :  { %11012 = vmatpush3.msra.mxu0 %v12620_v26 }
 0x7ab   :  { %11013 = vmatprep.subr.mxu0 %v12477_v3 }
 0x7ac   :  { %11014 = vmatpush3.msra.mxu0 %v12627_v31 }
 0x7ad   :  { %11029 = vmatprep.subr.mxu0 %v12477_v3 }
 0x865   :  { %v1114_v41 = vpop.f32.mrf.mxu0 }
 0x866   :  { %v1118_v44 = vmul.f32 %v1114_v41, %v12643_v38 }
 0x867   :  { %v10995_v45 = vpop.f32.mrf.mxu0 }
 0x868   :  { %v1119_v43 = vadd.f32 %v1118_v44, %v12822_v28 }
 0x86a   :  { %v1120_v47 = vadd.f32 %v1119_v43, %v1041_v46 }
 0x86c   :  { %12219 = vtanh.f32 %v1120_v47 }
 0x879   :  { %v12220_v48 = vpop.eup %12219 }
 0x87a   :  { %11005 = vmatmul.mubr.msk.f32.vlgmr.msra.gmra.mxu1 %vm49_vm0, %v12220_v48 }
 0x87b   :  { %11019 = vmatpush3.msra.mxu1 %v12639_v37  ;;  %11026 = vmatprep.mubr.msk.f32.mxu1 %vm12478_vm1, %v12477_v3 }
 0x87c   :  { %11020 = vmatprep.subr.mxu1 %v12477_v3 }
 0x87d   :  { %11021 = vmatpush3.msra.mxu1 %v12648_v40 }
 0x87e   :  { %11022 = vmatprep.subr.mxu1 %v12477_v3 }
 0x87f   :  { %11023 = vmatpush3.msra.mxu1 %v12620_v26 }
 0x880   :  { %11024 = vmatprep.subr.mxu1 %v12477_v3 }
 0x881   :  { %11025 = vmatpush3.msra.mxu1 %v12627_v31 }
 0x882   :  { %11040 = vmatprep.subr.mxu1 %v12477_v3 }
 0x93a   :  { %v1191_v50 = vpop.f32.mrf.mxu1 }
 0x93b   :  { %v1195_v51 = vmul.f32 %v1191_v50, %v12643_v38 }
 0x93c   :  { %v11006_v52 = vpop.f32.mrf.mxu1 }
 0x93d   :  { %v1196_v53 = vadd.f32 %v1195_v51, %v12822_v28  ;;  %v1364_v51 = vadd.f32 %v1362_v23, %v12727_v5  ;;  %v12957_v5 = vsub.s32 2, %v12608_v17 }
 0x93f   :  { %v1197_v54 = vadd.f32 %v1196_v53, %v1041_v46 }
 0x941   :  { %12221 = vtanh.f32 %v1197_v54 }
 0x94e   :  { %v12222_v55 = vpop.eup %12221 }
 0x94f   :  { %11016 = vmatmul.mubr.msk.f32.vlgmr.msra.gmra.mxu0 %vm49_vm0, %v12222_v55  ;;  %v1276_v62 = vadd.f32 %v12222_v55, %v12220_v48 }
 0x950   :  { %11030 = vmatpush3.msra.mxu0 %v12639_v37  ;;  %11037 = vmatprep.mubr.msk.f32.mxu0 %vm12478_vm1, %v12477_v3 }
 0x951   :  { %11031 = vmatprep.subr.mxu0 %v12477_v3  ;;  %v1277_v63 = vmul.f32 2.0, %v1276_v62 }
 0x952   :  { %11032 = vmatpush3.msra.mxu0 %v12648_v40 }
 0x953   :  { %11033 = vmatprep.subr.mxu0 %v12477_v3  ;;  %v1278_v1 = vadd.f32 %v12218_v33, %v1277_v63 }
 0x954   :  { %11034 = vmatpush3.msra.mxu0 %v12620_v26 }
 0x955   :  { %11035 = vmatprep.subr.mxu0 %v12477_v3 }
 0x956   :  { %11036 = vmatpush3.msra.mxu0 %v12627_v31 }
 0x957   :  { %11051 = vmatprep.subr.mxu0 %v12477_v3 }
 0xa0f   :  { %v1268_v56 = vpop.f32.mrf.mxu0 }
 0xa10   :  { %v1272_v57 = vmul.f32 %v1268_v56, %v12717_v0 }
 0xa11   :  { %v11017_v58 = vpop.f32.mrf.mxu0 }
 0xa12   :  { %v1273_v60 = vadd.f32 %v1272_v57, %v12822_v28 }
 0xa14   :  { %v1274_v61 = vadd.f32 %v1273_v60, %v1042_v59 }
 0xa16   :  { %12223 = vtanh.f32 %v1274_v61 }
 0xa23   :  { %v12224_v4 = vpop.eup %12223 }
 0xa24   :  { %v1279_v8 = vadd.f32 %v12224_v4, %v1278_v1 }
 0xa26   :  { %11027 = vmatmul.mubr.msk.f32.vlgmr.msra.gmra.mxu1 %vm49_vm0, %v1279_v8  ;;  %v12870_v9 = vadd.f32 %v1279_v8, %v1034_v6 }
 0xa27   :  { %11041 = vmatpush3.msra.mxu1 %v12639_v37  ;;  %11048 = vmatprep.mubr.msk.f32.mxu1 %vm12478_vm1, %v12477_v3 }
 0xa28   :  { %11042 = vmatprep.subr.mxu1 %v12477_v3 }
 0xa29   :  { %11043 = vmatpush3.msra.mxu1 %v12648_v40 }
 0xa2a   :  { %11044 = vmatprep.subr.mxu1 %v12477_v3 }
 0xa2b   :  { %11045 = vmatpush3.msra.mxu1 %v12620_v26 }
 0xa2c   :  { %11046 = vmatprep.subr.mxu1 %v12477_v3 }
 0xa2d   :  { %11047 = vmatpush3.msra.mxu1 %v12627_v31 }
 0xa2e   :  { %11062 = vmatprep.subr.mxu1 %v12477_v3 }
 0xae6   :  { %v1349_v15 = vpop.f32.mrf.mxu1 }
 0xae7   :  { %v1353_v16 = vmul.f32 %v1349_v15, %v12748_v25 }
 0xae8   :  { %v11028_v19 = vpop.f32.mrf.mxu1 }
 0xae9   :  { %v1354_v20 = vadd.f32 %v1353_v16, %v12822_v28 }
 0xaeb   :  { %v12887_v22 = vadd.f32 %v1354_v20, %v12755_v34 }
 0xaed   :  { %v1365_v27 = vadd.f32 %v1362_v23, %v12887_v22 }
 0xaef   :  { %12225 = vtanh.f32 %v1365_v27 }
 0xafc   :  { %v12226_v29 = vpop.eup %12225 }
 0xafd   :  { %11038 = vmatmul.mubr.msk.f32.vlgmr.msra.gmra.mxu0 %vm49_vm0, %v12226_v29 }
 0xafe   :  { %11052 = vmatpush3.msra.mxu0 %v12639_v37  ;;  %11059 = vmatprep.mubr.msk.f32.mxu0 %vm12478_vm1, %v12477_v3 }
 0xaff   :  { %11053 = vmatprep.subr.mxu0 %v12477_v3 }
 0xb00   :  { %11054 = vmatpush3.msra.mxu0 %v12648_v40 }
 0xb01   :  { %11055 = vmatprep.subr.mxu0 %v12477_v3 }
 0xb02   :  { %11056 = vmatpush3.msra.mxu0 %v12620_v26 }
 0xb03   :  { %11057 = vmatprep.subr.mxu0 %v12477_v3 }
 0xb04   :  { %11058 = vmatpush3.msra.mxu0 %v12627_v31 }
 0xb05   :  { %11073 = vmatprep.subr.mxu0 %v12477_v3 }
 0xbbd   :  { %v1436_v39 = vpop.f32.mrf.mxu0 }
 0xbbe   :  { %v1440_v2 = vmul.f32 %v1436_v39, %v12643_v38 }
 0xbbf   :  { %v11039_v28 = vpop.f32.mrf.mxu0 }
 0xbc0   :  { %v1441_v33 = vadd.f32 %v1440_v2, %v12887_v22 }
 0xbc2   :  { %v1442_v41 = vadd.f32 %v1441_v33, %v1363_v30 }
 0xbc4   :  { %12227 = vtanh.f32 %v1442_v41 }
 0xbd1   :  { %v12228_v44 = vpop.eup %12227 }
 0xbd2   :  { %11049 = vmatmul.mubr.msk.f32.vlgmr.msra.gmra.mxu1 %vm49_vm0, %v12228_v44 }
 0xbd3   :  { %11063 = vmatpush3.msra.mxu1 %v12639_v37  ;;  %11070 = vmatprep.mubr.msk.f32.mxu1 %vm12478_vm1, %v12477_v3 }
 0xbd4   :  { %11064 = vmatprep.subr.mxu1 %v12477_v3 }
 0xbd5   :  { %11065 = vmatpush3.msra.mxu1 %v12648_v40 }
 0xbd6   :  { %11066 = vmatprep.subr.mxu1 %v12477_v3 }
 0xbd7   :  { %11067 = vmatpush3.msra.mxu1 %v12620_v26 }
 0xbd8   :  { %11068 = vmatprep.subr.mxu1 %v12477_v3 }
 0xbd9   :  { %11069 = vmatpush3.msra.mxu1 %v12627_v31 }
 0xbda   :  { %11084 = vmatprep.subr.mxu1 %v12477_v3 }
 0xc92   :  { %v1513_v49 = vpop.f32.mrf.mxu1 }
 0xc93   :  { %v1517_v45 = vmul.f32 %v1513_v49, %v12643_v38 }
 0xc94   :  { %v11050_v46 = vpop.f32.mrf.mxu1 }
 0xc95   :  { %v1518_v43 = vadd.f32 %v1517_v45, %v12887_v22 }
 0xc97   :  { %v1519_v47 = vadd.f32 %v1518_v43, %v1363_v30 }
 0xc99   :  { %12229 = vtanh.f32 %v1519_v47 }
 0xca6   :  { %v12230_v48 = vpop.eup %12229 }
 0xca7   :  { %11060 = vmatmul.mubr.msk.f32.vlgmr.msra.gmra.mxu0 %vm49_vm0, %v12230_v48 }
 0xca8   :  { %11074 = vmatpush3.msra.mxu0 %v12575_v13  ;;  %11081 = vmatprep.mubr.msk.f32.mxu0 %vm12478_vm1, %v12477_v3 }
 0xca9   :  { %11075 = vmatprep.subr.mxu0 %v12477_v3 }
 0xcaa   :  { %11076 = vmatpush3.msra.mxu0 %v12568_v12  ;;  %v1598_v12 = vadd.f32 %v12230_v48, %v12228_v44  ;;  %v13031_v44 = vstv %s12990_s28 }
 0xcab   :  { %11077 = vmatprep.subr.mxu0 %v12477_v3  ;;  %v1776_v49 = vmul.f32 %v13031_v44, %v12658_v42  ;;  %v13037_v45 = vmul.f32 %v13031_v44, %v12582_v14 }
 0xcac   :  { %11078 = vmatpush3.msra.mxu0 %v12553_v11  ;;  %v1599_v54 = vmul.f32 2.0, %v1598_v12 }
 0xcad   :  { %11079 = vmatprep.subr.mxu0 %v12477_v3  ;;  %v1777_v46 = vadd.f32 %v1776_v49, %v13037_v45 }
 0xcae   :  { %11080 = vmatpush3.msra.mxu0 %v12547_v10  ;;  %v1600_v55 = vadd.f32 %v12226_v29, %v1599_v54 }
 0xcaf   :  { %11095 = vmatprep.subr.mxu0 %v12477_v3  ;;  %v13041_v43 = vrot.slane %v1777_v46, %v12614_v21  ;;  %v2434_v46 = vmul.f32 2.0, %v13037_v45 }
 0xd67   :  { %v1590_v38 = vpop.f32.mrf.mxu0 }
 0xd68   :  { %v1594_v13 = vmul.f32 %v1590_v38, %v12717_v0  ;;  %v1755_v0 = vstv %s1754_s26 }
 0xd69   :  { %v11061_v50 = vpop.f32.mrf.mxu0  ;;  %v1756_v57 = vmul.f32 %v1755_v0, %v12582_v14 }
 0xd6a   :  { %v1595_v52 = vadd.f32 %v1594_v13, %v12887_v22  ;;  %v1794_v13 = vadd.f32 %v13041_v43, %v12634_v35 }
 0xd6b   :  { %v1760_v1 = vrot.slane %v1756_v57, %v12957_v5 }
 0xd6c   :  { %v1596_v53 = vadd.f32 %v1595_v52, %v1364_v51 }
 0xd6e   :  { %12231 = vtanh.f32 %v1596_v53 }
 0xd7b   :  { %v12232_v11 = vpop.eup %12231 }
 0xd7c   :  { %v1601_v56 = vadd.f32 %v12232_v11, %v1600_v55  ;;  %v13063_v55 = vstv %s1769_s30 }
 0xd7e   :  { %11071 = vmatmul.mubr.msk.f32.vlgmr.msra.gmra.mxu1 %vm49_vm0, %v1601_v56  ;;  %v1678_v10 = vadd.f32 %v1601_v56, %v12870_v9 }
 0xd7f   :  { %11085 = vmatpush3.msra.mxu1 %v12639_v37  ;;  %11092 = vmatprep.mubr.msk.f32.mxu1 %vm12478_vm1, %v12477_v3 }
 0xd80   :  { %11086 = vmatprep.subr.mxu1 %v12477_v3  ;;  %11082 = vmatmul.mubr.msk.f32.vlgmr.msra.gmra.mxu0 %vm49_vm0, %v1678_v10  ;;  %v2116_v10 = vrot.slane %v13037_v45, %v12614_v21 }
 0xd81   :  { %11087 = vmatpush3.msra.mxu1 %v12648_v40  ;;  %11096 = vmatpush3.msra.mxu0 %v12639_v37 }
 0xd82   :  { %11088 = vmatprep.subr.mxu1 %v12477_v3  ;;  %11097 = vmatprep.subr.mxu0 %v12477_v3 }
 0xd83   :  { %11089 = vmatpush3.msra.mxu1 %v12620_v26  ;;  %11098 = vmatpush3.msra.mxu0 %v12648_v40 }
 0xd84   :  { %11090 = vmatprep.subr.mxu1 %v12477_v3  ;;  %11099 = vmatprep.subr.mxu0 %v12477_v3 }
 0xd85   :  { %11091 = vmatpush3.msra.mxu1 %v12627_v31  ;;  %11100 = vmatpush3.msra.mxu0 %v12620_v26 }
 0xd86   :  { %11101 = vmatprep.subr.mxu0 %v12477_v3  ;;  %11106 = vmatprep.subr.mxu1 %v12477_v3 }
 0xd87   :  { %11102 = vmatpush3.msra.mxu0 %v12627_v31  ;;  %11103 = vmatprep.mubr.msk.f32.mxu0 %vm12478_vm1, %v12477_v3 }
 0xd88   :  { %11117 = vmatprep.subr.mxu0 %v12477_v3 }
 0xe3e   :  { %v1671_v58 = vpop.f32.mrf.mxu1 }
 0xe3f   :  { %v1675_v59 = vmul.f32 %v1671_v58, %v12748_v25  ;;  %v13070_v58 = vrot.slane %v1776_v49, %v12614_v21 }
 0xe40   :  { %v11072_v60 = vpop.f32.mrf.mxu1  ;;  %v1748_v61 = vpop.f32.mrf.mxu0 }
 0xe41   :  { %v1676_v62 = vadd.f32 %v1675_v59, %v12887_v22  ;;  %v1752_v63 = vmul.f32 %v1748_v61, %v12748_v25  ;;  %v2117_v60 = vadd.f32 %v2116_v10, %v12634_v35 }
 0xe42   :  { %v11083_v4 = vpop.f32.mrf.mxu0 }
 0xe43   :  { %v12965_v6 = vadd.f32 %v1676_v62, %v12755_v34  ;;  %v1753_v17 = vadd.f32 %v1752_v63, %v12533_v7  ;;  %v12993_v7 = vstv %s1768_s29 }
 0xe44   :  { %v1773_v34 = vmul.f32 %v12993_v7, %v12582_v14  ;;  %v1774_v24 = vmul.f32 %v12993_v7, %v12658_v42 }
 0xe45   :  { %v1795_v8 = vadd.f32 %v12634_v35, %v12965_v6  ;;  %v12970_v9 = vadd.f32 %v1760_v1, %v1753_v17 }
 0xe46   :  { %v1775_v15 = vadd.f32 %v1774_v24, %v1773_v34 }
 0xe47   :  { %12233 = vtanh.f32 %v1795_v8  ;;  %1763 = vst.msk [vmem:[#allocation5 + $0x8] sm:$0xff] %vm49_vm0, %v12970_v9 }
 0xe48   :  { %v13000_v16 = vrot.slane %v1775_v15, %v12614_v21 }
 0xe4a   :  { %v1789_v22 = vadd.f32 %v13000_v16, %v12634_v35 }
 0xe54   :  { %v12974_v25 = vpop.eup %12233 }
 0xe55   :  { %11093 = vmatmul.mubr.msk.f32.vlgmr.msra.gmra.mxu1 %vm49_vm0, %v12974_v25 }
 0xe56   :  { %11107 = vmatpush3.msra.mxu1 %v12639_v37  ;;  %11114 = vmatprep.mubr.msk.f32.mxu1 %vm12478_vm1, %v12477_v3 }
 0xe57   :  { %11108 = vmatprep.subr.mxu1 %v12477_v3 }
 0xe58   :  { %11109 = vmatpush3.msra.mxu1 %v12648_v40 }
 0xe59   :  { %11110 = vmatprep.subr.mxu1 %v12477_v3 }
 0xe5a   :  { %11111 = vmatpush3.msra.mxu1 %v12620_v26 }
 0xe5b   :  { %11112 = vmatprep.subr.mxu1 %v12477_v3 }
 0xe5c   :  { %11113 = vmatpush3.msra.mxu1 %v12627_v31 }
 0xe5d   :  { %11128 = vmatprep.subr.mxu1 %v12477_v3 }
 0xf15   :  { %v1866_v18 = vpop.f32.mrf.mxu1 }
 0xf16   :  { %v1870_v19 = vmul.f32 %v1866_v18, %v12993_v7 }
 0xf17   :  { %v11094_v20 = vpop.f32.mrf.mxu1 }
 0xf18   :  { %v1871_v23 = vadd.f32 %v1870_v19, %v12965_v6 }
 0xf1a   :  { %v1872_v27 = vadd.f32 %v1871_v23, %v1789_v22 }
 0xf1c   :  { %12235 = vtanh.f32 %v1872_v27 }
 0xf29   :  { %v12236_v29 = vpop.eup %12235 }
 0xf2a   :  { %11104 = vmatmul.mubr.msk.f32.vlgmr.msra.gmra.mxu0 %vm49_vm0, %v12236_v29 }
 0xf2b   :  { %11118 = vmatpush3.msra.mxu0 %v12639_v37  ;;  %11125 = vmatprep.mubr.msk.f32.mxu0 %vm12478_vm1, %v12477_v3 }
 0xf2c   :  { %11119 = vmatprep.subr.mxu0 %v12477_v3 }
 0xf2d   :  { %11120 = vmatpush3.msra.mxu0 %v12648_v40 }
 0xf2e   :  { %11121 = vmatprep.subr.mxu0 %v12477_v3 }
 0xf2f   :  { %11122 = vmatpush3.msra.mxu0 %v12620_v26 }
 0xf30   :  { %11123 = vmatprep.subr.mxu0 %v12477_v3 }
 0xf31   :  { %11124 = vmatpush3.msra.mxu0 %v12627_v31 }
 0xf32   :  { %11139 = vmatprep.subr.mxu0 %v12477_v3 }
 0xfea   :  { %v1943_v39 = vpop.f32.mrf.mxu0 }
 0xfeb   :  { %v1947_v2 = vmul.f32 %v1943_v39, %v12993_v7 }
 0xfec   :  { %v11105_v28 = vpop.f32.mrf.mxu0 }
 0xfed   :  { %v1948_v30 = vadd.f32 %v1947_v2, %v12965_v6 }
 0xfef   :  { %v1949_v33 = vadd.f32 %v1948_v30, %v1789_v22 }
 0xff1   :  { %12237 = vtanh.f32 %v1949_v33 }
 0xffe   :  { %v12238_v41 = vpop.eup %12237 }
 0xfff   :  { %11115 = vmatmul.mubr.msk.f32.vlgmr.msra.gmra.mxu1 %vm49_vm0, %v12238_v41  ;;  %v2028_v52 = vadd.f32 %v12238_v41, %v12236_v29  ;;  %v2119_v29 = vadd.f32 %v2117_v60, %v13041_v43 }
0x1000   :  { %11129 = vmatpush3.msra.mxu1 %v12639_v37  ;;  %11136 = vmatprep.mubr.msk.f32.mxu1 %vm12478_vm1, %v12477_v3 }
0x1001   :  { %11130 = vmatprep.subr.mxu1 %v12477_v3  ;;  %v2029_v14 = vmul.f32 2.0, %v2028_v52 }
0x1002   :  { %11131 = vmatpush3.msra.mxu1 %v12648_v40 }
0x1003   :  { %11132 = vmatprep.subr.mxu1 %v12477_v3  ;;  %v2030_v53 = vadd.f32 %v12974_v25, %v2029_v14 }
0x1004   :  { %11133 = vmatpush3.msra.mxu1 %v12620_v26 }
0x1005   :  { %11134 = vmatprep.subr.mxu1 %v12477_v3 }
0x1006   :  { %11135 = vmatpush3.msra.mxu1 %v12627_v31 }
0x1007   :  { %11150 = vmatprep.subr.mxu1 %v12477_v3 }
0x10bf   :  { %v2020_v47 = vpop.f32.mrf.mxu1 }
0x10c0   :  { %v2024_v48 = vmul.f32 %v2020_v47, %v13031_v44 }
0x10c1   :  { %v11116_v38 = vpop.f32.mrf.mxu1 }
0x10c2   :  { %v2025_v50 = vadd.f32 %v2024_v48, %v12965_v6  ;;  %v2438_v38 = vrot.slane %v2434_v46, %v12614_v21 }
0x10c4   :  { %v2026_v51 = vadd.f32 %v2025_v50, %v1794_v13  ;;  %v2439_v52 = vadd.f32 %v2438_v38, %v12634_v35 }
0x10c6   :  { %12239 = vtanh.f32 %v2026_v51  ;;  %v2440_v10 = vadd.f32 %v2439_v52, %v13000_v16 }
0x10d3   :  { %v12240_v12 = vpop.eup %12239 }
0x10d4   :  { %v13048_v54 = vadd.f32 %v12240_v12, %v2030_v53 }
0x10d6   :  { %11126 = vmatmul.mubr.msk.f32.vlgmr.msra.gmra.mxu0 %vm49_vm0, %v13048_v54 }
0x10d7   :  { %11140 = vmatpush3.msra.mxu0 %v12639_v37  ;;  %11147 = vmatprep.mubr.msk.f32.mxu0 %vm12478_vm1, %v12477_v3 }
0x10d8   :  { %11141 = vmatprep.subr.mxu0 %v12477_v3 }
0x10d9   :  { %11142 = vmatpush3.msra.mxu0 %v12648_v40 }
0x10da   :  { %11143 = vmatprep.subr.mxu0 %v12477_v3 }
0x10db   :  { %11144 = vmatpush3.msra.mxu0 %v12620_v26 }
0x10dc   :  { %11145 = vmatprep.subr.mxu0 %v12477_v3 }
0x10dd   :  { %11146 = vmatpush3.msra.mxu0 %v12627_v31 }
0x10de   :  { %11161 = vmatprep.subr.mxu0 %v12477_v3 }
0x1196   :  { %v2101_v11 = vpop.f32.mrf.mxu0 }
0x1197   :  { %v2106_v56 = vmul.f32 %v13063_v55, %v2101_v11 }
0x1198   :  { %v11127_v0 = vpop.f32.mrf.mxu0 }
0x1199   :  { %v2107_v57 = vadd.f32 %v2106_v56, %v12965_v6  ;;  %v2118_v6 = vadd.f32 %v2117_v60, %v13000_v16 }
0x119b   :  { %v13073_v59 = vadd.f32 %v13070_v58, %v2107_v57 }
0x119d   :  { %v2120_v61 = vadd.f32 %v2117_v60, %v13073_v59 }
0x119f   :  { %12241 = vtanh.f32 %v2120_v61 }
0x11ac   :  { %v12242_v62 = vpop.eup %12241 }
0x11ad   :  { %11137 = vmatmul.mubr.msk.f32.vlgmr.msra.gmra.mxu1 %vm49_vm0, %v12242_v62 }
0x11ae   :  { %11151 = vmatpush3.msra.mxu1 %v12639_v37  ;;  %11158 = vmatprep.mubr.msk.f32.mxu1 %vm12478_vm1, %v12477_v3 }
0x11af   :  { %11152 = vmatprep.subr.mxu1 %v12477_v3 }
0x11b0   :  { %11153 = vmatpush3.msra.mxu1 %v12648_v40 }
0x11b1   :  { %11154 = vmatprep.subr.mxu1 %v12477_v3 }
0x11b2   :  { %11155 = vmatpush3.msra.mxu1 %v12620_v26 }
0x11b3   :  { %11156 = vmatprep.subr.mxu1 %v12477_v3 }
0x11b4   :  { %11157 = vmatpush3.msra.mxu1 %v12627_v31 }
0x11b5   :  { %11172 = vmatprep.subr.mxu1 %v12477_v3 }
0x126d   :  { %v2191_v63 = vpop.f32.mrf.mxu1 }
0x126e   :  { %v2195_v1 = vmul.f32 %v2191_v63, %v12993_v7 }
0x126f   :  { %v11138_v4 = vpop.f32.mrf.mxu1 }
0x1270   :  { %v2196_v17 = vadd.f32 %v2195_v1, %v13073_v59 }
0x1272   :  { %v2197_v8 = vadd.f32 %v2196_v17, %v2118_v6 }
0x1274   :  { %12243 = vtanh.f32 %v2197_v8 }
0x1281   :  { %v12244_v25 = vpop.eup %12243 }
0x1282   :  { %11148 = vmatmul.mubr.msk.f32.vlgmr.msra.gmra.mxu0 %vm49_vm0, %v12244_v25 }
0x1283   :  { %11162 = vmatpush3.msra.mxu0 %v12639_v37  ;;  %11169 = vmatprep.mubr.msk.f32.mxu0 %vm12478_vm1, %v12477_v3 }
0x1284   :  { %11163 = vmatprep.subr.mxu0 %v12477_v3 }
0x1285   :  { %11164 = vmatpush3.msra.mxu0 %v12648_v40 }
0x1286   :  { %11165 = vmatprep.subr.mxu0 %v12477_v3 }
0x1287   :  { %11166 = vmatpush3.msra.mxu0 %v12620_v26 }
0x1288   :  { %11167 = vmatprep.subr.mxu0 %v12477_v3 }
0x1289   :  { %11168 = vmatpush3.msra.mxu0 %v12627_v31 }
0x128a   :  { %11183 = vmatprep.subr.mxu0 %v12477_v3 }
0x1342   :  { %v2268_v34 = vpop.f32.mrf.mxu0 }
0x1343   :  { %v2272_v24 = vmul.f32 %v2268_v34, %v12993_v7 }
0x1344   :  { %v11149_v15 = vpop.f32.mrf.mxu0 }
0x1345   :  { %v2273_v18 = vadd.f32 %v2272_v24, %v13073_v59 }
0x1347   :  { %v2274_v19 = vadd.f32 %v2273_v18, %v2118_v6 }
0x1349   :  { %12245 = vtanh.f32 %v2274_v19 }
0x1356   :  { %v12246_v20 = vpop.eup %12245 }
0x1357   :  { %11159 = vmatmul.mubr.msk.f32.vlgmr.msra.gmra.mxu1 %vm49_vm0, %v12246_v20  ;;  %v2353_v28 = vadd.f32 %v12246_v20, %v12244_v25  ;;  %v2441_v25 = vadd.f32 %v2439_v52, %v13041_v43 }
0x1358   :  { %11173 = vmatpush3.msra.mxu1 %v12639_v37  ;;  %11180 = vmatprep.mubr.msk.f32.mxu1 %vm12478_vm1, %v12477_v3 }
0x1359   :  { %11174 = vmatprep.subr.mxu1 %v12477_v3  ;;  %v2354_v30 = vmul.f32 2.0, %v2353_v28 }
0x135a   :  { %11175 = vmatpush3.msra.mxu1 %v12648_v40 }
0x135b   :  { %11176 = vmatprep.subr.mxu1 %v12477_v3  ;;  %v2355_v33 = vadd.f32 %v12242_v62, %v2354_v30 }
0x135c   :  { %11177 = vmatpush3.msra.mxu1 %v12620_v26 }
0x135d   :  { %11178 = vmatprep.subr.mxu1 %v12477_v3 }
0x135e   :  { %11179 = vmatpush3.msra.mxu1 %v12627_v31 }
0x135f   :  { %11194 = vmatprep.subr.mxu1 %v12477_v3 }
0x1417   :  { %v2345_v22 = vpop.f32.mrf.mxu1 }
0x1418   :  { %v2349_v23 = vmul.f32 %v2345_v22, %v13031_v44 }
0x1419   :  { %v11160_v27 = vpop.f32.mrf.mxu1 }
0x141a   :  { %v2350_v39 = vadd.f32 %v2349_v23, %v13073_v59 }
0x141c   :  { %v2351_v2 = vadd.f32 %v2350_v39, %v2119_v29 }
0x141e   :  { %12247 = vtanh.f32 %v2351_v2 }
0x142b   :  { %v12248_v41 = vpop.eup %12247 }
0x142c   :  { %v13118_v49 = vadd.f32 %v12248_v41, %v2355_v33 }
0x142e   :  { %11170 = vmatmul.mubr.msk.f32.vlgmr.msra.gmra.mxu0 %vm49_vm0, %v13118_v49  ;;  %v2433_v22 = vadd.f32 %v13118_v49, %v13048_v54  ;;  %v2756_v54 = vmul.f32 3.0, %v13037_v45 }
0x142f   :  { %11184 = vmatpush3.msra.mxu0 %v12639_v37  ;;  %11191 = vmatprep.mubr.msk.f32.mxu0 %vm12478_vm1, %v12477_v3 }
0x1430   :  { %11185 = vmatprep.subr.mxu0 %v12477_v3  ;;  %v2760_v2 = vrot.slane %v2756_v54, %v12614_v21 }
0x1431   :  { %11186 = vmatpush3.msra.mxu0 %v12648_v40 }
0x1432   :  { %11187 = vmatprep.subr.mxu0 %v12477_v3  ;;  %v2761_v41 = vadd.f32 %v2760_v2, %v12634_v35 }
0x1433   :  { %11188 = vmatpush3.msra.mxu0 %v12620_v26 }
0x1434   :  { %11189 = vmatprep.subr.mxu0 %v12477_v3 }
0x1435   :  { %11190 = vmatpush3.msra.mxu0 %v12627_v31 }
0x1436   :  { %11205 = vmatprep.subr.mxu0 %v12477_v3 }
0x14ee   :  { %v2426_v47 = vpop.f32.mrf.mxu0 }
0x14ef   :  { %v2430_v48 = vmul.f32 %v2426_v47, %v13063_v55 }
0x14f0   :  { %v11171_v13 = vpop.f32.mrf.mxu0 }
0x14f1   :  { %v2431_v50 = vadd.f32 %v2430_v48, %v13073_v59  ;;  %v2762_v48 = vadd.f32 %v2761_v41, %v13000_v16 }
0x14f3   :  { %v13137_v51 = vadd.f32 %v2431_v50, %v13070_v58 }
0x14f5   :  { %v2442_v14 = vadd.f32 %v2439_v52, %v13137_v51 }
0x14f7   :  { %12249 = vtanh.f32 %v2442_v14 }
0x1504   :  { %v12250_v53 = vpop.eup %12249 }
0x1505   :  { %11181 = vmatmul.mubr.msk.f32.vlgmr.msra.gmra.mxu1 %vm49_vm0, %v12250_v53 }
0x1506   :  { %11195 = vmatpush3.msra.mxu1 %v12639_v37  ;;  %11202 = vmatprep.mubr.msk.f32.mxu1 %vm12478_vm1, %v12477_v3 }
0x1507   :  { %11196 = vmatprep.subr.mxu1 %v12477_v3 }
0x1508   :  { %11197 = vmatpush3.msra.mxu1 %v12648_v40 }
0x1509   :  { %11198 = vmatprep.subr.mxu1 %v12477_v3 }
0x150a   :  { %11199 = vmatpush3.msra.mxu1 %v12620_v26 }
0x150b   :  { %11200 = vmatprep.subr.mxu1 %v12477_v3 }
0x150c   :  { %11201 = vmatpush3.msra.mxu1 %v12627_v31 }
0x150d   :  { %11216 = vmatprep.subr.mxu1 %v12477_v3 }
0x15c5   :  { %v2513_v12 = vpop.f32.mrf.mxu1 }
0x15c6   :  { %v2517_v11 = vmul.f32 %v2513_v12, %v12993_v7 }
0x15c7   :  { %v11182_v56 = vpop.f32.mrf.mxu1 }
0x15c8   :  { %v2518_v0 = vadd.f32 %v2517_v11, %v13137_v51  ;;  %v13237_v11 = vld [vmem:[%s14904_s2 + $0x58] sm:$0xff]  ;;  %v13253_v56 = vld [vmem:[%s14904_s2 + $0x48] sm:$0xff] }
0x15ca   :  { %v2519_v57 = vadd.f32 %v2518_v0, %v2440_v10 }
0x15cc   :  { %12251 = vtanh.f32 %v2519_v57 }
0x15d9   :  { %v12252_v59 = vpop.eup %12251 }
0x15da   :  { %11192 = vmatmul.mubr.msk.f32.vlgmr.msra.gmra.mxu0 %vm49_vm0, %v12252_v59 }
0x15db   :  { %11206 = vmatpush3.msra.mxu0 %v12639_v37  ;;  %11213 = vmatprep.mubr.msk.f32.mxu0 %vm12478_vm1, %v12477_v3 }
0x15dc   :  { %11207 = vmatprep.subr.mxu0 %v12477_v3 }
0x15dd   :  { %11208 = vmatpush3.msra.mxu0 %v12648_v40 }
0x15de   :  { %11209 = vmatprep.subr.mxu0 %v12477_v3 }
0x15df   :  { %11210 = vmatpush3.msra.mxu0 %v12620_v26 }
0x15e0   :  { %11211 = vmatprep.subr.mxu0 %v12477_v3 }
0x15e1   :  { %11212 = vmatpush3.msra.mxu0 %v12627_v31 }
0x15e2   :  { %11227 = vmatprep.subr.mxu0 %v12477_v3 }
0x169a   :  { %v2590_v60 = vpop.f32.mrf.mxu0 }
0x169b   :  { %v2594_v61 = vmul.f32 %v2590_v60, %v12993_v7  ;;  %v2763_v60 = vadd.f32 %v2761_v41, %v13041_v43  ;;  %v13294_v43 = vld [vmem:[%s14905_s3] sm:$0xff] }
0x169c   :  { %v11193_v62 = vpop.f32.mrf.mxu0 }
0x169d   :  { %v2595_v63 = vadd.f32 %v2594_v61, %v13137_v51 }
0x169f   :  { %v2596_v1 = vadd.f32 %v2595_v63, %v2440_v10  ;;  %v13260_v10 = vld [vmem:[%s14904_s2 + $0x40] sm:$0xff] }
0x16a1   :  { %12253 = vtanh.f32 %v2596_v1 }
0x16ae   :  { %v12254_v4 = vpop.eup %12253 }
0x16af   :  { %11203 = vmatmul.mubr.msk.f32.vlgmr.msra.gmra.mxu1 %vm49_vm0, %v12254_v4  ;;  %v2675_v15 = vadd.f32 %v12254_v4, %v12252_v59 }
0x16b0   :  { %11217 = vmatpush3.msra.mxu1 %v12639_v37  ;;  %11224 = vmatprep.mubr.msk.f32.mxu1 %vm12478_vm1, %v12477_v3 }
0x16b1   :  { %11218 = vmatprep.subr.mxu1 %v12477_v3  ;;  %v2676_v18 = vmul.f32 2.0, %v2675_v15 }
0x16b2   :  { %11219 = vmatpush3.msra.mxu1 %v12648_v40 }
0x16b3   :  { %11220 = vmatprep.subr.mxu1 %v12477_v3  ;;  %v2677_v19 = vadd.f32 %v12250_v53, %v2676_v18 }
0x16b4   :  { %11221 = vmatpush3.msra.mxu1 %v12620_v26 }
0x16b5   :  { %11222 = vmatprep.subr.mxu1 %v12477_v3 }
0x16b6   :  { %11223 = vmatpush3.msra.mxu1 %v12627_v31 }
0x16b7   :  { %11238 = vmatprep.subr.mxu1 %v12477_v3 }
0x176f   :  { %v2667_v6 = vpop.f32.mrf.mxu1 }
0x1770   :  { %v2671_v17 = vmul.f32 %v2667_v6, %v13031_v44 }
0x1771   :  { %v11204_v8 = vpop.f32.mrf.mxu1 }
0x1772   :  { %v2672_v34 = vadd.f32 %v2671_v17, %v13137_v51 }
0x1774   :  { %v2673_v24 = vadd.f32 %v2672_v34, %v2441_v25 }
0x1776   :  { %12255 = vtanh.f32 %v2673_v24 }
0x1783   :  { %v12256_v20 = vpop.eup %12255 }
0x1784   :  { %v2678_v23 = vadd.f32 %v12256_v20, %v2677_v19 }
0x1786   :  { %11214 = vmatmul.mubr.msk.f32.vlgmr.msra.gmra.mxu0 %vm49_vm0, %v2678_v23  ;;  %v13185_v27 = vadd.f32 %v2678_v23, %v2433_v22 }
0x1787   :  { %11228 = vmatpush3.msra.mxu0 %v12639_v37  ;;  %11235 = vmatprep.mubr.msk.f32.mxu0 %vm12478_vm1, %v12477_v3 }
0x1788   :  { %11229 = vmatprep.subr.mxu0 %v12477_v3 }
0x1789   :  { %11230 = vmatpush3.msra.mxu0 %v12648_v40 }
0x178a   :  { %11231 = vmatprep.subr.mxu0 %v12477_v3 }
0x178b   :  { %11232 = vmatpush3.msra.mxu0 %v12620_v26 }
0x178c   :  { %11233 = vmatprep.subr.mxu0 %v12477_v3 }
0x178d   :  { %11234 = vmatpush3.msra.mxu0 %v12627_v31 }
0x178e   :  { %11249 = vmatprep.subr.mxu0 %v12477_v3 }
0x1846   :  { %v2748_v29 = vpop.f32.mrf.mxu0 }
0x1847   :  { %v2752_v39 = vmul.f32 %v2748_v29, %v13063_v55 }
0x1848   :  { %v11215_v28 = vpop.f32.mrf.mxu0 }
0x1849   :  { %v2753_v30 = vadd.f32 %v2752_v39, %v13137_v51 }
0x184b   :  { %v13202_v33 = vadd.f32 %v2753_v30, %v13070_v58 }
0x184d   :  { %v2764_v49 = vadd.f32 %v2761_v41, %v13202_v33 }
0x184f   :  { %12257 = vtanh.f32 %v2764_v49 }
0x185c   :  { %v12258_v46 = vpop.eup %12257 }
0x185d   :  { %11225 = vmatmul.mubr.msk.f32.vlgmr.msra.gmra.mxu1 %vm49_vm0, %v12258_v46 }
0x185e   :  { %11239 = vmatpush3.msra.mxu1 %v12639_v37  ;;  %11246 = vmatprep.mubr.msk.f32.mxu1 %vm12478_vm1, %v12477_v3 }
0x185f   :  { %11240 = vmatprep.subr.mxu1 %v12477_v3 }
0x1860   :  { %11241 = vmatpush3.msra.mxu1 %v12648_v40 }
0x1861   :  { %11242 = vmatprep.subr.mxu1 %v12477_v3 }
0x1862   :  { %11243 = vmatpush3.msra.mxu1 %v12620_v26 }
0x1863   :  { %11244 = vmatprep.subr.mxu1 %v12477_v3 }
0x1864   :  { %11245 = vmatpush3.msra.mxu1 %v12627_v31 }
0x1865   :  { %11260 = vmatprep.subr.mxu1 %v12477_v3 }
0x191d   :  { %v2835_v35 = vpop.f32.mrf.mxu1 }
0x191e   :  { %v2839_v45 = vmul.f32 %v2835_v35, %v12993_v7 }
0x191f   :  { %v11226_v47 = vpop.f32.mrf.mxu1 }
0x1920   :  { %v2840_v38 = vadd.f32 %v2839_v45, %v13202_v33 }
0x1922   :  { %v2841_v13 = vadd.f32 %v2840_v38, %v2762_v48 }
0x1924   :  { %12259 = vtanh.f32 %v2841_v13 }
0x1931   :  { %v12260_v50 = vpop.eup %12259 }
0x1932   :  { %11236 = vmatmul.mubr.msk.f32.vlgmr.msra.gmra.mxu0 %vm49_vm0, %v12260_v50 }
0x1933   :  { %11250 = vmatpush3.msra.mxu0 %v12639_v37  ;;  %11257 = vmatprep.mubr.msk.f32.mxu0 %vm12478_vm1, %v12477_v3 }
0x1934   :  { %11251 = vmatprep.subr.mxu0 %v12477_v3 }
0x1935   :  { %11252 = vmatpush3.msra.mxu0 %v12648_v40 }
0x1936   :  { %11253 = vmatprep.subr.mxu0 %v12477_v3 }
0x1937   :  { %11254 = vmatpush3.msra.mxu0 %v12620_v26 }
0x1938   :  { %11255 = vmatprep.subr.mxu0 %v12477_v3 }
0x1939   :  { %11256 = vmatpush3.msra.mxu0 %v12627_v31 }
0x193a   :  { %11271 = vmatprep.subr.mxu0 %v12477_v3 }
0x19f2   :  { %v2912_v16 = vpop.f32.mrf.mxu0 }
0x19f3   :  { %v2916_v51 = vmul.f32 %v2912_v16, %v12993_v7  ;;  %v13246_v7 = vld [vmem:[%s14904_s2 + $0x50] sm:$0xff] }
0x19f4   :  { %v11237_v52 = vpop.f32.mrf.mxu0 }
0x19f5   :  { %v2917_v14 = vadd.f32 %v2916_v51, %v13202_v33  ;;  %v13367_v52 = vstv %s13326_s17 }
0x19f7   :  { %v2918_v53 = vadd.f32 %v2917_v14, %v2762_v48  ;;  %v3175_v14 = vmul.f32 %v13367_v52, %v12658_v42 }
0x19f9   :  { %12261 = vtanh.f32 %v2918_v53  ;;  %v13373_v53 = vmul.f32 %v13294_v43, %v13367_v52 }
0x1a06   :  { %v12262_v12 = vpop.eup %12261 }
0x1a07   :  { %11247 = vmatmul.mubr.msk.f32.vlgmr.msra.gmra.mxu1 %vm49_vm0, %v12262_v12  ;;  %v2997_v63 = vadd.f32 %v12262_v12, %v12260_v50  ;;  %v3176_v12 = vadd.f32 %v3175_v14, %v13373_v53 }
0x1a08   :  { %11261 = vmatpush3.msra.mxu1 %v13237_v11  ;;  %11268 = vmatprep.mubr.msk.f32.mxu1 %vm12478_vm1, %v12477_v3 }
0x1a09   :  { %11262 = vmatprep.subr.mxu1 %v12477_v3  ;;  %v2998_v1 = vmul.f32 2.0, %v2997_v63 }
0x1a0a   :  { %11263 = vmatpush3.msra.mxu1 %v13246_v7 }
0x1a0b   :  { %11264 = vmatprep.subr.mxu1 %v12477_v3  ;;  %v2999_v4 = vadd.f32 %v12258_v46, %v2998_v1 }
0x1a0c   :  { %11265 = vmatpush3.msra.mxu1 %v13253_v56 }
0x1a0d   :  { %11266 = vmatprep.subr.mxu1 %v12477_v3 }
0x1a0e   :  { %11267 = vmatpush3.msra.mxu1 %v13260_v10 }
0x1a0f   :  { %11282 = vmatprep.subr.mxu1 %v12477_v3 }
0x1ac7   :  { %v2989_v0 = vpop.f32.mrf.mxu1 }
0x1ac8   :  { %v2993_v57 = vmul.f32 %v2989_v0, %v13031_v44  ;;  %v3154_v44 = vstv %s3153_s12  ;;  %v13377_v0 = vrot.slane %v3176_v12, %v12614_v21  ;;  %s5963_s12 = ssub.f32 %s10182_s11, %s13945_s8  ;;  %s12479_s11 = smov [#allocation5]  }
0x1ac9   :  { %v11248_v59 = vpop.f32.mrf.mxu1  ;;  %v3155_v25 = vmul.f32 %v13294_v43, %v3154_v44  ;;  %v13399_v44 = vstv %s3168_s19 }
0x1aca   :  { %v2994_v61 = vadd.f32 %v2993_v57, %v13202_v33  ;;  %s13989_s13 = smul.f32 0.25, %s5963_s12  ;;  %s10087_s12 = sshll.u32 %s12479_s11, 4  ;;  %s10088_s12 = int_to_ptr.vmem [resolvable:$true] %s10087_s12 }
0x1acb   :  { %v3159_v22 = vrot.slane %v3155_v25, %v12957_v5  ;;  %p12457_p6 = scmp.lt.s32.totalorder %s10088_s12, %s10088_s12 }
0x1acc   :  { %v2995_v62 = vadd.f32 %v2994_v61, %v2763_v60  ;;  %v3193_v61 = vadd.f32 %v13377_v0, %v12637_v36  ;;  %s5965_s14 = smul.f32 0.5, %s13989_s13 }
0x1acd   :  { %s5966_s15 = smul.f32 0.16666667, %s13989_s13 }
0x1ace   :  { %12263 = vtanh.f32 %v2995_v62  ;;  %s7350_s17 = smul.f32 4.0, %s13989_s13 }
0x1adb   :  { %v12264_v6 = vpop.eup %12263 }
0x1adc   :  { %v3000_v17 = vadd.f32 %v12264_v6, %v2999_v4 }
0x1ade   :  { %11258 = vmatmul.mubr.msk.f32.vlgmr.msra.gmra.mxu0 %vm49_vm0, %v3000_v17  ;;  %v3077_v8 = vadd.f32 %v3000_v17, %v13185_v27 }
0x1adf   :  { %11272 = vmatpush3.msra.mxu0 %v12639_v37  ;;  %11279 = vmatprep.mubr.msk.f32.mxu0 %vm12478_vm1, %v12477_v3 }
0x1ae0   :  { %11273 = vmatprep.subr.mxu0 %v12477_v3  ;;  %11269 = vmatmul.mubr.msk.f32.vlgmr.msra.gmra.mxu1 %vm49_vm0, %v3077_v8 }
0x1ae1   :  { %11274 = vmatpush3.msra.mxu0 %v12648_v40  ;;  %11283 = vmatpush3.msra.mxu1 %v12639_v37 }
0x1ae2   :  { %11275 = vmatprep.subr.mxu0 %v12477_v3  ;;  %11284 = vmatprep.subr.mxu1 %v12477_v3 }
0x1ae3   :  { %11276 = vmatpush3.msra.mxu0 %v12620_v26  ;;  %11285 = vmatpush3.msra.mxu1 %v12648_v40 }
0x1ae4   :  { %11277 = vmatprep.subr.mxu0 %v12477_v3  ;;  %11286 = vmatprep.subr.mxu1 %v12477_v3 }
0x1ae5   :  { %11278 = vmatpush3.msra.mxu0 %v12627_v31  ;;  %11287 = vmatpush3.msra.mxu1 %v12620_v26 }
0x1ae6   :  { %11288 = vmatprep.subr.mxu1 %v12477_v3  ;;  %11293 = vmatprep.subr.mxu0 %v12477_v3 }
0x1ae7   :  { %11289 = vmatpush3.msra.mxu1 %v12627_v31  ;;  %11290 = vmatprep.mubr.msk.f32.mxu1 %vm12478_vm1, %v12477_v3 }
0x1ae8   :  { %11304 = vmatprep.subr.mxu1 %v12477_v3 }
0x1b9e   :  { %v3070_v34 = vpop.f32.mrf.mxu0 }
0x1b9f   :  { %v3074_v24 = vmul.f32 %v3070_v34, %v13063_v55 }
0x1ba0   :  { %v11259_v15 = vpop.f32.mrf.mxu0  ;;  %v3147_v18 = vpop.f32.mrf.mxu1 }
0x1ba1   :  { %v3075_v19 = vadd.f32 %v3074_v24, %v13202_v33  ;;  %v3151_v20 = vmul.f32 %v3147_v18, %v13063_v55  ;;  %v3515_v24 = vrot.slane %v13373_v53, %v12614_v21 }
0x1ba2   :  { %v11270_v23 = vpop.f32.mrf.mxu1 }
0x1ba3   :  { %v13302_v27 = vadd.f32 %v3075_v19, %v13070_v58  ;;  %v3152_v54 = vadd.f32 %v3151_v20, %v12970_v9  ;;  %v13329_v9 = vstv %s3167_s18  ;;  %v13406_v19 = vrot.slane %v3175_v14, %v12614_v21  ;;  %s10201_s18 = sld [smem:[#allocation2 + $0x6]] }
0x1ba4   :  { %v3172_v55 = vmul.f32 %v13294_v43, %v13329_v9  ;;  %v3173_v58 = vmul.f32 %v13329_v9, %v12658_v42 }
0x1ba5   :  { %v3194_v29 = vadd.f32 %v12637_v36, %v13302_v27  ;;  %v13307_v39 = vadd.f32 %v3159_v22, %v3152_v54  ;;  %v3516_v22 = vadd.f32 %v3515_v24, %v12637_v36 }
0x1ba6   :  { %v3174_v28 = vadd.f32 %v3173_v58, %v3172_v55 }
0x1ba7   :  { %12265 = vtanh.f32 %v3194_v29  ;;  %3162 = vst.msk [vmem:[#allocation5 + $0x10] sm:$0xff] %vm49_vm0, %v13307_v39 }
0x1ba8   :  { %v13336_v30 = vrot.slane %v3174_v28, %v12614_v21 }
0x1ba9   :  { %s7362_s19 = ssub.f32 %s10201_s18, %s14269_s16 }
0x1baa   :  { %v3188_v46 = vadd.f32 %v13336_v30, %v12637_v36  ;;  %v3517_v55 = vadd.f32 %v3516_v22, %v13336_v30 }
0x1bb4   :  { %v13311_v2 = vpop.eup %12265 }
0x1bb5   :  { %11280 = vmatmul.mubr.msk.f32.vlgmr.msra.gmra.mxu0 %vm49_vm0, %v13311_v2 }
0x1bb6   :  { %11294 = vmatpush3.msra.mxu0 %v12639_v37  ;;  %11301 = vmatprep.mubr.msk.f32.mxu0 %vm12478_vm1, %v12477_v3 }
0x1bb7   :  { %11295 = vmatprep.subr.mxu0 %v12477_v3 }
0x1bb8   :  { %11296 = vmatpush3.msra.mxu0 %v12648_v40 }
0x1bb9   :  { %11297 = vmatprep.subr.mxu0 %v12477_v3 }
0x1bba   :  { %11298 = vmatpush3.msra.mxu0 %v12620_v26 }
0x1bbb   :  { %11299 = vmatprep.subr.mxu0 %v12477_v3 }
0x1bbc   :  { %11300 = vmatpush3.msra.mxu0 %v12627_v31 }
0x1bbd   :  { %11315 = vmatprep.subr.mxu0 %v12477_v3 }
0x1c75   :  { %v3265_v33 = vpop.f32.mrf.mxu0 }
0x1c76   :  { %v3269_v41 = vmul.f32 %v3265_v33, %v13329_v9 }
0x1c77   :  { %v11281_v49 = vpop.f32.mrf.mxu0 }
0x1c78   :  { %v3270_v35 = vadd.f32 %v3269_v41, %v13302_v27 }
0x1c7a   :  { %v3271_v45 = vadd.f32 %v3270_v35, %v3188_v46 }
0x1c7c   :  { %12267 = vtanh.f32 %v3271_v45 }
0x1c89   :  { %v12268_v47 = vpop.eup %12267 }
0x1c8a   :  { %11291 = vmatmul.mubr.msk.f32.vlgmr.msra.gmra.mxu1 %vm49_vm0, %v12268_v47 }
0x1c8b   :  { %11305 = vmatpush3.msra.mxu1 %v12639_v37  ;;  %11312 = vmatprep.mubr.msk.f32.mxu1 %vm12478_vm1, %v12477_v3 }
0x1c8c   :  { %11306 = vmatprep.subr.mxu1 %v12477_v3 }
0x1c8d   :  { %11307 = vmatpush3.msra.mxu1 %v12648_v40 }
0x1c8e   :  { %11308 = vmatprep.subr.mxu1 %v12477_v3 }
0x1c8f   :  { %11309 = vmatpush3.msra.mxu1 %v12620_v26 }
0x1c90   :  { %11310 = vmatprep.subr.mxu1 %v12477_v3 }
0x1c91   :  { %11311 = vmatpush3.msra.mxu1 %v12627_v31 }
0x1c92   :  { %11326 = vmatprep.subr.mxu1 %v12477_v3 }
0x1d4a   :  { %v3342_v48 = vpop.f32.mrf.mxu1 }
0x1d4b   :  { %v3346_v38 = vmul.f32 %v3342_v48, %v13329_v9 }
0x1d4c   :  { %v11292_v13 = vpop.f32.mrf.mxu1 }
0x1d4d   :  { %v3347_v50 = vadd.f32 %v3346_v38, %v13302_v27 }
0x1d4f   :  { %v3348_v16 = vadd.f32 %v3347_v50, %v3188_v46  ;;  %v3518_v50 = vadd.f32 %v3516_v22, %v13377_v0 }
0x1d51   :  { %12269 = vtanh.f32 %v3348_v16 }
0x1d5e   :  { %v12270_v51 = vpop.eup %12269 }
0x1d5f   :  { %11302 = vmatmul.mubr.msk.f32.vlgmr.msra.gmra.mxu0 %vm49_vm0, %v12270_v51  ;;  %v3427_v1 = vadd.f32 %v12270_v51, %v12268_v47 }
0x1d60   :  { %11316 = vmatpush3.msra.mxu0 %v12639_v37  ;;  %11323 = vmatprep.mubr.msk.f32.mxu0 %vm12478_vm1, %v12477_v3 }
0x1d61   :  { %11317 = vmatprep.subr.mxu0 %v12477_v3  ;;  %v3428_v4 = vmul.f32 2.0, %v3427_v1 }
0x1d62   :  { %11318 = vmatpush3.msra.mxu0 %v12648_v40 }
0x1d63   :  { %11319 = vmatprep.subr.mxu0 %v12477_v3  ;;  %v3429_v6 = vadd.f32 %v13311_v2, %v3428_v4 }
0x1d64   :  { %11320 = vmatpush3.msra.mxu0 %v12620_v26 }
0x1d65   :  { %11321 = vmatprep.subr.mxu0 %v12477_v3 }
0x1d66   :  { %11322 = vmatpush3.msra.mxu0 %v12627_v31 }
0x1d67   :  { %11337 = vmatprep.subr.mxu0 %v12477_v3 }
0x1e1f   :  { %v3419_v57 = vpop.f32.mrf.mxu0 }
0x1e20   :  { %v3423_v59 = vmul.f32 %v3419_v57, %v13367_v52 }
0x1e21   :  { %v11303_v60 = vpop.f32.mrf.mxu0 }
0x1e22   :  { %v3424_v62 = vadd.f32 %v3423_v59, %v13302_v27 }
0x1e24   :  { %v3425_v63 = vadd.f32 %v3424_v62, %v3193_v61  ;;  %v3833_v61 = vmul.f32 2.0, %v13373_v53 }
0x1e26   :  { %12271 = vtanh.f32 %v3425_v63  ;;  %v3837_v1 = vrot.slane %v3833_v61, %v12614_v21 }
0x1e33   :  { %v12272_v17 = vpop.eup %12271 }
0x1e34   :  { %v13384_v8 = vadd.f32 %v12272_v17, %v3429_v6 }
0x1e36   :  { %11313 = vmatmul.mubr.msk.f32.vlgmr.msra.gmra.mxu1 %vm49_vm0, %v13384_v8 }
0x1e37   :  { %11327 = vmatpush3.msra.mxu1 %v12639_v37  ;;  %11334 = vmatprep.mubr.msk.f32.mxu1 %vm12478_vm1, %v12477_v3 }
0x1e38   :  { %11328 = vmatprep.subr.mxu1 %v12477_v3 }
0x1e39   :  { %11329 = vmatpush3.msra.mxu1 %v12648_v40 }
0x1e3a   :  { %11330 = vmatprep.subr.mxu1 %v12477_v3 }
0x1e3b   :  { %11331 = vmatpush3.msra.mxu1 %v12620_v26 }
0x1e3c   :  { %11332 = vmatprep.subr.mxu1 %v12477_v3 }
0x1e3d   :  { %11333 = vmatpush3.msra.mxu1 %v12627_v31 }
0x1e3e   :  { %11348 = vmatprep.subr.mxu1 %v12477_v3 }
0x1ef6   :  { %v3500_v25 = vpop.f32.mrf.mxu1 }
0x1ef7   :  { %v3505_v34 = vmul.f32 %v13399_v44, %v3500_v25  ;;  %v3838_v25 = vadd.f32 %v3837_v1, %v12637_v36 }
0x1ef8   :  { %v11314_v15 = vpop.f32.mrf.mxu1 }
0x1ef9   :  { %v3506_v18 = vadd.f32 %v3505_v34, %v13302_v27 }
0x1efb   :  { %v13409_v20 = vadd.f32 %v13406_v19, %v3506_v18 }
0x1efd   :  { %v3519_v23 = vadd.f32 %v3516_v22, %v13409_v20  ;;  %v3839_v22 = vadd.f32 %v3838_v25, %v13336_v30 }
0x1eff   :  { %12273 = vtanh.f32 %v3519_v23 }
0x1f0c   :  { %v12274_v54 = vpop.eup %12273 }
0x1f0d   :  { %11324 = vmatmul.mubr.msk.f32.vlgmr.msra.gmra.mxu0 %vm49_vm0, %v12274_v54 }
0x1f0e   :  { %11338 = vmatpush3.msra.mxu0 %v12639_v37  ;;  %11345 = vmatprep.mubr.msk.f32.mxu0 %vm12478_vm1, %v12477_v3 }
0x1f0f   :  { %11339 = vmatprep.subr.mxu0 %v12477_v3 }
0x1f10   :  { %11340 = vmatpush3.msra.mxu0 %v12648_v40 }
0x1f11   :  { %11341 = vmatprep.subr.mxu0 %v12477_v3 }
0x1f12   :  { %11342 = vmatpush3.msra.mxu0 %v12620_v26 }
0x1f13   :  { %11343 = vmatprep.subr.mxu0 %v12477_v3 }
0x1f14   :  { %11344 = vmatpush3.msra.mxu0 %v12627_v31 }
0x1f15   :  { %11359 = vmatprep.subr.mxu0 %v12477_v3 }
0x1fcd   :  { %v3590_v27 = vpop.f32.mrf.mxu0 }
0x1fce   :  { %v3594_v29 = vmul.f32 %v3590_v27, %v13329_v9 }
0x1fcf   :  { %v11325_v2 = vpop.f32.mrf.mxu0 }
0x1fd0   :  { %v3595_v58 = vadd.f32 %v3594_v29, %v13409_v20 }
0x1fd2   :  { %v3596_v28 = vadd.f32 %v3595_v58, %v3517_v55 }
0x1fd4   :  { %12275 = vtanh.f32 %v3596_v28 }
0x1fe1   :  { %v12276_v33 = vpop.eup %12275 }
0x1fe2   :  { %11335 = vmatmul.mubr.msk.f32.vlgmr.msra.gmra.mxu1 %vm49_vm0, %v12276_v33 }
0x1fe3   :  { %11349 = vmatpush3.msra.mxu1 %v12639_v37  ;;  %11356 = vmatprep.mubr.msk.f32.mxu1 %vm12478_vm1, %v12477_v3 }
0x1fe4   :  { %11350 = vmatprep.subr.mxu1 %v12477_v3 }
0x1fe5   :  { %11351 = vmatpush3.msra.mxu1 %v12648_v40 }
0x1fe6   :  { %11352 = vmatprep.subr.mxu1 %v12477_v3 }
0x1fe7   :  { %11353 = vmatpush3.msra.mxu1 %v12620_v26 }
0x1fe8   :  { %11354 = vmatprep.subr.mxu1 %v12477_v3 }
0x1fe9   :  { %11355 = vmatpush3.msra.mxu1 %v12627_v31 }
0x1fea   :  { %11370 = vmatprep.subr.mxu1 %v12477_v3 }
0x20a2   :  { %v3667_v41 = vpop.f32.mrf.mxu1 }
0x20a3   :  { %v3671_v49 = vmul.f32 %v3667_v41, %v13329_v9 }
0x20a4   :  { %v11336_v46 = vpop.f32.mrf.mxu1 }
0x20a5   :  { %v3672_v35 = vadd.f32 %v3671_v49, %v13409_v20 }
0x20a7   :  { %v3673_v45 = vadd.f32 %v3672_v35, %v3517_v55  ;;  %v3840_v35 = vadd.f32 %v3838_v25, %v13377_v0 }
0x20a9   :  { %12277 = vtanh.f32 %v3673_v45 }
0x20b6   :  { %v12278_v47 = vpop.eup %12277 }
0x20b7   :  { %11346 = vmatmul.mubr.msk.f32.vlgmr.msra.gmra.mxu0 %vm49_vm0, %v12278_v47  ;;  %v3752_v14 = vadd.f32 %v12278_v47, %v12276_v33 }
0x20b8   :  { %11360 = vmatpush3.msra.mxu0 %v12639_v37  ;;  %11367 = vmatprep.mubr.msk.f32.mxu0 %vm12478_vm1, %v12477_v3 }
0x20b9   :  { %11361 = vmatprep.subr.mxu0 %v12477_v3  ;;  %v3753_v12 = vmul.f32 2.0, %v3752_v14 }
0x20ba   :  { %11362 = vmatpush3.msra.mxu0 %v12648_v40 }
0x20bb   :  { %11363 = vmatprep.subr.mxu0 %v12477_v3  ;;  %v3754_v57 = vadd.f32 %v12274_v54, %v3753_v12 }
0x20bc   :  { %11364 = vmatpush3.msra.mxu0 %v12620_v26 }
0x20bd   :  { %11365 = vmatprep.subr.mxu0 %v12477_v3 }
0x20be   :  { %11366 = vmatpush3.msra.mxu0 %v12627_v31 }
0x20bf   :  { %11381 = vmatprep.subr.mxu0 %v12477_v3 }
0x2177   :  { %v3744_v48 = vpop.f32.mrf.mxu0 }
0x2178   :  { %v3748_v38 = vmul.f32 %v3744_v48, %v13367_v52 }
0x2179   :  { %v11347_v13 = vpop.f32.mrf.mxu0 }
0x217a   :  { %v3749_v16 = vadd.f32 %v3748_v38, %v13409_v20 }
0x217c   :  { %v3750_v51 = vadd.f32 %v3749_v16, %v3518_v50 }
0x217e   :  { %12279 = vtanh.f32 %v3750_v51 }
0x218b   :  { %v12280_v59 = vpop.eup %12279 }
0x218c   :  { %v13454_v60 = vadd.f32 %v12280_v59, %v3754_v57 }
0x218e   :  { %11357 = vmatmul.mubr.msk.f32.vlgmr.msra.gmra.mxu1 %vm49_vm0, %v13454_v60  ;;  %v3832_v16 = vadd.f32 %v13454_v60, %v13384_v8  ;;  %v4155_v8 = vmul.f32 3.0, %v13373_v53 }
0x218f   :  { %11371 = vmatpush3.msra.mxu1 %v12639_v37  ;;  %11378 = vmatprep.mubr.msk.f32.mxu1 %vm12478_vm1, %v12477_v3 }
0x2190   :  { %11372 = vmatprep.subr.mxu1 %v12477_v3  ;;  %v4159_v59 = vrot.slane %v4155_v8, %v12614_v21 }
0x2191   :  { %11373 = vmatpush3.msra.mxu1 %v12648_v40 }
0x2192   :  { %11374 = vmatprep.subr.mxu1 %v12477_v3 }
0x2193   :  { %11375 = vmatpush3.msra.mxu1 %v12620_v26 }
0x2194   :  { %11376 = vmatprep.subr.mxu1 %v12477_v3 }
0x2195   :  { %11377 = vmatpush3.msra.mxu1 %v12627_v31 }
0x2196   :  { %11392 = vmatprep.subr.mxu1 %v12477_v3 }
0x224e   :  { %v3825_v62 = vpop.f32.mrf.mxu1 }
0x224f   :  { %v3829_v63 = vmul.f32 %v3825_v62, %v13399_v44 }
0x2250   :  { %v11358_v4 = vpop.f32.mrf.mxu1 }
0x2251   :  { %v3830_v6 = vadd.f32 %v3829_v63, %v13409_v20  ;;  %v4160_v63 = vadd.f32 %v4159_v59, %v12637_v36 }
0x2253   :  { %v13473_v17 = vadd.f32 %v3830_v6, %v13406_v19 }
0x2255   :  { %v3841_v34 = vadd.f32 %v3838_v25, %v13473_v17 }
0x2257   :  { %12281 = vtanh.f32 %v3841_v34 }
0x2264   :  { %v12282_v24 = vpop.eup %12281 }
0x2265   :  { %11368 = vmatmul.mubr.msk.f32.vlgmr.msra.gmra.mxu0 %vm49_vm0, %v12282_v24 }
0x2266   :  { %11382 = vmatpush3.msra.mxu0 %v12639_v37  ;;  %11389 = vmatprep.mubr.msk.f32.mxu0 %vm12478_vm1, %v12477_v3 }
0x2267   :  { %11383 = vmatprep.subr.mxu0 %v12477_v3 }
0x2268   :  { %11384 = vmatpush3.msra.mxu0 %v12648_v40 }
0x2269   :  { %11385 = vmatprep.subr.mxu0 %v12477_v3 }
0x226a   :  { %11386 = vmatpush3.msra.mxu0 %v12620_v26 }
0x226b   :  { %11387 = vmatprep.subr.mxu0 %v12477_v3 }
0x226c   :  { %11388 = vmatpush3.msra.mxu0 %v12627_v31 }
0x226d   :  { %11403 = vmatprep.subr.mxu0 %v12477_v3 }
0x2325   :  { %v3912_v15 = vpop.f32.mrf.mxu0 }
0x2326   :  { %v3916_v18 = vmul.f32 %v3912_v15, %v13329_v9 }
0x2327   :  { %v11369_v20 = vpop.f32.mrf.mxu0 }
0x2328   :  { %v3917_v23 = vadd.f32 %v3916_v18, %v13473_v17 }
0x232a   :  { %v3918_v54 = vadd.f32 %v3917_v23, %v3839_v22 }
0x232c   :  { %12283 = vtanh.f32 %v3918_v54 }
0x2339   :  { %v12284_v27 = vpop.eup %12283 }
0x233a   :  { %11379 = vmatmul.mubr.msk.f32.vlgmr.msra.gmra.mxu1 %vm49_vm0, %v12284_v27 }
0x233b   :  { %11393 = vmatpush3.msra.mxu1 %v12639_v37  ;;  %11400 = vmatprep.mubr.msk.f32.mxu1 %vm12478_vm1, %v12477_v3 }
0x233c   :  { %11394 = vmatprep.subr.mxu1 %v12477_v3 }
0x233d   :  { %11395 = vmatpush3.msra.mxu1 %v12648_v40 }
0x233e   :  { %11396 = vmatprep.subr.mxu1 %v12477_v3 }
0x233f   :  { %11397 = vmatpush3.msra.mxu1 %v12620_v26 }
0x2340   :  { %11398 = vmatprep.subr.mxu1 %v12477_v3 }
0x2341   :  { %11399 = vmatpush3.msra.mxu1 %v12627_v31 }
0x2342   :  { %11414 = vmatprep.subr.mxu1 %v12477_v3 }
0x23fa   :  { %v3989_v29 = vpop.f32.mrf.mxu1 }
0x23fb   :  { %v3993_v2 = vmul.f32 %v3989_v29, %v13329_v9 }
0x23fc   :  { %v11380_v55 = vpop.f32.mrf.mxu1 }
0x23fd   :  { %v3994_v58 = vadd.f32 %v3993_v2, %v13473_v17 }
0x23ff   :  { %v3995_v28 = vadd.f32 %v3994_v58, %v3839_v22 }
0x2401   :  { %12285 = vtanh.f32 %v3995_v28 }
0x240e   :  { %v12286_v33 = vpop.eup %12285 }
0x240f   :  { %11390 = vmatmul.mubr.msk.f32.vlgmr.msra.gmra.mxu0 %vm49_vm0, %v12286_v33  ;;  %v4074_v48 = vadd.f32 %v12286_v33, %v12284_v27  ;;  %v4162_v27 = vadd.f32 %v4160_v63, %v13377_v0  ;;  %v4553_v0 = vstv %s4552_s21 }
0x2410   :  { %11404 = vmatpush3.msra.mxu0 %v12639_v37  ;;  %11411 = vmatprep.mubr.msk.f32.mxu0 %vm12478_vm1, %v12477_v3 }
0x2411   :  { %11405 = vmatprep.subr.mxu0 %v12477_v3  ;;  %v4075_v38 = vmul.f32 2.0, %v4074_v48 }
0x2412   :  { %11406 = vmatpush3.msra.mxu0 %v12648_v40 }
0x2413   :  { %11407 = vmatprep.subr.mxu0 %v12477_v3  ;;  %v4076_v13 = vadd.f32 %v12282_v24, %v4075_v38 }
0x2414   :  { %11408 = vmatpush3.msra.mxu0 %v12620_v26 }
0x2415   :  { %11409 = vmatprep.subr.mxu0 %v12477_v3 }
0x2416   :  { %11410 = vmatpush3.msra.mxu0 %v12627_v31 }
0x2417   :  { %11425 = vmatprep.subr.mxu0 %v12477_v3 }
0x24cf   :  { %v4066_v41 = vpop.f32.mrf.mxu0 }
0x24d0   :  { %v4070_v49 = vmul.f32 %v4066_v41, %v13367_v52  ;;  %v4554_v41 = vmul.f32 %v13294_v43, %v4553_v0 }
0x24d1   :  { %v11391_v46 = vpop.f32.mrf.mxu0 }
0x24d2   :  { %v4071_v45 = vadd.f32 %v4070_v49, %v13473_v17 }
0x24d4   :  { %v4072_v47 = vadd.f32 %v4071_v45, %v3840_v35 }
0x24d6   :  { %12287 = vtanh.f32 %v4072_v47 }
0x24e3   :  { %v12288_v50 = vpop.eup %12287 }
0x24e4   :  { %v4077_v51 = vadd.f32 %v12288_v50, %v4076_v13  ;;  %v4558_v13 = vrot.slane %v4554_v41, %v12957_v5 }
0x24e6   :  { %11401 = vmatmul.mubr.msk.f32.vlgmr.msra.gmra.mxu1 %vm49_vm0, %v4077_v51  ;;  %v13521_v14 = vadd.f32 %v4077_v51, %v3832_v16 }
0x24e7   :  { %11415 = vmatpush3.msra.mxu1 %v12639_v37  ;;  %11422 = vmatprep.mubr.msk.f32.mxu1 %vm12478_vm1, %v12477_v3 }
0x24e8   :  { %11416 = vmatprep.subr.mxu1 %v12477_v3 }
0x24e9   :  { %11417 = vmatpush3.msra.mxu1 %v12648_v40 }
0x24ea   :  { %11418 = vmatprep.subr.mxu1 %v12477_v3 }
0x24eb   :  { %11419 = vmatpush3.msra.mxu1 %v12620_v26 }
0x24ec   :  { %11420 = vmatprep.subr.mxu1 %v12477_v3 }
0x24ed   :  { %11421 = vmatpush3.msra.mxu1 %v12627_v31 }
0x24ee   :  { %11436 = vmatprep.subr.mxu1 %v12477_v3 }
0x25a6   :  { %v4147_v12 = vpop.f32.mrf.mxu1 }
0x25a7   :  { %v4151_v57 = vmul.f32 %v4147_v12, %v13399_v44 }
0x25a8   :  { %v11402_v60 = vpop.f32.mrf.mxu1 }
0x25a9   :  { %v4152_v61 = vadd.f32 %v4151_v57, %v13473_v17  ;;  %v4161_v17 = vadd.f32 %v4160_v63, %v13336_v30 }
0x25ab   :  { %v13538_v62 = vadd.f32 %v4152_v61, %v13406_v19 }
0x25ad   :  { %v4163_v1 = vadd.f32 %v4160_v63, %v13538_v62 }
0x25af   :  { %12289 = vtanh.f32 %v4163_v1 }
0x25bc   :  { %v12290_v4 = vpop.eup %12289 }
0x25bd   :  { %11412 = vmatmul.mubr.msk.f32.vlgmr.msra.gmra.mxu0 %vm49_vm0, %v12290_v4 }
0x25be   :  { %11426 = vmatpush3.msra.mxu0 %v12639_v37  ;;  %11433 = vmatprep.mubr.msk.f32.mxu0 %vm12478_vm1, %v12477_v3 }
0x25bf   :  { %11427 = vmatprep.subr.mxu0 %v12477_v3 }
0x25c0   :  { %11428 = vmatpush3.msra.mxu0 %v12648_v40 }
0x25c1   :  { %11429 = vmatprep.subr.mxu0 %v12477_v3 }
0x25c2   :  { %11430 = vmatpush3.msra.mxu0 %v12620_v26 }
0x25c3   :  { %11431 = vmatprep.subr.mxu0 %v12477_v3 }
0x25c4   :  { %11432 = vmatpush3.msra.mxu0 %v12627_v31 }
0x25c5   :  { %11447 = vmatprep.subr.mxu0 %v12477_v3 }
0x267d   :  { %v4234_v36 = vpop.f32.mrf.mxu0 }
0x267e   :  { %v4238_v53 = vmul.f32 %v4234_v36, %v13329_v9 }
0x267f   :  { %v11413_v6 = vpop.f32.mrf.mxu0 }
0x2680   :  { %v4239_v25 = vadd.f32 %v4238_v53, %v13538_v62 }
0x2682   :  { %v4240_v34 = vadd.f32 %v4239_v25, %v4161_v17 }
0x2684   :  { %12291 = vtanh.f32 %v4240_v34 }
0x2691   :  { %v12292_v24 = vpop.eup %12291 }
0x2692   :  { %11423 = vmatmul.mubr.msk.f32.vlgmr.msra.gmra.mxu1 %vm49_vm0, %v12292_v24 }
0x2693   :  { %11437 = vmatpush3.msra.mxu1 %v12639_v37  ;;  %11444 = vmatprep.mubr.msk.f32.mxu1 %vm12478_vm1, %v12477_v3 }
0x2694   :  { %11438 = vmatprep.subr.mxu1 %v12477_v3 }
0x2695   :  { %11439 = vmatpush3.msra.mxu1 %v12648_v40 }
0x2696   :  { %11440 = vmatprep.subr.mxu1 %v12477_v3 }
0x2697   :  { %11441 = vmatpush3.msra.mxu1 %v12620_v26 }
0x2698   :  { %11442 = vmatprep.subr.mxu1 %v12477_v3 }
0x2699   :  { %11443 = vmatpush3.msra.mxu1 %v12627_v31 }
0x269a   :  { %11458 = vmatprep.subr.mxu1 %v12477_v3 }
0x2752   :  { %v4311_v30 = vpop.f32.mrf.mxu1 }
0x2753   :  { %v4315_v15 = vmul.f32 %v4311_v30, %v13329_v9 }
0x2754   :  { %v11424_v18 = vpop.f32.mrf.mxu1 }
0x2755   :  { %v4316_v20 = vadd.f32 %v4315_v15, %v13538_v62  ;;  %v13686_v15 = vstv %s13645_s0 }
0x2756   :  { %v4574_v18 = vmul.f32 %v13686_v15, %v12658_v42 }
0x2757   :  { %v4317_v22 = vadd.f32 %v4316_v20, %v4161_v17  ;;  %v13692_v20 = vmul.f32 %v13294_v43, %v13686_v15 }
0x2759   :  { %12293 = vtanh.f32 %v4317_v22  ;;  %v4575_v22 = vadd.f32 %v4574_v18, %v13692_v20  ;;  %v4914_v0 = vrot.slane %v13692_v20, %v12614_v21 }
0x2766   :  { %v12294_v23 = vpop.eup %12293 }
0x2767   :  { %11434 = vmatmul.mubr.msk.f32.vlgmr.msra.gmra.mxu0 %vm49_vm0, %v12294_v23 }
0x2768   :  { %11448 = vmatpush3.msra.mxu0 %v13237_v11  ;;  %11455 = vmatprep.mubr.msk.f32.mxu0 %vm12478_vm1, %v12477_v3 }
0x2769   :  { %11449 = vmatprep.subr.mxu0 %v12477_v3 }
0x276a   :  { %11450 = vmatpush3.msra.mxu0 %v13246_v7  ;;  %v4396_v7 = vadd.f32 %v12294_v23, %v12292_v24  ;;  %v13696_v23 = vrot.slane %v4575_v22, %v12614_v21 }
0x276b   :  { %11451 = vmatprep.subr.mxu0 %v12477_v3 }
0x276c   :  { %11452 = vmatpush3.msra.mxu0 %v13253_v56  ;;  %v4397_v55 = vmul.f32 2.0, %v4396_v7 }
0x276d   :  { %11453 = vmatprep.subr.mxu0 %v12477_v3 }
0x276e   :  { %11454 = vmatpush3.msra.mxu0 %v13260_v10  ;;  %v4398_v58 = vadd.f32 %v12290_v4, %v4397_v55 }
0x276f   :  { %11469 = vmatprep.subr.mxu0 %v12477_v3 }
0x2827   :  { %v4388_v9 = vpop.f32.mrf.mxu0 }
0x2828   :  { %v4392_v11 = vmul.f32 %v4388_v9, %v13367_v52  ;;  %v4576_v52 = vstv %s13606_s20  ;;  %s14308_s20 = smul.f32 0.25, %s7362_s19 }
0x2829   :  { %v11435_v54 = vpop.f32.mrf.mxu0  ;;  %v4577_v33 = vmul.f32 %v13294_v43, %v4576_v52 }
0x282a   :  { %v4393_v29 = vadd.f32 %v4392_v11, %v13538_v62  ;;  %s7364_s21 = smul.f32 0.5, %s14308_s20 }
0x282b   :  { %v4581_v46 = vrot.slane %v4577_v33, %v12614_v21  ;;  %s7365_s22 = smul.f32 0.16666667, %s14308_s20 }
0x282c   :  { %v4394_v2 = vadd.f32 %v4393_v29, %v4162_v27  ;;  %s8749_s30 = smul.f32 4.0, %s14308_s20 }
0x282d   :  { %v13618_v16 = vadd.f32 %v4581_v46, %v12629_v32 }
0x282e   :  { %12295 = vtanh.f32 %v4394_v2 }
0x282f   :  { %v4592_v27 = vadd.f32 %v13696_v23, %v13618_v16 }
0x283b   :  { %v12296_v56 = vpop.eup %12295 }
0x283c   :  { %v4399_v28 = vadd.f32 %v12296_v56, %v4398_v58 }
0x283e   :  { %11445 = vmatmul.mubr.msk.f32.vlgmr.msra.gmra.mxu1 %vm49_vm0, %v4399_v28  ;;  %v4476_v10 = vadd.f32 %v4399_v28, %v13521_v14  ;;  %v13718_v28 = vstv %s4567_s25 }
0x283f   :  { %11459 = vmatpush3.msra.mxu1 %v12639_v37  ;;  %11466 = vmatprep.mubr.msk.f32.mxu1 %vm12478_vm1, %v12477_v3 }
0x2840   :  { %11460 = vmatprep.subr.mxu1 %v12477_v3  ;;  %11456 = vmatmul.mubr.msk.f32.vlgmr.msra.gmra.mxu0 %vm49_vm0, %v4476_v10 }
0x2841   :  { %11461 = vmatpush3.msra.mxu1 %v12648_v40  ;;  %11470 = vmatpush3.msra.mxu0 %v12639_v37 }
0x2842   :  { %11462 = vmatprep.subr.mxu1 %v12477_v3  ;;  %11471 = vmatprep.subr.mxu0 %v12477_v3 }
0x2843   :  { %11463 = vmatpush3.msra.mxu1 %v12620_v26  ;;  %11472 = vmatpush3.msra.mxu0 %v12648_v40 }
0x2844   :  { %11464 = vmatprep.subr.mxu1 %v12477_v3  ;;  %11473 = vmatprep.subr.mxu0 %v12477_v3 }
0x2845   :  { %11465 = vmatpush3.msra.mxu1 %v12627_v31  ;;  %11474 = vmatpush3.msra.mxu0 %v12620_v26 }
0x2846   :  { %11475 = vmatprep.subr.mxu0 %v12477_v3  ;;  %11480 = vmatprep.subr.mxu1 %v12477_v3 }
0x2847   :  { %11476 = vmatpush3.msra.mxu0 %v12627_v31  ;;  %11477 = vmatprep.mubr.msk.f32.mxu0 %vm12478_vm1, %v12477_v3 }
0x2848   :  { %11491 = vmatprep.subr.mxu0 %v12477_v3 }
0x28fe   :  { %v4469_v49 = vpop.f32.mrf.mxu1 }
0x28ff   :  { %v4473_v35 = vmul.f32 %v4469_v49, %v13399_v44  ;;  %v13725_v49 = vrot.slane %v4574_v18, %v12614_v21  ;;  %v5232_v18 = vmul.f32 2.0, %v13692_v20 }
0x2900   :  { %v11446_v45 = vpop.f32.mrf.mxu1  ;;  %v4546_v47 = vpop.f32.mrf.mxu0 }
0x2901   :  { %v4474_v48 = vadd.f32 %v4473_v35, %v13538_v62  ;;  %v4550_v38 = vmul.f32 %v4546_v47, %v13399_v44  ;;  %v4915_v35 = vadd.f32 %v4914_v0, %v13618_v16 }
0x2902   :  { %v11457_v50 = vpop.f32.mrf.mxu0 }
0x2903   :  { %v13621_v51 = vadd.f32 %v4474_v48, %v13406_v19  ;;  %v4551_v14 = vadd.f32 %v4550_v38, %v13307_v39  ;;  %v13648_v39 = vstv %s4566_s24 }
0x2904   :  { %v4571_v19 = vmul.f32 %v13294_v43, %v13648_v39  ;;  %v4572_v57 = vmul.f32 %v13648_v39, %v12658_v42 }
0x2905   :  { %v4593_v8 = vadd.f32 %v13618_v16, %v13621_v51  ;;  %v13626_v12 = vadd.f32 %v4558_v13, %v4551_v14 }
0x2906   :  { %v4573_v59 = vadd.f32 %v4572_v57, %v4571_v19 }
0x2907   :  { %12297 = vtanh.f32 %v4593_v8  ;;  %4561 = vst.msk [vmem:[#allocation5 + $0x18] sm:$0xff] %vm49_vm0, %v13626_v12 }
0x2908   :  { %v13655_v60 = vrot.slane %v4573_v59, %v12614_v21 }
0x290a   :  { %v4587_v1 = vadd.f32 %v13655_v60, %v13618_v16  ;;  %v4916_v50 = vadd.f32 %v4915_v35, %v13655_v60 }
0x2914   :  { %v13630_v44 = vpop.eup %12297 }
0x2915   :  { %11467 = vmatmul.mubr.msk.f32.vlgmr.msra.gmra.mxu1 %vm49_vm0, %v13630_v44 }
0x2916   :  { %11481 = vmatpush3.msra.mxu1 %v12639_v37  ;;  %11488 = vmatprep.mubr.msk.f32.mxu1 %vm12478_vm1, %v12477_v3 }
0x2917   :  { %11482 = vmatprep.subr.mxu1 %v12477_v3 }
0x2918   :  { %11483 = vmatpush3.msra.mxu1 %v12648_v40 }
0x2919   :  { %11484 = vmatprep.subr.mxu1 %v12477_v3 }
0x291a   :  { %11485 = vmatpush3.msra.mxu1 %v12620_v26 }
0x291b   :  { %11486 = vmatprep.subr.mxu1 %v12477_v3 }
0x291c   :  { %11487 = vmatpush3.msra.mxu1 %v12627_v31 }
0x291d   :  { %11502 = vmatprep.subr.mxu1 %v12477_v3 }
0x29d5   :  { %v4664_v61 = vpop.f32.mrf.mxu1 }
0x29d6   :  { %v4668_v62 = vmul.f32 %v4664_v61, %v13648_v39 }
0x29d7   :  { %v11468_v63 = vpop.f32.mrf.mxu1 }
0x29d8   :  { %v4669_v4 = vadd.f32 %v4668_v62, %v13621_v51 }
0x29da   :  { %v4670_v36 = vadd.f32 %v4669_v4, %v4587_v1 }
0x29dc   :  { %12299 = vtanh.f32 %v4670_v36  ;;  %v4917_v36 = vadd.f32 %v4915_v35, %v13696_v23 }
0x29e9   :  { %v12300_v53 = vpop.eup %12299 }
0x29ea   :  { %11478 = vmatmul.mubr.msk.f32.vlgmr.msra.gmra.mxu0 %vm49_vm0, %v12300_v53 }
0x29eb   :  { %11492 = vmatpush3.msra.mxu0 %v12639_v37  ;;  %11499 = vmatprep.mubr.msk.f32.mxu0 %vm12478_vm1, %v12477_v3 }
0x29ec   :  { %11493 = vmatprep.subr.mxu0 %v12477_v3 }
0x29ed   :  { %11494 = vmatpush3.msra.mxu0 %v12648_v40 }
0x29ee   :  { %11495 = vmatprep.subr.mxu0 %v12477_v3 }
0x29ef   :  { %11496 = vmatpush3.msra.mxu0 %v12620_v26 }
0x29f0   :  { %11497 = vmatprep.subr.mxu0 %v12477_v3 }
0x29f1   :  { %11498 = vmatpush3.msra.mxu0 %v12627_v31 }
0x29f2   :  { %11513 = vmatprep.subr.mxu0 %v12477_v3 }
0x2aaa   :  { %v4741_v6 = vpop.f32.mrf.mxu0 }
0x2aab   :  { %v4745_v17 = vmul.f32 %v4741_v6, %v13648_v39 }
0x2aac   :  { %v11479_v25 = vpop.f32.mrf.mxu0 }
0x2aad   :  { %v4746_v34 = vadd.f32 %v4745_v17, %v13621_v51 }
0x2aaf   :  { %v4747_v24 = vadd.f32 %v4746_v34, %v4587_v1 }
0x2ab1   :  { %12301 = vtanh.f32 %v4747_v24 }
0x2abe   :  { %v12302_v30 = vpop.eup %12301 }
0x2abf   :  { %11489 = vmatmul.mubr.msk.f32.vlgmr.msra.gmra.mxu1 %vm49_vm0, %v12302_v30  ;;  %v4826_v7 = vadd.f32 %v12302_v30, %v12300_v53 }
0x2ac0   :  { %11503 = vmatpush3.msra.mxu1 %v12639_v37  ;;  %11510 = vmatprep.mubr.msk.f32.mxu1 %vm12478_vm1, %v12477_v3 }
0x2ac1   :  { %11504 = vmatprep.subr.mxu1 %v12477_v3  ;;  %v4827_v43 = vmul.f32 2.0, %v4826_v7 }
0x2ac2   :  { %11505 = vmatpush3.msra.mxu1 %v12648_v40 }
0x2ac3   :  { %11506 = vmatprep.subr.mxu1 %v12477_v3  ;;  %v4828_v55 = vadd.f32 %v13630_v44, %v4827_v43 }
0x2ac4   :  { %11507 = vmatpush3.msra.mxu1 %v12620_v26 }
0x2ac5   :  { %11508 = vmatprep.subr.mxu1 %v12477_v3 }
0x2ac6   :  { %11509 = vmatpush3.msra.mxu1 %v12627_v31 }
0x2ac7   :  { %11524 = vmatprep.subr.mxu1 %v12477_v3 }
0x2b7f   :  { %v4818_v9 = vpop.f32.mrf.mxu1 }
0x2b80   :  { %v4822_v11 = vmul.f32 %v4818_v9, %v13686_v15 }
0x2b81   :  { %v11490_v54 = vpop.f32.mrf.mxu1 }
0x2b82   :  { %v4823_v29 = vadd.f32 %v4822_v11, %v13621_v51  ;;  %v5236_v11 = vrot.slane %v5232_v18, %v12614_v21 }
0x2b84   :  { %v4824_v2 = vadd.f32 %v4823_v29, %v4592_v27 }
0x2b86   :  { %12303 = vtanh.f32 %v4824_v2  ;;  %v5237_v2 = vadd.f32 %v5236_v11, %v13618_v16 }
0x2b93   :  { %v12304_v58 = vpop.eup %12303 }
0x2b94   :  { %v13703_v56 = vadd.f32 %v12304_v58, %v4828_v55 }
0x2b96   :  { %11500 = vmatmul.mubr.msk.f32.vlgmr.msra.gmra.mxu0 %vm49_vm0, %v13703_v56 }
0x2b97   :  { %11514 = vmatpush3.msra.mxu0 %v12639_v37  ;;  %11521 = vmatprep.mubr.msk.f32.mxu0 %vm12478_vm1, %v12477_v3 }
0x2b98   :  { %11515 = vmatprep.subr.mxu0 %v12477_v3 }
0x2b99   :  { %11516 = vmatpush3.msra.mxu0 %v12648_v40 }
0x2b9a   :  { %11517 = vmatprep.subr.mxu0 %v12477_v3 }
0x2b9b   :  { %11518 = vmatpush3.msra.mxu0 %v12620_v26 }
0x2b9c   :  { %11519 = vmatprep.subr.mxu0 %v12477_v3 }
0x2b9d   :  { %11520 = vmatpush3.msra.mxu0 %v12627_v31 }
0x2b9e   :  { %11535 = vmatprep.subr.mxu0 %v12477_v3 }
0x2c56   :  { %v4899_v10 = vpop.f32.mrf.mxu0 }
0x2c57   :  { %v4904_v52 = vmul.f32 %v13718_v28, %v4899_v10 }
0x2c58   :  { %v11501_v33 = vpop.f32.mrf.mxu0 }
0x2c59   :  { %v4905_v41 = vadd.f32 %v4904_v52, %v13621_v51  ;;  %v5238_v52 = vadd.f32 %v5237_v2, %v13655_v60 }
0x2c5b   :  { %v13728_v46 = vadd.f32 %v13725_v49, %v4905_v41 }
0x2c5d   :  { %v4918_v45 = vadd.f32 %v4915_v35, %v13728_v46 }
0x2c5f   :  { %12305 = vtanh.f32 %v4918_v45 }
0x2c6c   :  { %v12306_v47 = vpop.eup %12305 }
0x2c6d   :  { %11511 = vmatmul.mubr.msk.f32.vlgmr.msra.gmra.mxu1 %vm49_vm0, %v12306_v47 }
0x2c6e   :  { %11525 = vmatpush3.msra.mxu1 %v12639_v37  ;;  %11532 = vmatprep.mubr.msk.f32.mxu1 %vm12478_vm1, %v12477_v3 }
0x2c6f   :  { %11526 = vmatprep.subr.mxu1 %v12477_v3 }
0x2c70   :  { %11527 = vmatpush3.msra.mxu1 %v12648_v40 }
0x2c71   :  { %11528 = vmatprep.subr.mxu1 %v12477_v3 }
0x2c72   :  { %11529 = vmatpush3.msra.mxu1 %v12620_v26 }
0x2c73   :  { %11530 = vmatprep.subr.mxu1 %v12477_v3 }
0x2c74   :  { %11531 = vmatpush3.msra.mxu1 %v12627_v31 }
0x2c75   :  { %11546 = vmatprep.subr.mxu1 %v12477_v3 }
0x2d2d   :  { %v4989_v48 = vpop.f32.mrf.mxu1 }
0x2d2e   :  { %v4993_v38 = vmul.f32 %v4989_v48, %v13648_v39 }
0x2d2f   :  { %v11512_v13 = vpop.f32.mrf.mxu1 }
0x2d30   :  { %v4994_v51 = vadd.f32 %v4993_v38, %v13728_v46 }
0x2d32   :  { %v4995_v14 = vadd.f32 %v4994_v51, %v4916_v50 }
0x2d34   :  { %12307 = vtanh.f32 %v4995_v14  ;;  %v5239_v14 = vadd.f32 %v5237_v2, %v13696_v23 }
0x2d41   :  { %v12308_v8 = vpop.eup %12307 }
0x2d42   :  { %11522 = vmatmul.mubr.msk.f32.vlgmr.msra.gmra.mxu0 %vm49_vm0, %v12308_v8 }
0x2d43   :  { %11536 = vmatpush3.msra.mxu0 %v12639_v37  ;;  %11543 = vmatprep.mubr.msk.f32.mxu0 %vm12478_vm1, %v12477_v3 }
0x2d44   :  { %11537 = vmatprep.subr.mxu0 %v12477_v3 }
0x2d45   :  { %11538 = vmatpush3.msra.mxu0 %v12648_v40 }
0x2d46   :  { %11539 = vmatprep.subr.mxu0 %v12477_v3 }
0x2d47   :  { %11540 = vmatpush3.msra.mxu0 %v12620_v26 }
0x2d48   :  { %11541 = vmatprep.subr.mxu0 %v12477_v3 }
0x2d49   :  { %11542 = vmatpush3.msra.mxu0 %v12627_v31 }
0x2d4a   :  { %11557 = vmatprep.subr.mxu0 %v12477_v3 }
0x2e02   :  { %v5066_v44 = vpop.f32.mrf.mxu0 }
0x2e03   :  { %v5070_v19 = vmul.f32 %v5066_v44, %v13648_v39 }
0x2e04   :  { %v11523_v57 = vpop.f32.mrf.mxu0 }
0x2e05   :  { %v5071_v59 = vadd.f32 %v5070_v19, %v13728_v46 }
0x2e07   :  { %v5072_v61 = vadd.f32 %v5071_v59, %v4916_v50 }
0x2e09   :  { %12309 = vtanh.f32 %v5072_v61 }
0x2e16   :  { %v12310_v62 = vpop.eup %12309 }
0x2e17   :  { %11533 = vmatmul.mubr.msk.f32.vlgmr.msra.gmra.mxu1 %vm49_vm0, %v12310_v62  ;;  %v5151_v17 = vadd.f32 %v12310_v62, %v12308_v8 }
0x2e18   :  { %11547 = vmatpush3.msra.mxu1 %v12639_v37  ;;  %11554 = vmatprep.mubr.msk.f32.mxu1 %vm12478_vm1, %v12477_v3 }
0x2e19   :  { %11548 = vmatprep.subr.mxu1 %v12477_v3  ;;  %v5152_v25 = vmul.f32 2.0, %v5151_v17 }
0x2e1a   :  { %11549 = vmatpush3.msra.mxu1 %v12648_v40 }
0x2e1b   :  { %11550 = vmatprep.subr.mxu1 %v12477_v3  ;;  %v5153_v34 = vadd.f32 %v12306_v47, %v5152_v25 }
0x2e1c   :  { %11551 = vmatpush3.msra.mxu1 %v12620_v26 }
0x2e1d   :  { %11552 = vmatprep.subr.mxu1 %v12477_v3 }
0x2e1e   :  { %11553 = vmatpush3.msra.mxu1 %v12627_v31 }
0x2e1f   :  { %11568 = vmatprep.subr.mxu1 %v12477_v3 }
0x2ed7   :  { %v5143_v63 = vpop.f32.mrf.mxu1 }
0x2ed8   :  { %v5147_v1 = vmul.f32 %v5143_v63, %v13686_v15 }
0x2ed9   :  { %v11534_v4 = vpop.f32.mrf.mxu1 }
0x2eda   :  { %v5148_v53 = vadd.f32 %v5147_v1, %v13728_v46 }
0x2edc   :  { %v5149_v6 = vadd.f32 %v5148_v53, %v4917_v36 }
0x2ede   :  { %12311 = vtanh.f32 %v5149_v6 }
0x2eeb   :  { %v12312_v24 = vpop.eup %12311 }
0x2eec   :  { %v13773_v30 = vadd.f32 %v12312_v24, %v5153_v34 }
0x2eee   :  { %11544 = vmatmul.mubr.msk.f32.vlgmr.msra.gmra.mxu0 %vm49_vm0, %v13773_v30  ;;  %v5231_v62 = vadd.f32 %v13773_v30, %v13703_v56  ;;  %v5554_v56 = vmul.f32 3.0, %v13692_v20 }
0x2eef   :  { %11558 = vmatpush3.msra.mxu0 %v12639_v37  ;;  %11565 = vmatprep.mubr.msk.f32.mxu0 %vm12478_vm1, %v12477_v3 }
0x2ef0   :  { %11559 = vmatprep.subr.mxu0 %v12477_v3  ;;  %v5558_v53 = vrot.slane %v5554_v56, %v12614_v21 }
0x2ef1   :  { %11560 = vmatpush3.msra.mxu0 %v12648_v40 }
0x2ef2   :  { %11561 = vmatprep.subr.mxu0 %v12477_v3  ;;  %v5559_v34 = vadd.f32 %v5558_v53, %v13618_v16 }
0x2ef3   :  { %11562 = vmatpush3.msra.mxu0 %v12620_v26 }
0x2ef4   :  { %11563 = vmatprep.subr.mxu0 %v12477_v3 }
0x2ef5   :  { %11564 = vmatpush3.msra.mxu0 %v12627_v31 }
0x2ef6   :  { %11579 = vmatprep.subr.mxu0 %v12477_v3 }
0x2fae   :  { %v5224_v22 = vpop.f32.mrf.mxu0 }
0x2faf   :  { %v5228_v9 = vmul.f32 %v5224_v22, %v13718_v28  ;;  %v5560_v22 = vadd.f32 %v5559_v34, %v13655_v60 }
0x2fb0   :  { %v11545_v54 = vpop.f32.mrf.mxu0 }
0x2fb1   :  { %v5229_v27 = vadd.f32 %v5228_v9, %v13728_v46 }
0x2fb3   :  { %v13792_v29 = vadd.f32 %v5229_v27, %v13725_v49 }
0x2fb5   :  { %v5240_v7 = vadd.f32 %v5237_v2, %v13792_v29 }
0x2fb7   :  { %12313 = vtanh.f32 %v5240_v7 }
0x2fc4   :  { %v12314_v43 = vpop.eup %12313 }
0x2fc5   :  { %11555 = vmatmul.mubr.msk.f32.vlgmr.msra.gmra.mxu1 %vm49_vm0, %v12314_v43 }
0x2fc6   :  { %11569 = vmatpush3.msra.mxu1 %v12639_v37  ;;  %11576 = vmatprep.mubr.msk.f32.mxu1 %vm12478_vm1, %v12477_v3 }
0x2fc7   :  { %11570 = vmatprep.subr.mxu1 %v12477_v3 }
0x2fc8   :  { %11571 = vmatpush3.msra.mxu1 %v12648_v40 }
0x2fc9   :  { %11572 = vmatprep.subr.mxu1 %v12477_v3 }
0x2fca   :  { %11573 = vmatpush3.msra.mxu1 %v12620_v26 }
0x2fcb   :  { %11574 = vmatprep.subr.mxu1 %v12477_v3 }
0x2fcc   :  { %11575 = vmatpush3.msra.mxu1 %v12627_v31 }
0x2fcd   :  { %11590 = vmatprep.subr.mxu1 %v12477_v3 }
0x3085   :  { %v5311_v55 = vpop.f32.mrf.mxu1 }
0x3086   :  { %v5315_v58 = vmul.f32 %v5311_v55, %v13648_v39  ;;  %v13892_v55 = vld [vmem:[%s14904_s2 + $0x58] sm:$0xff] }
0x3087   :  { %v11556_v10 = vpop.f32.mrf.mxu1 }
0x3088   :  { %v5316_v0 = vadd.f32 %v5315_v58, %v13792_v29  ;;  %v13908_v58 = vld [vmem:[%s14904_s2 + $0x48] sm:$0xff]  ;;  %v13915_v10 = vld [vmem:[%s14904_s2 + $0x40] sm:$0xff] }
0x308a   :  { %v5317_v33 = vadd.f32 %v5316_v0, %v5238_v52 }
0x308c   :  { %12315 = vtanh.f32 %v5317_v33 }
0x3099   :  { %v12316_v41 = vpop.eup %12315 }
0x309a   :  { %11566 = vmatmul.mubr.msk.f32.vlgmr.msra.gmra.mxu0 %vm49_vm0, %v12316_v41 }
0x309b   :  { %11580 = vmatpush3.msra.mxu0 %v12639_v37  ;;  %11587 = vmatprep.mubr.msk.f32.mxu0 %vm12478_vm1, %v12477_v3 }
0x309c   :  { %11581 = vmatprep.subr.mxu0 %v12477_v3 }
0x309d   :  { %11582 = vmatpush3.msra.mxu0 %v12648_v40 }
0x309e   :  { %11583 = vmatprep.subr.mxu0 %v12477_v3 }
0x309f   :  { %11584 = vmatpush3.msra.mxu0 %v12620_v26 }
0x30a0   :  { %11585 = vmatprep.subr.mxu0 %v12477_v3 }
0x30a1   :  { %11586 = vmatpush3.msra.mxu0 %v12627_v31 }
0x30a2   :  { %11601 = vmatprep.subr.mxu0 %v12477_v3 }
0x315a   :  { %v5388_v46 = vpop.f32.mrf.mxu0 }
0x315b   :  { %v5392_v35 = vmul.f32 %v5388_v46, %v13648_v39 }
0x315c   :  { %v11567_v45 = vpop.f32.mrf.mxu0 }
0x315d   :  { %v5393_v47 = vadd.f32 %v5392_v35, %v13792_v29 }
0x315f   :  { %v5394_v48 = vadd.f32 %v5393_v47, %v5238_v52 }
0x3161   :  { %12317 = vtanh.f32 %v5394_v48 }
0x316e   :  { %v12318_v38 = vpop.eup %12317 }
0x316f   :  { %11577 = vmatmul.mubr.msk.f32.vlgmr.msra.gmra.mxu1 %vm49_vm0, %v12318_v38  ;;  %v5473_v19 = vadd.f32 %v12318_v38, %v12316_v41  ;;  %v5561_v41 = vadd.f32 %v5559_v34, %v13696_v23  ;;  %v5952_v23 = vstv %s5951_s9 }
0x3170   :  { %11591 = vmatpush3.msra.mxu1 %v12639_v37  ;;  %11598 = vmatprep.mubr.msk.f32.mxu1 %vm12478_vm1, %v12477_v3 }
0x3171   :  { %11592 = vmatprep.subr.mxu1 %v12477_v3  ;;  %v5474_v57 = vmul.f32 2.0, %v5473_v19 }
0x3172   :  { %11593 = vmatpush3.msra.mxu1 %v12648_v40 }
0x3173   :  { %11594 = vmatprep.subr.mxu1 %v12477_v3  ;;  %v5475_v59 = vadd.f32 %v12314_v43, %v5474_v57 }
0x3174   :  { %11595 = vmatpush3.msra.mxu1 %v12620_v26 }
0x3175   :  { %11596 = vmatprep.subr.mxu1 %v12477_v3 }
0x3176   :  { %11597 = vmatpush3.msra.mxu1 %v12627_v31 }
0x3177   :  { %11612 = vmatprep.subr.mxu1 %v12477_v3 }
0x322f   :  { %v5465_v13 = vpop.f32.mrf.mxu1 }
0x3230   :  { %v5469_v50 = vmul.f32 %v5465_v13, %v13686_v15 }
0x3231   :  { %v11578_v51 = vpop.f32.mrf.mxu1 }
0x3232   :  { %v5470_v8 = vadd.f32 %v5469_v50, %v13792_v29  ;;  %v13952_v51 = vld [vmem:[%s14905_s3] sm:$0xff] }
0x3234   :  { %v5471_v44 = vadd.f32 %v5470_v8, %v5239_v14  ;;  %v5953_v8 = vmul.f32 %v13952_v51, %v5952_v23 }
0x3236   :  { %12319 = vtanh.f32 %v5471_v44 }
0x3243   :  { %v12320_v61 = vpop.eup %12319 }
0x3244   :  { %v5476_v63 = vadd.f32 %v12320_v61, %v5475_v59 }
0x3246   :  { %11588 = vmatmul.mubr.msk.f32.vlgmr.msra.gmra.mxu0 %vm49_vm0, %v5476_v63  ;;  %v13840_v1 = vadd.f32 %v5476_v63, %v5231_v62 }
0x3247   :  { %11602 = vmatpush3.msra.mxu0 %v12639_v37  ;;  %11609 = vmatprep.mubr.msk.f32.mxu0 %vm12478_vm1, %v12477_v3 }
0x3248   :  { %11603 = vmatprep.subr.mxu0 %v12477_v3 }
0x3249   :  { %11604 = vmatpush3.msra.mxu0 %v12648_v40 }
0x324a   :  { %11605 = vmatprep.subr.mxu0 %v12477_v3 }
0x324b   :  { %11606 = vmatpush3.msra.mxu0 %v12620_v26 }
0x324c   :  { %11607 = vmatprep.subr.mxu0 %v12477_v3 }
0x324d   :  { %11608 = vmatpush3.msra.mxu0 %v12627_v31 }
0x324e   :  { %11623 = vmatprep.subr.mxu0 %v12477_v3 }
0x3306   :  { %v5546_v4 = vpop.f32.mrf.mxu0 }
0x3307   :  { %v5550_v36 = vmul.f32 %v5546_v4, %v13718_v28 }
0x3308   :  { %v11589_v6 = vpop.f32.mrf.mxu0 }
0x3309   :  { %v5551_v17 = vadd.f32 %v5550_v36, %v13792_v29 }
0x330b   :  { %v13857_v25 = vadd.f32 %v5551_v17, %v13725_v49 }
0x330d   :  { %v5562_v24 = vadd.f32 %v5559_v34, %v13857_v25 }
0x330f   :  { %12321 = vtanh.f32 %v5562_v24 }
0x331c   :  { %v12322_v30 = vpop.eup %12321 }
0x331d   :  { %11599 = vmatmul.mubr.msk.f32.vlgmr.msra.gmra.mxu1 %vm49_vm0, %v12322_v30 }
0x331e   :  { %11613 = vmatpush3.msra.mxu1 %v12639_v37  ;;  %11620 = vmatprep.mubr.msk.f32.mxu1 %vm12478_vm1, %v12477_v3 }
0x331f   :  { %11614 = vmatprep.subr.mxu1 %v12477_v3 }
0x3320   :  { %11615 = vmatpush3.msra.mxu1 %v12648_v40 }
0x3321   :  { %11616 = vmatprep.subr.mxu1 %v12477_v3 }
0x3322   :  { %11617 = vmatpush3.msra.mxu1 %v12620_v26 }
0x3323   :  { %11618 = vmatprep.subr.mxu1 %v12477_v3 }
0x3324   :  { %11619 = vmatpush3.msra.mxu1 %v12627_v31 }
0x3325   :  { %11634 = vmatprep.subr.mxu1 %v12477_v3 }
0x33dd   :  { %v5633_v16 = vpop.f32.mrf.mxu1 }
0x33de   :  { %v5637_v20 = vmul.f32 %v5633_v16, %v13648_v39 }
0x33df   :  { %v11600_v18 = vpop.f32.mrf.mxu1 }
0x33e0   :  { %v5638_v9 = vadd.f32 %v5637_v20, %v13857_v25 }
0x33e2   :  { %v5639_v11 = vadd.f32 %v5638_v9, %v5560_v22 }
0x33e4   :  { %12323 = vtanh.f32 %v5639_v11 }
0x33f1   :  { %v12324_v54 = vpop.eup %12323 }
0x33f2   :  { %11610 = vmatmul.mubr.msk.f32.vlgmr.msra.gmra.mxu0 %vm49_vm0, %v12324_v54 }
0x33f3   :  { %11624 = vmatpush3.msra.mxu0 %v12639_v37  ;;  %11631 = vmatprep.mubr.msk.f32.mxu0 %vm12478_vm1, %v12477_v3 }
0x33f4   :  { %11625 = vmatprep.subr.mxu0 %v12477_v3 }
0x33f5   :  { %11626 = vmatpush3.msra.mxu0 %v12648_v40 }
0x33f6   :  { %11627 = vmatprep.subr.mxu0 %v12477_v3 }
0x33f7   :  { %11628 = vmatpush3.msra.mxu0 %v12620_v26 }
0x33f8   :  { %11629 = vmatprep.subr.mxu0 %v12477_v3 }
0x33f9   :  { %11630 = vmatpush3.msra.mxu0 %v12627_v31 }
0x33fa   :  { %11645 = vmatprep.subr.mxu0 %v12477_v3 }
0x34b2   :  { %v5710_v60 = vpop.f32.mrf.mxu0 }
0x34b3   :  { %v5714_v27 = vmul.f32 %v5710_v60, %v13648_v39  ;;  %v13901_v39 = vld [vmem:[%s14904_s2 + $0x50] sm:$0xff] }
0x34b4   :  { %v11611_v29 = vpop.f32.mrf.mxu0 }
0x34b5   :  { %v5715_v2 = vadd.f32 %v5714_v27, %v13857_v25 }
0x34b7   :  { %v5716_v7 = vadd.f32 %v5715_v2, %v5560_v22 }
0x34b9   :  { %12325 = vtanh.f32 %v5716_v7 }
0x34c6   :  { %v12326_v43 = vpop.eup %12325 }
0x34c7   :  { %11621 = vmatmul.mubr.msk.f32.vlgmr.msra.gmra.mxu1 %vm49_vm0, %v12326_v43  ;;  %v5795_v45 = vadd.f32 %v12326_v43, %v12324_v54  ;;  %v14030_v43 = vstv %s13989_s13  ;;  %s12452_s13 = scalar_lea.vmem %s10088_s12, 1024 }
0x34c8   :  { %11635 = vmatpush3.msra.mxu1 %v13892_v55  ;;  %11642 = vmatprep.mubr.msk.f32.mxu1 %vm12478_vm1, %v12477_v3  ;;  %p12453_p5 = scmp.ne.s32.totalorder %s10088_s12, %s12452_s13  ;;  %p12458_p7 = scmp.lt.s32.totalorder %s12452_s13, %s12452_s13 }
0x34c9   :  { %11636 = vmatprep.subr.mxu1 %v12477_v3  ;;  %v5796_v47 = vmul.f32 2.0, %v5795_v45 }
0x34ca   :  { %11637 = vmatpush3.msra.mxu1 %v13901_v39  ;;  %p12459_p8 = por %p12458_p7, %p12457_p6 }
0x34cb   :  { %11638 = vmatprep.subr.mxu1 %v12477_v3  ;;  %v5797_v48 = vadd.f32 %v12322_v30, %v5796_v47 }
0x34cc   :  { %11639 = vmatpush3.msra.mxu1 %v13908_v58  ;;  %p12460_p9 = pnand %p12459_p8, %p12453_p5 }
0x34cd   :  { %11640 = vmatprep.subr.mxu1 %v12477_v3 }
0x34ce   :  { %11641 = vmatpush3.msra.mxu1 %v13915_v10 }
0x34cf   :  { %11656 = vmatprep.subr.mxu1 %v12477_v3 }
0x3587   :  { %v5787_v52 = vpop.f32.mrf.mxu1 }
0x3588   :  { %v5791_v0 = vmul.f32 %v5787_v52, %v13686_v15  ;;  %v5975_v15 = vstv %s13945_s8  ;;  %v5973_v52 = vmul.f32 %v14030_v43, %v12658_v42 }
0x3589   :  { %v11622_v33 = vpop.f32.mrf.mxu1  ;;  %v5976_v14 = vmul.f32 %v13952_v51, %v5975_v15 }
0x358a   :  { %v5792_v46 = vadd.f32 %v5791_v0, %v13857_v25  ;;  %v14036_v0 = vmul.f32 %v13952_v51, %v14030_v43 }
0x358b   :  { %v5980_v19 = vrot.slane %v5976_v14, %v12614_v21 }
0x358c   :  { %v5793_v35 = vadd.f32 %v5792_v46, %v5561_v41  ;;  %v5974_v33 = vadd.f32 %v5973_v52, %v14036_v0 }
0x358d   :  { %v13962_v4 = vadd.f32 %v5980_v19, %v12629_v32 }
0x358e   :  { %12327 = vtanh.f32 %v5793_v35  ;;  %v14040_v41 = vrot.slane %v5974_v33, %v12614_v21 }
0x3590   :  { %v5991_v47 = vadd.f32 %v14040_v41, %v13962_v4 }
0x359b   :  { %v12328_v38 = vpop.eup %12327 }
0x359c   :  { %v5798_v13 = vadd.f32 %v12328_v38, %v5797_v48 }
0x359e   :  { %11632 = vmatmul.mubr.msk.f32.vlgmr.msra.gmra.mxu0 %vm49_vm0, %v5798_v13  ;;  %v5875_v50 = vadd.f32 %v5798_v13, %v13840_v1  ;;  %v5957_v1 = vrot.slane %v5953_v8, %v12957_v5  ;;  %v14062_v8 = vstv %s5966_s15 }
0x359f   :  { %11646 = vmatpush3.msra.mxu0 %v12639_v37  ;;  %11653 = vmatprep.mubr.msk.f32.mxu0 %vm12478_vm1, %v12477_v3 }
0x35a0   :  { %11647 = vmatprep.subr.mxu0 %v12477_v3  ;;  %11643 = vmatmul.mubr.msk.f32.vlgmr.msra.gmra.mxu1 %vm49_vm0, %v5875_v50 }
0x35a1   :  { %11648 = vmatpush3.msra.mxu0 %v12648_v40  ;;  %11657 = vmatpush3.msra.mxu1 %v12639_v37 }
0x35a2   :  { %11649 = vmatprep.subr.mxu0 %v12477_v3  ;;  %11658 = vmatprep.subr.mxu1 %v12477_v3 }
0x35a3   :  { %11650 = vmatpush3.msra.mxu0 %v12620_v26  ;;  %11659 = vmatpush3.msra.mxu1 %v12648_v40 }
0x35a4   :  { %11651 = vmatprep.subr.mxu0 %v12477_v3  ;;  %11660 = vmatprep.subr.mxu1 %v12477_v3 }
0x35a5   :  { %11652 = vmatpush3.msra.mxu0 %v12627_v31  ;;  %11661 = vmatpush3.msra.mxu1 %v12620_v26 }
0x35a6   :  { %11662 = vmatprep.subr.mxu1 %v12477_v3  ;;  %11667 = vmatprep.subr.mxu0 %v12477_v3 }
0x35a7   :  { %11663 = vmatpush3.msra.mxu1 %v12627_v31  ;;  %11664 = vmatprep.mubr.msk.f32.mxu1 %vm12478_vm1, %v12477_v3 }
0x35a8   :  { %11678 = vmatprep.subr.mxu1 %v12477_v3 }
0x365e   :  { %v5868_v44 = vpop.f32.mrf.mxu0 }
0x365f   :  { %v5872_v57 = vmul.f32 %v5868_v44, %v13718_v28 }
0x3660   :  { %v11633_v59 = vpop.f32.mrf.mxu0  ;;  %v5945_v61 = vpop.f32.mrf.mxu1 }
0x3661   :  { %v5873_v62 = vadd.f32 %v5872_v57, %v13857_v25  ;;  %v5949_v63 = vmul.f32 %v5945_v61, %v13718_v28  ;;  %v6313_v57 = vrot.slane %v14036_v0, %v12614_v21 }
0x3662   :  { %v11644_v56 = vpop.f32.mrf.mxu1 }
0x3663   :  { %v13965_v36 = vadd.f32 %v5873_v62, %v13725_v49  ;;  %v5950_v53 = vadd.f32 %v5949_v63, %v13626_v12  ;;  %v13992_v12 = vstv %s5965_s14  ;;  %v14069_v62 = vrot.slane %v5973_v52, %v12614_v21 }
0x3664   :  { %v5970_v49 = vmul.f32 %v13952_v51, %v13992_v12  ;;  %v5971_v25 = vmul.f32 %v13992_v12, %v12658_v42 }
0x3665   :  { %v5992_v6 = vadd.f32 %v13962_v4, %v13965_v36  ;;  %v13970_v17 = vadd.f32 %v5957_v1, %v5950_v53  ;;  %v6314_v1 = vadd.f32 %v6313_v57, %v13962_v4 }
0x3666   :  { %v5972_v34 = vadd.f32 %v5971_v25, %v5970_v49 }
0x3667   :  { %12329 = vtanh.f32 %v5992_v6  ;;  %5960 = vst.msk [vmem:[#allocation5 + $0x20] sm:$0xff] %vm49_vm0, %v13970_v17 }
0x3668   :  { %v13999_v24 = vrot.slane %v5972_v34, %v12614_v21 }
0x366a   :  { %v5986_v18 = vadd.f32 %v13999_v24, %v13962_v4  ;;  %v6315_v49 = vadd.f32 %v6314_v1, %v13999_v24 }
0x3674   :  { %v13974_v28 = vpop.eup %12329 }
0x3675   :  { %11654 = vmatmul.mubr.msk.f32.vlgmr.msra.gmra.mxu0 %vm49_vm0, %v13974_v28 }
0x3676   :  { %11668 = vmatpush3.msra.mxu0 %v12639_v37  ;;  %11675 = vmatprep.mubr.msk.f32.mxu0 %vm12478_vm1, %v12477_v3 }
0x3677   :  { %11669 = vmatprep.subr.mxu0 %v12477_v3 }
0x3678   :  { %11670 = vmatpush3.msra.mxu0 %v12648_v40 }
0x3679   :  { %11671 = vmatprep.subr.mxu0 %v12477_v3 }
0x367a   :  { %11672 = vmatpush3.msra.mxu0 %v12620_v26 }
0x367b   :  { %11673 = vmatprep.subr.mxu0 %v12477_v3 }
0x367c   :  { %11674 = vmatpush3.msra.mxu0 %v12627_v31 }
0x367d   :  { %11689 = vmatprep.subr.mxu0 %v12477_v3 }
0x3735   :  { %v6063_v30 = vpop.f32.mrf.mxu0 }
0x3736   :  { %v6067_v16 = vmul.f32 %v6063_v30, %v13992_v12 }
0x3737   :  { %v11655_v20 = vpop.f32.mrf.mxu0 }
0x3738   :  { %v6068_v22 = vadd.f32 %v6067_v16, %v13965_v36 }
0x373a   :  { %v6069_v9 = vadd.f32 %v6068_v22, %v5986_v18 }
0x373c   :  { %12331 = vtanh.f32 %v6069_v9 }
0x3749   :  { %v12332_v11 = vpop.eup %12331 }
0x374a   :  { %11665 = vmatmul.mubr.msk.f32.vlgmr.msra.gmra.mxu1 %vm49_vm0, %v12332_v11 }
0x374b   :  { %11679 = vmatpush3.msra.mxu1 %v12639_v37  ;;  %11686 = vmatprep.mubr.msk.f32.mxu1 %vm12478_vm1, %v12477_v3 }
0x374c   :  { %11680 = vmatprep.subr.mxu1 %v12477_v3 }
0x374d   :  { %11681 = vmatpush3.msra.mxu1 %v12648_v40 }
0x374e   :  { %11682 = vmatprep.subr.mxu1 %v12477_v3 }
0x374f   :  { %11683 = vmatpush3.msra.mxu1 %v12620_v26 }
0x3750   :  { %11684 = vmatprep.subr.mxu1 %v12477_v3 }
0x3751   :  { %11685 = vmatpush3.msra.mxu1 %v12627_v31 }
0x3752   :  { %11700 = vmatprep.subr.mxu1 %v12477_v3 }
0x380a   :  { %v6140_v54 = vpop.f32.mrf.mxu1 }
0x380b   :  { %v6144_v60 = vmul.f32 %v6140_v54, %v13992_v12 }
0x380c   :  { %v11666_v27 = vpop.f32.mrf.mxu1 }
0x380d   :  { %v6145_v29 = vadd.f32 %v6144_v60, %v13965_v36 }
0x380f   :  { %v6146_v2 = vadd.f32 %v6145_v29, %v5986_v18  ;;  %v6316_v29 = vadd.f32 %v6314_v1, %v14040_v41 }
0x3811   :  { %12333 = vtanh.f32 %v6146_v2 }
0x381e   :  { %v12334_v7 = vpop.eup %12333 }
0x381f   :  { %11676 = vmatmul.mubr.msk.f32.vlgmr.msra.gmra.mxu0 %vm49_vm0, %v12334_v7  ;;  %v6225_v13 = vadd.f32 %v12334_v7, %v12332_v11 }
0x3820   :  { %11690 = vmatpush3.msra.mxu0 %v12639_v37  ;;  %11697 = vmatprep.mubr.msk.f32.mxu0 %vm12478_vm1, %v12477_v3 }
0x3821   :  { %11691 = vmatprep.subr.mxu0 %v12477_v3  ;;  %v6226_v50 = vmul.f32 2.0, %v6225_v13 }
0x3822   :  { %11692 = vmatpush3.msra.mxu0 %v12648_v40 }
0x3823   :  { %11693 = vmatprep.subr.mxu0 %v12477_v3  ;;  %v6227_v15 = vadd.f32 %v13974_v28, %v6226_v50 }
0x3824   :  { %11694 = vmatpush3.msra.mxu0 %v12620_v26 }
0x3825   :  { %11695 = vmatprep.subr.mxu0 %v12477_v3 }
0x3826   :  { %11696 = vmatpush3.msra.mxu0 %v12627_v31 }
0x3827   :  { %11711 = vmatprep.subr.mxu0 %v12477_v3 }
0x38df   :  { %v6217_v46 = vpop.f32.mrf.mxu0 }
0x38e0   :  { %v6221_v35 = vmul.f32 %v6217_v46, %v14030_v43 }
0x38e1   :  { %v11677_v45 = vpop.f32.mrf.mxu0 }
0x38e2   :  { %v6222_v48 = vadd.f32 %v6221_v35, %v13965_v36 }
0x38e4   :  { %v6223_v38 = vadd.f32 %v6222_v48, %v5991_v47  ;;  %v6631_v47 = vmul.f32 2.0, %v14036_v0 }
0x38e6   :  { %12335 = vtanh.f32 %v6223_v38  ;;  %v6635_v13 = vrot.slane %v6631_v47, %v12614_v21 }
0x38f3   :  { %v12336_v23 = vpop.eup %12335 }
0x38f4   :  { %v14047_v14 = vadd.f32 %v12336_v23, %v6227_v15 }
0x38f6   :  { %11687 = vmatmul.mubr.msk.f32.vlgmr.msra.gmra.mxu1 %vm49_vm0, %v14047_v14 }
0x38f7   :  { %11701 = vmatpush3.msra.mxu1 %v12639_v37  ;;  %11708 = vmatprep.mubr.msk.f32.mxu1 %vm12478_vm1, %v12477_v3 }
0x38f8   :  { %11702 = vmatprep.subr.mxu1 %v12477_v3 }
0x38f9   :  { %11703 = vmatpush3.msra.mxu1 %v12648_v40 }
0x38fa   :  { %11704 = vmatprep.subr.mxu1 %v12477_v3 }
0x38fb   :  { %11705 = vmatpush3.msra.mxu1 %v12620_v26 }
0x38fc   :  { %11706 = vmatprep.subr.mxu1 %v12477_v3 }
0x38fd   :  { %11707 = vmatpush3.msra.mxu1 %v12627_v31 }
0x38fe   :  { %11722 = vmatprep.subr.mxu1 %v12477_v3 }
0x39b6   :  { %v6298_v44 = vpop.f32.mrf.mxu1 }
0x39b7   :  { %v6303_v19 = vmul.f32 %v14062_v8, %v6298_v44  ;;  %v6636_v44 = vadd.f32 %v6635_v13, %v13962_v4 }
0x39b8   :  { %v11688_v59 = vpop.f32.mrf.mxu1 }
0x39b9   :  { %v6304_v61 = vadd.f32 %v6303_v19, %v13965_v36 }
0x39bb   :  { %v14072_v63 = vadd.f32 %v14069_v62, %v6304_v61 }
0x39bd   :  { %v6317_v56 = vadd.f32 %v6314_v1, %v14072_v63  ;;  %v6637_v1 = vadd.f32 %v6636_v44, %v13999_v24 }
0x39bf   :  { %12337 = vtanh.f32 %v6317_v56 }
0x39cc   :  { %v12338_v53 = vpop.eup %12337 }
0x39cd   :  { %11698 = vmatmul.mubr.msk.f32.vlgmr.msra.gmra.mxu0 %vm49_vm0, %v12338_v53 }
0x39ce   :  { %11712 = vmatpush3.msra.mxu0 %v12639_v37  ;;  %11719 = vmatprep.mubr.msk.f32.mxu0 %vm12478_vm1, %v12477_v3 }
0x39cf   :  { %11713 = vmatprep.subr.mxu0 %v12477_v3 }
0x39d0   :  { %11714 = vmatpush3.msra.mxu0 %v12648_v40 }
0x39d1   :  { %11715 = vmatprep.subr.mxu0 %v12477_v3 }
0x39d2   :  { %11716 = vmatpush3.msra.mxu0 %v12620_v26 }
0x39d3   :  { %11717 = vmatprep.subr.mxu0 %v12477_v3 }
0x39d4   :  { %11718 = vmatpush3.msra.mxu0 %v12627_v31 }
0x39d5   :  { %11733 = vmatprep.subr.mxu0 %v12477_v3 }
0x3a8d   :  { %v6388_v36 = vpop.f32.mrf.mxu0 }
0x3a8e   :  { %v6392_v6 = vmul.f32 %v6388_v36, %v13992_v12 }
0x3a8f   :  { %v11699_v28 = vpop.f32.mrf.mxu0 }
0x3a90   :  { %v6393_v25 = vadd.f32 %v6392_v6, %v14072_v63 }
0x3a92   :  { %v6394_v34 = vadd.f32 %v6393_v25, %v6315_v49 }
0x3a94   :  { %12339 = vtanh.f32 %v6394_v34 }
0x3aa1   :  { %v12340_v30 = vpop.eup %12339 }
0x3aa2   :  { %11709 = vmatmul.mubr.msk.f32.vlgmr.msra.gmra.mxu1 %vm49_vm0, %v12340_v30 }
0x3aa3   :  { %11723 = vmatpush3.msra.mxu1 %v12639_v37  ;;  %11730 = vmatprep.mubr.msk.f32.mxu1 %vm12478_vm1, %v12477_v3 }
0x3aa4   :  { %11724 = vmatprep.subr.mxu1 %v12477_v3 }
0x3aa5   :  { %11725 = vmatpush3.msra.mxu1 %v12648_v40 }
0x3aa6   :  { %11726 = vmatprep.subr.mxu1 %v12477_v3 }
0x3aa7   :  { %11727 = vmatpush3.msra.mxu1 %v12620_v26 }
0x3aa8   :  { %11728 = vmatprep.subr.mxu1 %v12477_v3 }
0x3aa9   :  { %11729 = vmatpush3.msra.mxu1 %v12627_v31 }
0x3aaa   :  { %11744 = vmatprep.subr.mxu1 %v12477_v3 }
0x3b62   :  { %v6465_v16 = vpop.f32.mrf.mxu1 }
0x3b63   :  { %v6469_v20 = vmul.f32 %v6465_v16, %v13992_v12 }
0x3b64   :  { %v11710_v18 = vpop.f32.mrf.mxu1 }
0x3b65   :  { %v6470_v22 = vadd.f32 %v6469_v20, %v14072_v63 }
0x3b67   :  { %v6471_v9 = vadd.f32 %v6470_v22, %v6315_v49  ;;  %v6638_v22 = vadd.f32 %v6636_v44, %v14040_v41 }
0x3b69   :  { %12341 = vtanh.f32 %v6471_v9 }
0x3b76   :  { %v12342_v11 = vpop.eup %12341 }
0x3b77   :  { %11720 = vmatmul.mubr.msk.f32.vlgmr.msra.gmra.mxu0 %vm49_vm0, %v12342_v11  ;;  %v6550_v52 = vadd.f32 %v12342_v11, %v12340_v30 }
0x3b78   :  { %11734 = vmatpush3.msra.mxu0 %v12639_v37  ;;  %11741 = vmatprep.mubr.msk.f32.mxu0 %vm12478_vm1, %v12477_v3 }
0x3b79   :  { %11735 = vmatprep.subr.mxu0 %v12477_v3  ;;  %v6551_v33 = vmul.f32 2.0, %v6550_v52 }
0x3b7a   :  { %11736 = vmatpush3.msra.mxu0 %v12648_v40 }
0x3b7b   :  { %11737 = vmatprep.subr.mxu0 %v12477_v3  ;;  %v6552_v46 = vadd.f32 %v12338_v53, %v6551_v33 }
0x3b7c   :  { %11738 = vmatpush3.msra.mxu0 %v12620_v26 }
0x3b7d   :  { %11739 = vmatprep.subr.mxu0 %v12477_v3 }
0x3b7e   :  { %11740 = vmatpush3.msra.mxu0 %v12627_v31 }
0x3b7f   :  { %11755 = vmatprep.subr.mxu0 %v12477_v3 }
0x3c37   :  { %v6542_v54 = vpop.f32.mrf.mxu0 }
0x3c38   :  { %v6546_v60 = vmul.f32 %v6542_v54, %v14030_v43 }
0x3c39   :  { %v11721_v27 = vpop.f32.mrf.mxu0 }
0x3c3a   :  { %v6547_v2 = vadd.f32 %v6546_v60, %v14072_v63 }
0x3c3c   :  { %v6548_v7 = vadd.f32 %v6547_v2, %v6316_v29 }
0x3c3e   :  { %12343 = vtanh.f32 %v6548_v7 }
0x3c4b   :  { %v12344_v35 = vpop.eup %12343 }
0x3c4c   :  { %v14117_v45 = vadd.f32 %v12344_v35, %v6552_v46 }
0x3c4e   :  { %11731 = vmatmul.mubr.msk.f32.vlgmr.msra.gmra.mxu1 %vm49_vm0, %v14117_v45  ;;  %v6630_v2 = vadd.f32 %v14117_v45, %v14047_v14  ;;  %v6953_v14 = vmul.f32 3.0, %v14036_v0 }
0x3c4f   :  { %11745 = vmatpush3.msra.mxu1 %v12639_v37  ;;  %11752 = vmatprep.mubr.msk.f32.mxu1 %vm12478_vm1, %v12477_v3 }
0x3c50   :  { %11746 = vmatprep.subr.mxu1 %v12477_v3  ;;  %v6957_v35 = vrot.slane %v6953_v14, %v12614_v21 }
0x3c51   :  { %11747 = vmatpush3.msra.mxu1 %v12648_v40 }
0x3c52   :  { %11748 = vmatprep.subr.mxu1 %v12477_v3 }
0x3c53   :  { %11749 = vmatpush3.msra.mxu1 %v12620_v26 }
0x3c54   :  { %11750 = vmatprep.subr.mxu1 %v12477_v3 }
0x3c55   :  { %11751 = vmatpush3.msra.mxu1 %v12627_v31 }
0x3c56   :  { %11766 = vmatprep.subr.mxu1 %v12477_v3 }
0x3d0e   :  { %v6623_v48 = vpop.f32.mrf.mxu1 }
0x3d0f   :  { %v6627_v38 = vmul.f32 %v6623_v48, %v14062_v8 }
0x3d10   :  { %v11732_v50 = vpop.f32.mrf.mxu1 }
0x3d11   :  { %v6628_v15 = vadd.f32 %v6627_v38, %v14072_v63  ;;  %v6958_v38 = vadd.f32 %v6957_v35, %v13962_v4 }
0x3d13   :  { %v14136_v23 = vadd.f32 %v6628_v15, %v14069_v62 }
0x3d15   :  { %v6639_v19 = vadd.f32 %v6636_v44, %v14136_v23 }
0x3d17   :  { %12345 = vtanh.f32 %v6639_v19 }
0x3d24   :  { %v12346_v57 = vpop.eup %12345 }
0x3d25   :  { %11742 = vmatmul.mubr.msk.f32.vlgmr.msra.gmra.mxu0 %vm49_vm0, %v12346_v57 }
0x3d26   :  { %11756 = vmatpush3.msra.mxu0 %v12639_v37  ;;  %11763 = vmatprep.mubr.msk.f32.mxu0 %vm12478_vm1, %v12477_v3 }
0x3d27   :  { %11757 = vmatprep.subr.mxu0 %v12477_v3 }
0x3d28   :  { %11758 = vmatpush3.msra.mxu0 %v12648_v40 }
0x3d29   :  { %11759 = vmatprep.subr.mxu0 %v12477_v3 }
0x3d2a   :  { %11760 = vmatpush3.msra.mxu0 %v12620_v26 }
0x3d2b   :  { %11761 = vmatprep.subr.mxu0 %v12477_v3 }
0x3d2c   :  { %11762 = vmatpush3.msra.mxu0 %v12627_v31 }
0x3d2d   :  { %11777 = vmatprep.subr.mxu0 %v12477_v3 }
0x3de5   :  { %v6710_v59 = vpop.f32.mrf.mxu0 }
0x3de6   :  { %v6714_v61 = vmul.f32 %v6710_v59, %v13992_v12 }
0x3de7   :  { %v11743_v63 = vpop.f32.mrf.mxu0 }
0x3de8   :  { %v6715_v56 = vadd.f32 %v6714_v61, %v14136_v23 }
0x3dea   :  { %v6716_v53 = vadd.f32 %v6715_v56, %v6637_v1 }
0x3dec   :  { %12347 = vtanh.f32 %v6716_v53 }
0x3df9   :  { %v12348_v36 = vpop.eup %12347 }
0x3dfa   :  { %11753 = vmatmul.mubr.msk.f32.vlgmr.msra.gmra.mxu1 %vm49_vm0, %v12348_v36 }
0x3dfb   :  { %11767 = vmatpush3.msra.mxu1 %v12639_v37  ;;  %11774 = vmatprep.mubr.msk.f32.mxu1 %vm12478_vm1, %v12477_v3 }
0x3dfc   :  { %11768 = vmatprep.subr.mxu1 %v12477_v3 }
0x3dfd   :  { %11769 = vmatpush3.msra.mxu1 %v12648_v40 }
0x3dfe   :  { %11770 = vmatprep.subr.mxu1 %v12477_v3 }
0x3dff   :  { %11771 = vmatpush3.msra.mxu1 %v12620_v26 }
0x3e00   :  { %11772 = vmatprep.subr.mxu1 %v12477_v3 }
0x3e01   :  { %11773 = vmatpush3.msra.mxu1 %v12627_v31 }
0x3e02   :  { %11788 = vmatprep.subr.mxu1 %v12477_v3 }
0x3eba   :  { %v6787_v6 = vpop.f32.mrf.mxu1 }
0x3ebb   :  { %v6791_v28 = vmul.f32 %v6787_v6, %v13992_v12 }
0x3ebc   :  { %v11754_v49 = vpop.f32.mrf.mxu1 }
0x3ebd   :  { %v6792_v25 = vadd.f32 %v6791_v28, %v14136_v23 }
0x3ebf   :  { %v6793_v34 = vadd.f32 %v6792_v25, %v6637_v1 }
0x3ec1   :  { %12349 = vtanh.f32 %v6793_v34 }
0x3ece   :  { %v12350_v30 = vpop.eup %12349 }
0x3ecf   :  { %11764 = vmatmul.mubr.msk.f32.vlgmr.msra.gmra.mxu0 %vm49_vm0, %v12350_v30  ;;  %v6872_v54 = vadd.f32 %v12350_v30, %v12348_v36  ;;  %v6960_v36 = vadd.f32 %v6958_v38, %v14040_v41  ;;  %v7351_v41 = vstv %s7350_s17 }
0x3ed0   :  { %11778 = vmatpush3.msra.mxu0 %v12639_v37  ;;  %11785 = vmatprep.mubr.msk.f32.mxu0 %vm12478_vm1, %v12477_v3 }
0x3ed1   :  { %11779 = vmatprep.subr.mxu0 %v12477_v3  ;;  %v6873_v60 = vmul.f32 2.0, %v6872_v54 }
0x3ed2   :  { %11780 = vmatpush3.msra.mxu0 %v12648_v40 }
0x3ed3   :  { %11781 = vmatprep.subr.mxu0 %v12477_v3  ;;  %v6874_v27 = vadd.f32 %v12346_v57, %v6873_v60 }
0x3ed4   :  { %11782 = vmatpush3.msra.mxu0 %v12620_v26 }
0x3ed5   :  { %11783 = vmatprep.subr.mxu0 %v12477_v3 }
0x3ed6   :  { %11784 = vmatpush3.msra.mxu0 %v12627_v31 }
0x3ed7   :  { %11799 = vmatprep.subr.mxu0 %v12477_v3 }
0x3f8f   :  { %v6864_v16 = vpop.f32.mrf.mxu0 }
0x3f90   :  { %v6868_v20 = vmul.f32 %v6864_v16, %v14030_v43  ;;  %v7352_v16 = vmul.f32 %v13952_v51, %v7351_v41 }
0x3f91   :  { %v11765_v18 = vpop.f32.mrf.mxu0 }
0x3f92   :  { %v6869_v9 = vadd.f32 %v6868_v20, %v14136_v23 }
0x3f94   :  { %v6870_v11 = vadd.f32 %v6869_v9, %v6638_v22 }
0x3f96   :  { %12351 = vtanh.f32 %v6870_v11 }
0x3fa3   :  { %v12352_v29 = vpop.eup %12351 }
0x3fa4   :  { %v6875_v7 = vadd.f32 %v12352_v29, %v6874_v27  ;;  %v7356_v27 = vrot.slane %v7352_v16, %v12957_v5 }
0x3fa6   :  { %11775 = vmatmul.mubr.msk.f32.vlgmr.msra.gmra.mxu1 %vm49_vm0, %v6875_v7  ;;  %v14184_v52 = vadd.f32 %v6875_v7, %v6630_v2 }
0x3fa7   :  { %11789 = vmatpush3.msra.mxu1 %v12639_v37  ;;  %11796 = vmatprep.mubr.msk.f32.mxu1 %vm12478_vm1, %v12477_v3 }
0x3fa8   :  { %11790 = vmatprep.subr.mxu1 %v12477_v3 }
0x3fa9   :  { %11791 = vmatpush3.msra.mxu1 %v12648_v40 }
0x3faa   :  { %11792 = vmatprep.subr.mxu1 %v12477_v3 }
0x3fab   :  { %11793 = vmatpush3.msra.mxu1 %v12620_v26 }
0x3fac   :  { %11794 = vmatprep.subr.mxu1 %v12477_v3 }
0x3fad   :  { %11795 = vmatpush3.msra.mxu1 %v12627_v31 }
0x3fae   :  { %11810 = vmatprep.subr.mxu1 %v12477_v3 }
0x4066   :  { %v6945_v33 = vpop.f32.mrf.mxu1 }
0x4067   :  { %v6949_v46 = vmul.f32 %v6945_v33, %v14062_v8 }
0x4068   :  { %v11776_v45 = vpop.f32.mrf.mxu1 }
0x4069   :  { %v6950_v47 = vadd.f32 %v6949_v46, %v14136_v23  ;;  %v6959_v23 = vadd.f32 %v6958_v38, %v13999_v24 }
0x406b   :  { %v14201_v48 = vadd.f32 %v6950_v47, %v14069_v62 }
0x406d   :  { %v6961_v13 = vadd.f32 %v6958_v38, %v14201_v48 }
0x406f   :  { %12353 = vtanh.f32 %v6961_v13 }
0x407c   :  { %v12354_v50 = vpop.eup %12353 }
0x407d   :  { %11786 = vmatmul.mubr.msk.f32.vlgmr.msra.gmra.mxu0 %vm49_vm0, %v12354_v50 }
0x407e   :  { %11800 = vmatpush3.msra.mxu0 %v12639_v37  ;;  %11807 = vmatprep.mubr.msk.f32.mxu0 %vm12478_vm1, %v12477_v3 }
0x407f   :  { %11801 = vmatprep.subr.mxu0 %v12477_v3 }
0x4080   :  { %11802 = vmatpush3.msra.mxu0 %v12648_v40 }
0x4081   :  { %11803 = vmatprep.subr.mxu0 %v12477_v3 }
0x4082   :  { %11804 = vmatpush3.msra.mxu0 %v12620_v26 }
0x4083   :  { %11805 = vmatprep.subr.mxu0 %v12477_v3 }
0x4084   :  { %11806 = vmatpush3.msra.mxu0 %v12627_v31 }
0x4085   :  { %11821 = vmatprep.subr.mxu0 %v12477_v3 }
0x413d   :  { %v7032_v4 = vpop.f32.mrf.mxu0 }
0x413e   :  { %v7036_v0 = vmul.f32 %v7032_v4, %v13992_v12 }
0x413f   :  { %v11787_v15 = vpop.f32.mrf.mxu0 }
0x4140   :  { %v7037_v44 = vadd.f32 %v7036_v0, %v14201_v48 }
0x4142   :  { %v7038_v19 = vadd.f32 %v7037_v44, %v6959_v23 }
0x4144   :  { %12355 = vtanh.f32 %v7038_v19 }
0x4151   :  { %v12356_v57 = vpop.eup %12355 }
0x4152   :  { %11797 = vmatmul.mubr.msk.f32.vlgmr.msra.gmra.mxu1 %vm49_vm0, %v12356_v57 }
0x4153   :  { %11811 = vmatpush3.msra.mxu1 %v12639_v37  ;;  %11818 = vmatprep.mubr.msk.f32.mxu1 %vm12478_vm1, %v12477_v3 }
0x4154   :  { %11812 = vmatprep.subr.mxu1 %v12477_v3 }
0x4155   :  { %11813 = vmatpush3.msra.mxu1 %v12648_v40 }
0x4156   :  { %11814 = vmatprep.subr.mxu1 %v12477_v3 }
0x4157   :  { %11815 = vmatpush3.msra.mxu1 %v12620_v26 }
0x4158   :  { %11816 = vmatprep.subr.mxu1 %v12477_v3 }
0x4159   :  { %11817 = vmatpush3.msra.mxu1 %v12627_v31 }
0x415a   :  { %11832 = vmatprep.subr.mxu1 %v12477_v3 }
0x4212   :  { %v7109_v24 = vpop.f32.mrf.mxu1 }
0x4213   :  { %v7113_v59 = vmul.f32 %v7109_v24, %v13992_v12 }
0x4214   :  { %v11798_v61 = vpop.f32.mrf.mxu1 }
0x4215   :  { %v7114_v63 = vadd.f32 %v7113_v59, %v14201_v48  ;;  %v14349_v59 = vstv %s14308_s20 }
0x4216   :  { %v7372_v61 = vmul.f32 %v14349_v59, %v12658_v42 }
0x4217   :  { %v7115_v1 = vadd.f32 %v7114_v63, %v6959_v23  ;;  %v14355_v63 = vmul.f32 %v13952_v51, %v14349_v59 }
0x4219   :  { %12357 = vtanh.f32 %v7115_v1  ;;  %v7373_v1 = vadd.f32 %v7372_v61, %v14355_v63  ;;  %v7712_v41 = vrot.slane %v14355_v63, %v12614_v21 }
0x4226   :  { %v12358_v56 = vpop.eup %12357 }
0x4227   :  { %11808 = vmatmul.mubr.msk.f32.vlgmr.msra.gmra.mxu0 %vm49_vm0, %v12358_v56 }
0x4228   :  { %11822 = vmatpush3.msra.mxu0 %v13892_v55  ;;  %11829 = vmatprep.mubr.msk.f32.mxu0 %vm12478_vm1, %v12477_v3 }
0x4229   :  { %11823 = vmatprep.subr.mxu0 %v12477_v3 }
0x422a   :  { %11824 = vmatpush3.msra.mxu0 %v13901_v39  ;;  %v7194_v39 = vadd.f32 %v12358_v56, %v12356_v57  ;;  %v14359_v56 = vrot.slane %v7373_v1, %v12614_v21 }
0x422b   :  { %11825 = vmatprep.subr.mxu0 %v12477_v3 }
0x422c   :  { %11826 = vmatpush3.msra.mxu0 %v13908_v58  ;;  %v7195_v49 = vmul.f32 2.0, %v7194_v39 }
0x422d   :  { %11827 = vmatprep.subr.mxu0 %v12477_v3 }
0x422e   :  { %11828 = vmatpush3.msra.mxu0 %v13915_v10  ;;  %v7196_v25 = vadd.f32 %v12354_v50, %v7195_v49 }
0x422f   :  { %11843 = vmatprep.subr.mxu0 %v12477_v3 }
0x42e7   :  { %v7186_v12 = vpop.f32.mrf.mxu0 }
0x42e8   :  { %v7190_v55 = vmul.f32 %v7186_v12, %v14030_v43  ;;  %v7374_v43 = vstv %s14269_s16 }
0x42e9   :  { %v11809_v53 = vpop.f32.mrf.mxu0  ;;  %v7375_v30 = vmul.f32 %v13952_v51, %v7374_v43 }
0x42ea   :  { %v7191_v6 = vadd.f32 %v7190_v55, %v14201_v48 }
0x42eb   :  { %v7379_v18 = vrot.slane %v7375_v30, %v12614_v21 }
0x42ec   :  { %v7192_v28 = vadd.f32 %v7191_v6, %v6960_v36 }
0x42ed   :  { %v14281_v2 = vadd.f32 %v7379_v18, %v12629_v32 }
0x42ee   :  { %12359 = vtanh.f32 %v7192_v28 }
0x42ef   :  { %v7390_v36 = vadd.f32 %v14359_v56, %v14281_v2 }
0x42fb   :  { %v12360_v58 = vpop.eup %12359 }
0x42fc   :  { %v7197_v34 = vadd.f32 %v12360_v58, %v7196_v25 }
0x42fe   :  { %11819 = vmatmul.mubr.msk.f32.vlgmr.msra.gmra.mxu1 %vm49_vm0, %v7197_v34  ;;  %v7274_v10 = vadd.f32 %v7197_v34, %v14184_v52  ;;  %v14381_v34 = vstv %s7365_s22 }
0x42ff   :  { %11833 = vmatpush3.msra.mxu1 %v12639_v37  ;;  %11840 = vmatprep.mubr.msk.f32.mxu1 %vm12478_vm1, %v12477_v3 }
0x4300   :  { %11834 = vmatprep.subr.mxu1 %v12477_v3  ;;  %11830 = vmatmul.mubr.msk.f32.vlgmr.msra.gmra.mxu0 %vm49_vm0, %v7274_v10 }
0x4301   :  { %11835 = vmatpush3.msra.mxu1 %v12648_v40  ;;  %11844 = vmatpush3.msra.mxu0 %v12639_v37 }
0x4302   :  { %11836 = vmatprep.subr.mxu1 %v12477_v3  ;;  %11845 = vmatprep.subr.mxu0 %v12477_v3 }
0x4303   :  { %11837 = vmatpush3.msra.mxu1 %v12620_v26  ;;  %11846 = vmatpush3.msra.mxu0 %v12648_v40 }
0x4304   :  { %11838 = vmatprep.subr.mxu1 %v12477_v3  ;;  %11847 = vmatprep.subr.mxu0 %v12477_v3 }
0x4305   :  { %11839 = vmatpush3.msra.mxu1 %v12627_v31  ;;  %11848 = vmatpush3.msra.mxu0 %v12620_v26 }
0x4306   :  { %11849 = vmatprep.subr.mxu0 %v12477_v3  ;;  %11854 = vmatprep.subr.mxu1 %v12477_v3 }
0x4307   :  { %11850 = vmatpush3.msra.mxu0 %v12627_v31  ;;  %11851 = vmatprep.mubr.msk.f32.mxu0 %vm12478_vm1, %v12477_v3 }
0x4308   :  { %11865 = vmatprep.subr.mxu0 %v12477_v3 }
0x43be   :  { %v7267_v20 = vpop.f32.mrf.mxu1 }
0x43bf   :  { %v7271_v22 = vmul.f32 %v7267_v20, %v14062_v8  ;;  %v14388_v20 = vrot.slane %v7372_v61, %v12614_v21  ;;  %v8030_v61 = vmul.f32 2.0, %v14355_v63 }
0x43c0   :  { %v11820_v9 = vpop.f32.mrf.mxu1  ;;  %v7344_v11 = vpop.f32.mrf.mxu0 }
0x43c1   :  { %v7272_v54 = vadd.f32 %v7271_v22, %v14201_v48  ;;  %v7348_v60 = vmul.f32 %v7344_v11, %v14062_v8  ;;  %v7713_v22 = vadd.f32 %v7712_v41, %v14281_v2 }
0x43c2   :  { %v11831_v29 = vpop.f32.mrf.mxu0 }
0x43c3   :  { %v14284_v7 = vadd.f32 %v7272_v54, %v14069_v62  ;;  %v7349_v52 = vadd.f32 %v7348_v60, %v13970_v17  ;;  %v14311_v17 = vstv %s7364_s21 }
0x43c4   :  { %v7369_v62 = vmul.f32 %v13952_v51, %v14311_v17  ;;  %v7370_v46 = vmul.f32 %v14311_v17, %v12658_v42 }
0x43c5   :  { %v7391_v14 = vadd.f32 %v14281_v2, %v14284_v7  ;;  %v14289_v33 = vadd.f32 %v7356_v27, %v7349_v52 }
0x43c6   :  { %v7371_v35 = vadd.f32 %v7370_v46, %v7369_v62 }
0x43c7   :  { %12361 = vtanh.f32 %v7391_v14  ;;  %7359 = vst.msk [vmem:[#allocation5 + $0x28] sm:$0xff] %vm49_vm0, %v14289_v33 }
0x43c8   :  { %v14318_v45 = vrot.slane %v7371_v35, %v12614_v21 }
0x43ca   :  { %v7385_v13 = vadd.f32 %v14318_v45, %v14281_v2  ;;  %v7714_v29 = vadd.f32 %v7713_v22, %v14318_v45 }
0x43d4   :  { %v14293_v8 = vpop.eup %12361 }
0x43d5   :  { %11841 = vmatmul.mubr.msk.f32.vlgmr.msra.gmra.mxu1 %vm49_vm0, %v14293_v8 }
0x43d6   :  { %11855 = vmatpush3.msra.mxu1 %v12639_v37  ;;  %11862 = vmatprep.mubr.msk.f32.mxu1 %vm12478_vm1, %v12477_v3 }
0x43d7   :  { %11856 = vmatprep.subr.mxu1 %v12477_v3 }
0x43d8   :  { %11857 = vmatpush3.msra.mxu1 %v12648_v40 }
0x43d9   :  { %11858 = vmatprep.subr.mxu1 %v12477_v3 }
0x43da   :  { %11859 = vmatpush3.msra.mxu1 %v12620_v26 }
0x43db   :  { %11860 = vmatprep.subr.mxu1 %v12477_v3 }
0x43dc   :  { %11861 = vmatpush3.msra.mxu1 %v12627_v31 }
0x43dd   :  { %11876 = vmatprep.subr.mxu1 %v12477_v3 }
0x4495   :  { %v7462_v47 = vpop.f32.mrf.mxu1 }
0x4496   :  { %v7466_v48 = vmul.f32 %v7462_v47, %v14311_v17 }
0x4497   :  { %v11842_v38 = vpop.f32.mrf.mxu1 }
0x4498   :  { %v7467_v50 = vadd.f32 %v7466_v48, %v14284_v7 }
0x449a   :  { %v7468_v4 = vadd.f32 %v7467_v50, %v7385_v13 }
0x449c   :  { %12363 = vtanh.f32 %v7468_v4  ;;  %v7715_v4 = vadd.f32 %v7713_v22, %v14359_v56 }
0x44a9   :  { %v12364_v0 = vpop.eup %12363 }
0x44aa   :  { %11852 = vmatmul.mubr.msk.f32.vlgmr.msra.gmra.mxu0 %vm49_vm0, %v12364_v0 }
0x44ab   :  { %11866 = vmatpush3.msra.mxu0 %v12639_v37  ;;  %11873 = vmatprep.mubr.msk.f32.mxu0 %vm12478_vm1, %v12477_v3 }
0x44ac   :  { %11867 = vmatprep.subr.mxu0 %v12477_v3 }
0x44ad   :  { %11868 = vmatpush3.msra.mxu0 %v12648_v40 }
0x44ae   :  { %11869 = vmatprep.subr.mxu0 %v12477_v3 }
0x44af   :  { %11870 = vmatpush3.msra.mxu0 %v12620_v26 }
0x44b0   :  { %11871 = vmatprep.subr.mxu0 %v12477_v3 }
0x44b1   :  { %11872 = vmatpush3.msra.mxu0 %v12627_v31 }
0x44b2   :  { %11887 = vmatprep.subr.mxu0 %v12477_v3 }
0x456a   :  { %v7539_v15 = vpop.f32.mrf.mxu0 }
0x456b   :  { %v7543_v23 = vmul.f32 %v7539_v15, %v14311_v17 }
0x456c   :  { %v11853_v44 = vpop.f32.mrf.mxu0 }
0x456d   :  { %v7544_v19 = vadd.f32 %v7543_v23, %v14284_v7 }
0x456f   :  { %v7545_v57 = vadd.f32 %v7544_v19, %v7385_v13 }
0x4571   :  { %12365 = vtanh.f32 %v7545_v57 }
0x457e   :  { %v12366_v24 = vpop.eup %12365 }
0x457f   :  { %11863 = vmatmul.mubr.msk.f32.vlgmr.msra.gmra.mxu1 %vm49_vm0, %v12366_v24  ;;  %v7624_v39 = vadd.f32 %v12366_v24, %v12364_v0 }
0x4580   :  { %11877 = vmatpush3.msra.mxu1 %v12639_v37  ;;  %11884 = vmatprep.mubr.msk.f32.mxu1 %vm12478_vm1, %v12477_v3 }
0x4581   :  { %11878 = vmatprep.subr.mxu1 %v12477_v3  ;;  %v7625_v51 = vmul.f32 2.0, %v7624_v39 }
0x4582   :  { %11879 = vmatpush3.msra.mxu1 %v12648_v40 }
0x4583   :  { %11880 = vmatprep.subr.mxu1 %v12477_v3  ;;  %v7626_v49 = vadd.f32 %v14293_v8, %v7625_v51 }
0x4584   :  { %11881 = vmatpush3.msra.mxu1 %v12620_v26 }
0x4585   :  { %11882 = vmatprep.subr.mxu1 %v12477_v3 }
0x4586   :  { %11883 = vmatpush3.msra.mxu1 %v12627_v31 }
0x4587   :  { %11898 = vmatprep.subr.mxu1 %v12477_v3 }
0x463f   :  { %v7616_v12 = vpop.f32.mrf.mxu1 }
0x4640   :  { %v7620_v55 = vmul.f32 %v7616_v12, %v14349_v59 }
0x4641   :  { %v11864_v53 = vpop.f32.mrf.mxu1 }
0x4642   :  { %v7621_v6 = vadd.f32 %v7620_v55, %v14284_v7  ;;  %v8034_v55 = vrot.slane %v8030_v61, %v12614_v21 }
0x4644   :  { %v7622_v28 = vadd.f32 %v7621_v6, %v7390_v36 }
0x4646   :  { %12367 = vtanh.f32 %v7622_v28  ;;  %v8035_v28 = vadd.f32 %v8034_v55, %v14281_v2 }
0x4653   :  { %v12368_v25 = vpop.eup %12367 }
0x4654   :  { %v14366_v58 = vadd.f32 %v12368_v25, %v7626_v49 }
0x4656   :  { %11874 = vmatmul.mubr.msk.f32.vlgmr.msra.gmra.mxu0 %vm49_vm0, %v14366_v58 }
0x4657   :  { %11888 = vmatpush3.msra.mxu0 %v12639_v37  ;;  %11895 = vmatprep.mubr.msk.f32.mxu0 %vm12478_vm1, %v12477_v3 }
0x4658   :  { %11889 = vmatprep.subr.mxu0 %v12477_v3 }
0x4659   :  { %11890 = vmatpush3.msra.mxu0 %v12648_v40 }
0x465a   :  { %11891 = vmatprep.subr.mxu0 %v12477_v3 }
0x465b   :  { %11892 = vmatpush3.msra.mxu0 %v12620_v26 }
0x465c   :  { %11893 = vmatprep.subr.mxu0 %v12477_v3 }
0x465d   :  { %11894 = vmatpush3.msra.mxu0 %v12627_v31 }
0x465e   :  { %11909 = vmatprep.subr.mxu0 %v12477_v3 }
0x4716   :  { %v7697_v10 = vpop.f32.mrf.mxu0 }
0x4717   :  { %v7702_v43 = vmul.f32 %v14381_v34, %v7697_v10 }
0x4718   :  { %v11875_v30 = vpop.f32.mrf.mxu0 }
0x4719   :  { %v7703_v16 = vadd.f32 %v7702_v43, %v14284_v7  ;;  %v8036_v43 = vadd.f32 %v8035_v28, %v14318_v45 }
0x471b   :  { %v14391_v18 = vadd.f32 %v14388_v20, %v7703_v16 }
0x471d   :  { %v7716_v9 = vadd.f32 %v7713_v22, %v14391_v18 }
0x471f   :  { %12369 = vtanh.f32 %v7716_v9 }
0x472c   :  { %v12370_v11 = vpop.eup %12369 }
0x472d   :  { %11885 = vmatmul.mubr.msk.f32.vlgmr.msra.gmra.mxu1 %vm49_vm0, %v12370_v11 }
0x472e   :  { %11899 = vmatpush3.msra.mxu1 %v12639_v37  ;;  %11906 = vmatprep.mubr.msk.f32.mxu1 %vm12478_vm1, %v12477_v3 }
0x472f   :  { %11900 = vmatprep.subr.mxu1 %v12477_v3 }
0x4730   :  { %11901 = vmatpush3.msra.mxu1 %v12648_v40 }
0x4731   :  { %11902 = vmatprep.subr.mxu1 %v12477_v3 }
0x4732   :  { %11903 = vmatpush3.msra.mxu1 %v12620_v26 }
0x4733   :  { %11904 = vmatprep.subr.mxu1 %v12477_v3 }
0x4734   :  { %11905 = vmatpush3.msra.mxu1 %v12627_v31 }
0x4735   :  { %11920 = vmatprep.subr.mxu1 %v12477_v3 }
0x47ed   :  { %v7787_v54 = vpop.f32.mrf.mxu1 }
0x47ee   :  { %v7791_v60 = vmul.f32 %v7787_v54, %v14311_v17 }
0x47ef   :  { %v11886_v27 = vpop.f32.mrf.mxu1 }
0x47f0   :  { %v7792_v7 = vadd.f32 %v7791_v60, %v14391_v18 }
0x47f2   :  { %v7793_v52 = vadd.f32 %v7792_v7, %v7714_v29 }
0x47f4   :  { %12371 = vtanh.f32 %v7793_v52  ;;  %v8037_v52 = vadd.f32 %v8035_v28, %v14359_v56 }
0x4801   :  { %v12372_v14 = vpop.eup %12371 }
0x4802   :  { %11896 = vmatmul.mubr.msk.f32.vlgmr.msra.gmra.mxu0 %vm49_vm0, %v12372_v14 }
0x4803   :  { %11910 = vmatpush3.msra.mxu0 %v12639_v37  ;;  %11917 = vmatprep.mubr.msk.f32.mxu0 %vm12478_vm1, %v12477_v3 }
0x4804   :  { %11911 = vmatprep.subr.mxu0 %v12477_v3 }
0x4805   :  { %11912 = vmatpush3.msra.mxu0 %v12648_v40 }
0x4806   :  { %11913 = vmatprep.subr.mxu0 %v12477_v3 }
0x4807   :  { %11914 = vmatpush3.msra.mxu0 %v12620_v26 }
0x4808   :  { %11915 = vmatprep.subr.mxu0 %v12477_v3 }
0x4809   :  { %11916 = vmatpush3.msra.mxu0 %v12627_v31 }
0x480a   :  { %11931 = vmatprep.subr.mxu0 %v12477_v3 }
0x48c2   :  { %v7864_v8 = vpop.f32.mrf.mxu0 }
0x48c3   :  { %v7868_v62 = vmul.f32 %v7864_v8, %v14311_v17 }
0x48c4   :  { %v11897_v46 = vpop.f32.mrf.mxu0 }
0x48c5   :  { %v7869_v35 = vadd.f32 %v7868_v62, %v14391_v18 }
0x48c7   :  { %v7870_v47 = vadd.f32 %v7869_v35, %v7714_v29 }
0x48c9   :  { %12373 = vtanh.f32 %v7870_v47 }
0x48d6   :  { %v12374_v48 = vpop.eup %12373 }
0x48d7   :  { %11907 = vmatmul.mubr.msk.f32.vlgmr.msra.gmra.mxu1 %vm49_vm0, %v12374_v48  ;;  %v7949_v23 = vadd.f32 %v12374_v48, %v12372_v14 }
0x48d8   :  { %11921 = vmatpush3.msra.mxu1 %v12639_v37  ;;  %11928 = vmatprep.mubr.msk.f32.mxu1 %vm12478_vm1, %v12477_v3 }
0x48d9   :  { %11922 = vmatprep.subr.mxu1 %v12477_v3  ;;  %v7950_v44 = vmul.f32 2.0, %v7949_v23 }
0x48da   :  { %11923 = vmatpush3.msra.mxu1 %v12648_v40 }
0x48db   :  { %11924 = vmatprep.subr.mxu1 %v12477_v3  ;;  %v7951_v19 = vadd.f32 %v12370_v11, %v7950_v44 }
0x48dc   :  { %11925 = vmatpush3.msra.mxu1 %v12620_v26 }
0x48dd   :  { %11926 = vmatprep.subr.mxu1 %v12477_v3 }
0x48de   :  { %11927 = vmatpush3.msra.mxu1 %v12627_v31 }
0x48df   :  { %11942 = vmatprep.subr.mxu1 %v12477_v3 }
0x4997   :  { %v7941_v38 = vpop.f32.mrf.mxu1 }
0x4998   :  { %v7945_v13 = vmul.f32 %v7941_v38, %v14349_v59 }
0x4999   :  { %v11908_v50 = vpop.f32.mrf.mxu1 }
0x499a   :  { %v7946_v0 = vadd.f32 %v7945_v13, %v14391_v18 }
0x499c   :  { %v7947_v15 = vadd.f32 %v7946_v0, %v7715_v4 }
0x499e   :  { %12375 = vtanh.f32 %v7947_v15 }
0x49ab   :  { %v12376_v57 = vpop.eup %12375 }
0x49ac   :  { %v14436_v24 = vadd.f32 %v12376_v57, %v7951_v19 }
0x49ae   :  { %11918 = vmatmul.mubr.msk.f32.vlgmr.msra.gmra.mxu0 %vm49_vm0, %v14436_v24  ;;  %v8029_v48 = vadd.f32 %v14436_v24, %v14366_v58  ;;  %v8352_v58 = vmul.f32 3.0, %v14355_v63 }
0x49af   :  { %11932 = vmatpush3.msra.mxu0 %v12639_v37  ;;  %11939 = vmatprep.mubr.msk.f32.mxu0 %vm12478_vm1, %v12477_v3 }
0x49b0   :  { %11933 = vmatprep.subr.mxu0 %v12477_v3  ;;  %v8356_v0 = vrot.slane %v8352_v58, %v12614_v21 }
0x49b1   :  { %11934 = vmatpush3.msra.mxu0 %v12648_v40 }
0x49b2   :  { %11935 = vmatprep.subr.mxu0 %v12477_v3  ;;  %v8357_v19 = vadd.f32 %v8356_v0, %v14281_v2 }
0x49b3   :  { %11936 = vmatpush3.msra.mxu0 %v12620_v26 }
0x49b4   :  { %11937 = vmatprep.subr.mxu0 %v12477_v3 }
0x49b5   :  { %11938 = vmatpush3.msra.mxu0 %v12627_v31 }
0x49b6   :  { %11953 = vmatprep.subr.mxu0 %v12477_v3 }
0x4a6e   :  { %v8022_v1 = vpop.f32.mrf.mxu0 }
0x4a6f   :  { %v8026_v12 = vmul.f32 %v8022_v1, %v14381_v34  ;;  %v8358_v1 = vadd.f32 %v8357_v19, %v14318_v45 }
0x4a70   :  { %v11919_v53 = vpop.f32.mrf.mxu0 }
0x4a71   :  { %v8027_v36 = vadd.f32 %v8026_v12, %v14391_v18 }
0x4a73   :  { %v14455_v6 = vadd.f32 %v8027_v36, %v14388_v20 }
0x4a75   :  { %v8038_v39 = vadd.f32 %v8035_v28, %v14455_v6 }
0x4a77   :  { %12377 = vtanh.f32 %v8038_v39 }
0x4a84   :  { %v12378_v51 = vpop.eup %12377 }
0x4a85   :  { %11929 = vmatmul.mubr.msk.f32.vlgmr.msra.gmra.mxu1 %vm49_vm0, %v12378_v51 }
0x4a86   :  { %11943 = vmatpush3.msra.mxu1 %v12639_v37  ;;  %11950 = vmatprep.mubr.msk.f32.mxu1 %vm12478_vm1, %v12477_v3 }
0x4a87   :  { %11944 = vmatprep.subr.mxu1 %v12477_v3 }
0x4a88   :  { %11945 = vmatpush3.msra.mxu1 %v12648_v40 }
0x4a89   :  { %11946 = vmatprep.subr.mxu1 %v12477_v3 }
0x4a8a   :  { %11947 = vmatpush3.msra.mxu1 %v12620_v26 }
0x4a8b   :  { %11948 = vmatprep.subr.mxu1 %v12477_v3 }
0x4a8c   :  { %11949 = vmatpush3.msra.mxu1 %v12627_v31 }
0x4a8d   :  { %11964 = vmatprep.subr.mxu1 %v12477_v3 }
0x4b45   :  { %v8109_v49 = vpop.f32.mrf.mxu1 }
0x4b46   :  { %v8113_v25 = vmul.f32 %v8109_v49, %v14311_v17  ;;  %v14555_v49 = vld [vmem:[%s14904_s2 + $0x58] sm:$0xff] }
0x4b47   :  { %v11930_v10 = vpop.f32.mrf.mxu1 }
0x4b48   :  { %v8114_v41 = vadd.f32 %v8113_v25, %v14455_v6  ;;  %v14571_v25 = vld [vmem:[%s14904_s2 + $0x48] sm:$0xff]  ;;  %v14578_v10 = vld [vmem:[%s14904_s2 + $0x40] sm:$0xff] }
0x4b4a   :  { %v8115_v30 = vadd.f32 %v8114_v41, %v8036_v43 }
0x4b4c   :  { %12379 = vtanh.f32 %v8115_v30 }
0x4b59   :  { %v12380_v16 = vpop.eup %12379 }
0x4b5a   :  { %11940 = vmatmul.mubr.msk.f32.vlgmr.msra.gmra.mxu0 %vm49_vm0, %v12380_v16 }
0x4b5b   :  { %11954 = vmatpush3.msra.mxu0 %v12639_v37  ;;  %11961 = vmatprep.mubr.msk.f32.mxu0 %vm12478_vm1, %v12477_v3 }
0x4b5c   :  { %11955 = vmatprep.subr.mxu0 %v12477_v3 }
0x4b5d   :  { %11956 = vmatpush3.msra.mxu0 %v12648_v40 }
0x4b5e   :  { %11957 = vmatprep.subr.mxu0 %v12477_v3 }
0x4b5f   :  { %11958 = vmatpush3.msra.mxu0 %v12620_v26 }
0x4b60   :  { %11959 = vmatprep.subr.mxu0 %v12477_v3 }
0x4b61   :  { %11960 = vmatpush3.msra.mxu0 %v12627_v31 }
0x4b62   :  { %11975 = vmatprep.subr.mxu0 %v12477_v3 }
0x4c1a   :  { %v8186_v18 = vpop.f32.mrf.mxu0 }
0x4c1b   :  { %v8190_v22 = vmul.f32 %v8186_v18, %v14311_v17 }
0x4c1c   :  { %v11941_v9 = vpop.f32.mrf.mxu0 }
0x4c1d   :  { %v8191_v11 = vadd.f32 %v8190_v22, %v14455_v6 }
0x4c1f   :  { %v8192_v54 = vadd.f32 %v8191_v11, %v8036_v43 }
0x4c21   :  { %12381 = vtanh.f32 %v8192_v54 }
0x4c2e   :  { %v12382_v60 = vpop.eup %12381 }
0x4c2f   :  { %11951 = vmatmul.mubr.msk.f32.vlgmr.msra.gmra.mxu1 %vm49_vm0, %v12382_v60  ;;  %v8271_v62 = vadd.f32 %v12382_v60, %v12380_v16  ;;  %v8359_v16 = vadd.f32 %v8357_v19, %v14359_v56  ;;  %v8750_v56 = vstv %s8749_s30 }
0x4c30   :  { %11965 = vmatpush3.msra.mxu1 %v12639_v37  ;;  %11972 = vmatprep.mubr.msk.f32.mxu1 %vm12478_vm1, %v12477_v3 }
0x4c31   :  { %11966 = vmatprep.subr.mxu1 %v12477_v3  ;;  %v8272_v46 = vmul.f32 2.0, %v8271_v62 }
0x4c32   :  { %11967 = vmatpush3.msra.mxu1 %v12648_v40 }
0x4c33   :  { %11968 = vmatprep.subr.mxu1 %v12477_v3  ;;  %v8273_v35 = vadd.f32 %v12378_v51, %v8272_v46 }
0x4c34   :  { %11969 = vmatpush3.msra.mxu1 %v12620_v26 }
0x4c35   :  { %11970 = vmatprep.subr.mxu1 %v12477_v3 }
0x4c36   :  { %11971 = vmatpush3.msra.mxu1 %v12627_v31 }
0x4c37   :  { %11986 = vmatprep.subr.mxu1 %v12477_v3 }
0x4cef   :  { %v8263_v27 = vpop.f32.mrf.mxu1 }
0x4cf0   :  { %v8267_v29 = vmul.f32 %v8263_v27, %v14349_v59 }
0x4cf1   :  { %v11952_v7 = vpop.f32.mrf.mxu1 }
0x4cf2   :  { %v8268_v14 = vadd.f32 %v8267_v29, %v14455_v6  ;;  %v14615_v7 = vld [vmem:[%s14905_s3] sm:$0xff]  ;;  %s10220_s3 = sld [smem:[#allocation2 + $0x7]] }
0x4cf4   :  { %v8269_v8 = vadd.f32 %v8268_v14, %v8037_v52  ;;  %v8751_v14 = vmul.f32 %v14615_v7, %v8750_v56 }
0x4cf6   :  { %12383 = vtanh.f32 %v8269_v8 }
0x4d03   :  { %v12384_v47 = vpop.eup %12383 }
0x4d04   :  { %v8274_v38 = vadd.f32 %v12384_v47, %v8273_v35 }
0x4d06   :  { %11962 = vmatmul.mubr.msk.f32.vlgmr.msra.gmra.mxu0 %vm49_vm0, %v8274_v38  ;;  %v14503_v13 = vadd.f32 %v8274_v38, %v8029_v48 }
0x4d07   :  { %11976 = vmatpush3.msra.mxu0 %v12639_v37  ;;  %11983 = vmatprep.mubr.msk.f32.mxu0 %vm12478_vm1, %v12477_v3 }
0x4d08   :  { %11977 = vmatprep.subr.mxu0 %v12477_v3 }
0x4d09   :  { %11978 = vmatpush3.msra.mxu0 %v12648_v40 }
0x4d0a   :  { %11979 = vmatprep.subr.mxu0 %v12477_v3 }
0x4d0b   :  { %11980 = vmatpush3.msra.mxu0 %v12620_v26 }
0x4d0c   :  { %11981 = vmatprep.subr.mxu0 %v12477_v3 }
0x4d0d   :  { %11982 = vmatpush3.msra.mxu0 %v12627_v31 }
0x4d0e   :  { %11997 = vmatprep.subr.mxu0 %v12477_v3 }
0x4dc6   :  { %v8344_v50 = vpop.f32.mrf.mxu0 }
0x4dc7   :  { %v8348_v4 = vmul.f32 %v8344_v50, %v14381_v34 }
0x4dc8   :  { %v11963_v15 = vpop.f32.mrf.mxu0 }
0x4dc9   :  { %v8349_v23 = vadd.f32 %v8348_v4, %v14455_v6 }
0x4dcb   :  { %v14520_v44 = vadd.f32 %v8349_v23, %v14388_v20 }
0x4dcd   :  { %v8360_v57 = vadd.f32 %v8357_v19, %v14520_v44 }
0x4dcf   :  { %12385 = vtanh.f32 %v8360_v57 }
0x4ddc   :  { %v12386_v24 = vpop.eup %12385 }
0x4ddd   :  { %11973 = vmatmul.mubr.msk.f32.vlgmr.msra.gmra.mxu1 %vm49_vm0, %v12386_v24 }
0x4dde   :  { %11987 = vmatpush3.msra.mxu1 %v12639_v37  ;;  %11994 = vmatprep.mubr.msk.f32.mxu1 %vm12478_vm1, %v12477_v3 }
0x4ddf   :  { %11988 = vmatprep.subr.mxu1 %v12477_v3 }
0x4de0   :  { %11989 = vmatpush3.msra.mxu1 %v12648_v40 }
0x4de1   :  { %11990 = vmatprep.subr.mxu1 %v12477_v3 }
0x4de2   :  { %11991 = vmatpush3.msra.mxu1 %v12620_v26 }
0x4de3   :  { %11992 = vmatprep.subr.mxu1 %v12477_v3 }
0x4de4   :  { %11993 = vmatpush3.msra.mxu1 %v12627_v31 }
0x4de5   :  { %12008 = vmatprep.subr.mxu1 %v12477_v3 }
0x4e9d   :  { %v8431_v2 = vpop.f32.mrf.mxu1 }
0x4e9e   :  { %v8435_v63 = vmul.f32 %v8431_v2, %v14311_v17 }
0x4e9f   :  { %v11974_v61 = vpop.f32.mrf.mxu1 }
0x4ea0   :  { %v8436_v12 = vadd.f32 %v8435_v63, %v14520_v44 }
0x4ea2   :  { %v8437_v55 = vadd.f32 %v8436_v12, %v8358_v1 }
0x4ea4   :  { %12387 = vtanh.f32 %v8437_v55 }
0x4eb1   :  { %v12388_v53 = vpop.eup %12387 }
0x4eb2   :  { %11984 = vmatmul.mubr.msk.f32.vlgmr.msra.gmra.mxu0 %vm49_vm0, %v12388_v53 }
0x4eb3   :  { %11998 = vmatpush3.msra.mxu0 %v12639_v37  ;;  %12005 = vmatprep.mubr.msk.f32.mxu0 %vm12478_vm1, %v12477_v3 }
0x4eb4   :  { %11999 = vmatprep.subr.mxu0 %v12477_v3 }
0x4eb5   :  { %12000 = vmatpush3.msra.mxu0 %v12648_v40 }
0x4eb6   :  { %12001 = vmatprep.subr.mxu0 %v12477_v3 }
0x4eb7   :  { %12002 = vmatpush3.msra.mxu0 %v12620_v26 }
0x4eb8   :  { %12003 = vmatprep.subr.mxu0 %v12477_v3 }
0x4eb9   :  { %12004 = vmatpush3.msra.mxu0 %v12627_v31 }
0x4eba   :  { %12019 = vmatprep.subr.mxu0 %v12477_v3 }
0x4f72   :  { %v8508_v45 = vpop.f32.mrf.mxu0 }
0x4f73   :  { %v8512_v36 = vmul.f32 %v8508_v45, %v14311_v17  ;;  %v14564_v17 = vld [vmem:[%s14904_s2 + $0x50] sm:$0xff]  ;;  %s14608_s2 = sld [smem:[#allocation2 + $0x6]] }
0x4f74   :  { %v11985_v6 = vpop.f32.mrf.mxu0 }
0x4f75   :  { %v8513_v28 = vadd.f32 %v8512_v36, %v14520_v44 }
0x4f77   :  { %v8514_v39 = vadd.f32 %v8513_v28, %v8358_v1 }
0x4f79   :  { %12389 = vtanh.f32 %v8514_v39  ;;  %s8761_s7 = ssub.f32 %s10220_s3, %s14608_s2 }
0x4f7b   :  { %s14652_s8 = smul.f32 0.25, %s8761_s7 }
0x4f7d   :  { %s8763_s9 = smul.f32 0.5, %s14652_s8  ;;  %v14693_v39 = vstv %s14652_s8 }
0x4f7e   :  { %s8764_s10 = smul.f32 0.16666667, %s14652_s8 }
0x4f7f   :  { %s10072_s1 = smul.f32 4.0, %s14652_s8 }
0x4f80   :  { %v14725_v56 = vstv %s8764_s10 }
0x4f86   :  { %v12390_v51 = vpop.eup %12389 }
0x4f87   :  { %11995 = vmatmul.mubr.msk.f32.vlgmr.msra.gmra.mxu1 %vm49_vm0, %v12390_v51  ;;  %v8593_v9 = vadd.f32 %v12390_v51, %v12388_v53  ;;  %v8771_v51 = vmul.f32 %v14693_v39, %v12658_v42 }
0x4f88   :  { %12009 = vmatpush3.msra.mxu1 %v14555_v49  ;;  %12016 = vmatprep.mubr.msk.f32.mxu1 %vm12478_vm1, %v12477_v3 }
0x4f89   :  { %12010 = vmatprep.subr.mxu1 %v12477_v3  ;;  %v8594_v11 = vmul.f32 2.0, %v8593_v9 }
0x4f8a   :  { %12011 = vmatpush3.msra.mxu1 %v14564_v17 }
0x4f8b   :  { %12012 = vmatprep.subr.mxu1 %v12477_v3  ;;  %v8595_v54 = vadd.f32 %v12386_v24, %v8594_v11 }
0x4f8c   :  { %12013 = vmatpush3.msra.mxu1 %v14571_v25 }
0x4f8d   :  { %12014 = vmatprep.subr.mxu1 %v12477_v3 }
0x4f8e   :  { %12015 = vmatpush3.msra.mxu1 %v14578_v10 }
0x4f8f   :  { %12030 = vmatprep.subr.mxu1 %v12477_v3 }
0x5047   :  { %v8585_v43 = vpop.f32.mrf.mxu1 }
0x5048   :  { %v8589_v41 = vmul.f32 %v8585_v43, %v14349_v59  ;;  %v8773_v59 = vstv %s14608_s2  ;;  %v14699_v43 = vmul.f32 %v14615_v7, %v14693_v39 }
0x5049   :  { %v11996_v30 = vpop.f32.mrf.mxu1  ;;  %v8774_v52 = vmul.f32 %v14615_v7, %v8773_v59 }
0x504a   :  { %v8590_v18 = vadd.f32 %v8589_v41, %v14520_v44  ;;  %v8772_v41 = vadd.f32 %v8771_v51, %v14699_v43 }
0x504b   :  { %v8778_v62 = vrot.slane %v8774_v52, %v12614_v21 }
0x504c   :  { %v8591_v22 = vadd.f32 %v8590_v18, %v8359_v16  ;;  %v14703_v30 = vrot.slane %v8772_v41, %v12614_v21 }
0x504d   :  { %v14625_v50 = vadd.f32 %v8778_v62, %v12629_v32  ;;  %v14655_v32 = vstv %s8763_s9 }
0x504e   :  { %12391 = vtanh.f32 %v8591_v22 }
0x504f   :  { %v8789_v9 = vadd.f32 %v14703_v30, %v14625_v50 }
0x505b   :  { %v12392_v60 = vpop.eup %12391 }
0x505c   :  { %v8596_v27 = vadd.f32 %v12392_v60, %v8595_v54 }
0x505e   :  { %12006 = vmatmul.mubr.msk.f32.vlgmr.msra.gmra.mxu0 %vm49_vm0, %v8596_v27  ;;  %v8673_v29 = vadd.f32 %v8596_v27, %v14503_v13  ;;  %v8755_v13 = vrot.slane %v8751_v14, %v12957_v5 }
0x505f   :  { %12020 = vmatpush3.msra.mxu0 %v12639_v37  ;;  %12027 = vmatprep.mubr.msk.f32.mxu0 %vm12478_vm1, %v12477_v3 }
0x5060   :  { %12021 = vmatprep.subr.mxu0 %v12477_v3  ;;  %12017 = vmatmul.mubr.msk.f32.vlgmr.msra.gmra.mxu1 %vm49_vm0, %v8673_v29 }
0x5061   :  { %12022 = vmatpush3.msra.mxu0 %v12648_v40  ;;  %12031 = vmatpush3.msra.mxu1 %v12639_v37 }
0x5062   :  { %12023 = vmatprep.subr.mxu0 %v12477_v3  ;;  %12032 = vmatprep.subr.mxu1 %v12477_v3 }
0x5063   :  { %12024 = vmatpush3.msra.mxu0 %v12620_v26  ;;  %12033 = vmatpush3.msra.mxu1 %v12648_v40 }
0x5064   :  { %12025 = vmatprep.subr.mxu0 %v12477_v3  ;;  %12034 = vmatprep.subr.mxu1 %v12477_v3 }
0x5065   :  { %12026 = vmatpush3.msra.mxu0 %v12627_v31  ;;  %12035 = vmatpush3.msra.mxu1 %v12620_v26 }
0x5066   :  { %12036 = vmatprep.subr.mxu1 %v12477_v3  ;;  %12041 = vmatprep.subr.mxu0 %v12477_v3 }
0x5067   :  { %12037 = vmatpush3.msra.mxu1 %v12627_v31  ;;  %12038 = vmatprep.mubr.msk.f32.mxu1 %vm12478_vm1, %v12477_v3 }
0x5068   :  { %12052 = vmatprep.subr.mxu1 %v12477_v3 }
0x511e   :  { %v8666_v8 = vpop.f32.mrf.mxu0 }
0x511f   :  { %v8670_v46 = vmul.f32 %v8666_v8, %v14381_v34  ;;  %v9111_v8 = vrot.slane %v14699_v43, %v12614_v21 }
0x5120   :  { %v12007_v35 = vpop.f32.mrf.mxu0  ;;  %v8743_v47 = vpop.f32.mrf.mxu1 }
0x5121   :  { %v8671_v48 = vadd.f32 %v8670_v46, %v14520_v44  ;;  %v8747_v38 = vmul.f32 %v8743_v47, %v14381_v34  ;;  %v14732_v35 = vrot.slane %v8771_v51, %v12614_v21 }
0x5122   :  { %v12018_v58 = vpop.f32.mrf.mxu1 }
0x5123   :  { %v14628_v4 = vadd.f32 %v8671_v48, %v14388_v20  ;;  %v8748_v0 = vadd.f32 %v8747_v38, %v14289_v33  ;;  %v8768_v33 = vmul.f32 %v14615_v7, %v14655_v32  ;;  %v8769_v20 = vmul.f32 %v14655_v32, %v12658_v42 }
0x5124   :  { %v9112_v48 = vadd.f32 %v9111_v8, %v14625_v50 }
0x5125   :  { %v8790_v15 = vadd.f32 %v14625_v50, %v14628_v4  ;;  %v14633_v23 = vadd.f32 %v8755_v13, %v8748_v0  ;;  %v8770_v44 = vadd.f32 %v8769_v20, %v8768_v33 }
0x5127   :  { %12393 = vtanh.f32 %v8790_v15  ;;  %8758 = vst.msk [vmem:[#allocation5 + $0x30] sm:$0xff] %vm49_vm0, %v14633_v23  ;;  %v14662_v19 = vrot.slane %v8770_v44, %v12614_v21 }
0x5129   :  { %v8784_v63 = vadd.f32 %v14662_v19, %v14625_v50  ;;  %v9113_v15 = vadd.f32 %v9112_v48, %v14662_v19 }
0x5134   :  { %v14637_v34 = vpop.eup %12393 }
0x5135   :  { %12028 = vmatmul.mubr.msk.f32.vlgmr.msra.gmra.mxu0 %vm49_vm0, %v14637_v34 }
0x5136   :  { %12042 = vmatpush3.msra.mxu0 %v12639_v37  ;;  %12049 = vmatprep.mubr.msk.f32.mxu0 %vm12478_vm1, %v12477_v3 }
0x5137   :  { %12043 = vmatprep.subr.mxu0 %v12477_v3 }
0x5138   :  { %12044 = vmatpush3.msra.mxu0 %v12648_v40 }
0x5139   :  { %12045 = vmatprep.subr.mxu0 %v12477_v3 }
0x513a   :  { %12046 = vmatpush3.msra.mxu0 %v12620_v26 }
0x513b   :  { %12047 = vmatprep.subr.mxu0 %v12477_v3 }
0x513c   :  { %12048 = vmatpush3.msra.mxu0 %v12627_v31 }
0x513d   :  { %12063 = vmatprep.subr.mxu0 %v12477_v3 }
0x51f5   :  { %v8861_v57 = vpop.f32.mrf.mxu0 }
0x51f6   :  { %v8865_v24 = vmul.f32 %v8861_v57, %v14655_v32 }
0x51f7   :  { %v12029_v2 = vpop.f32.mrf.mxu0 }
0x51f8   :  { %v8866_v61 = vadd.f32 %v8865_v24, %v14628_v4 }
0x51fa   :  { %v8867_v1 = vadd.f32 %v8866_v61, %v8784_v63 }
0x51fc   :  { %12395 = vtanh.f32 %v8867_v1 }
0x5209   :  { %v12396_v12 = vpop.eup %12395 }
0x520a   :  { %12039 = vmatmul.mubr.msk.f32.vlgmr.msra.gmra.mxu1 %vm49_vm0, %v12396_v12 }
0x520b   :  { %12053 = vmatpush3.msra.mxu1 %v12639_v37  ;;  %12060 = vmatprep.mubr.msk.f32.mxu1 %vm12478_vm1, %v12477_v3 }
0x520c   :  { %12054 = vmatprep.subr.mxu1 %v12477_v3 }
0x520d   :  { %12055 = vmatpush3.msra.mxu1 %v12648_v40 }
0x520e   :  { %12056 = vmatprep.subr.mxu1 %v12477_v3 }
0x520f   :  { %12057 = vmatpush3.msra.mxu1 %v12620_v26 }
0x5210   :  { %12058 = vmatprep.subr.mxu1 %v12477_v3 }
0x5211   :  { %12059 = vmatpush3.msra.mxu1 %v12627_v31 }
0x5212   :  { %12074 = vmatprep.subr.mxu1 %v12477_v3 }
0x52ca   :  { %v8938_v55 = vpop.f32.mrf.mxu1 }
0x52cb   :  { %v8942_v53 = vmul.f32 %v8938_v55, %v14655_v32 }
0x52cc   :  { %v12040_v45 = vpop.f32.mrf.mxu1 }
0x52cd   :  { %v8943_v36 = vadd.f32 %v8942_v53, %v14628_v4  ;;  %v9114_v53 = vadd.f32 %v9112_v48, %v14703_v30 }
0x52cf   :  { %v8944_v6 = vadd.f32 %v8943_v36, %v8784_v63 }
0x52d1   :  { %12397 = vtanh.f32 %v8944_v6 }
0x52de   :  { %v12398_v28 = vpop.eup %12397 }
0x52df   :  { %12050 = vmatmul.mubr.msk.f32.vlgmr.msra.gmra.mxu0 %vm49_vm0, %v12398_v28  ;;  %v9023_v42 = vadd.f32 %v12398_v28, %v12396_v12 }
0x52e0   :  { %12064 = vmatpush3.msra.mxu0 %v12639_v37  ;;  %12071 = vmatprep.mubr.msk.f32.mxu0 %vm12478_vm1, %v12477_v3 }
0x52e1   :  { %12065 = vmatprep.subr.mxu0 %v12477_v3  ;;  %v9024_v60 = vmul.f32 2.0, %v9023_v42 }
0x52e2   :  { %12066 = vmatpush3.msra.mxu0 %v12648_v40 }
0x52e3   :  { %12067 = vmatprep.subr.mxu0 %v12477_v3  ;;  %v9025_v27 = vadd.f32 %v14637_v34, %v9024_v60 }
0x52e4   :  { %12068 = vmatpush3.msra.mxu0 %v12620_v26 }
0x52e5   :  { %12069 = vmatprep.subr.mxu0 %v12477_v3 }
0x52e6   :  { %12070 = vmatpush3.msra.mxu0 %v12627_v31 }
0x52e7   :  { %12085 = vmatprep.subr.mxu0 %v12477_v3 }
0x539f   :  { %v9015_v16 = vpop.f32.mrf.mxu0 }
0x53a0   :  { %v9019_v18 = vmul.f32 %v9015_v16, %v14693_v39 }
0x53a1   :  { %v12051_v22 = vpop.f32.mrf.mxu0 }
0x53a2   :  { %v9020_v11 = vadd.f32 %v9019_v18, %v14628_v4  ;;  %v9429_v18 = vmul.f32 2.0, %v14699_v43 }
0x53a4   :  { %v9021_v54 = vadd.f32 %v9020_v11, %v8789_v9  ;;  %v9433_v11 = vrot.slane %v9429_v18, %v12614_v21 }
0x53a6   :  { %12399 = vtanh.f32 %v9021_v54 }
0x53b3   :  { %v12400_v29 = vpop.eup %12399 }
0x53b4   :  { %v14710_v59 = vadd.f32 %v12400_v29, %v9025_v27  ;;  %v9434_v27 = vadd.f32 %v9433_v11, %v14625_v50 }
0x53b6   :  { %12061 = vmatmul.mubr.msk.f32.vlgmr.msra.gmra.mxu1 %vm49_vm0, %v14710_v59 }
0x53b7   :  { %12075 = vmatpush3.msra.mxu1 %v12639_v37  ;;  %12082 = vmatprep.mubr.msk.f32.mxu1 %vm12478_vm1, %v12477_v3 }
0x53b8   :  { %12076 = vmatprep.subr.mxu1 %v12477_v3 }
0x53b9   :  { %12077 = vmatpush3.msra.mxu1 %v12648_v40 }
0x53ba   :  { %12078 = vmatprep.subr.mxu1 %v12477_v3 }
0x53bb   :  { %12079 = vmatpush3.msra.mxu1 %v12620_v26 }
0x53bc   :  { %12080 = vmatprep.subr.mxu1 %v12477_v3 }
0x53bd   :  { %12081 = vmatpush3.msra.mxu1 %v12627_v31 }
0x53be   :  { %12096 = vmatprep.subr.mxu1 %v12477_v3 }
0x5476   :  { %v9096_v52 = vpop.f32.mrf.mxu1 }
0x5477   :  { %v9101_v14 = vmul.f32 %v14725_v56, %v9096_v52 }
0x5478   :  { %v12062_v62 = vpop.f32.mrf.mxu1 }
0x5479   :  { %v9102_v46 = vadd.f32 %v9101_v14, %v14628_v4 }
0x547b   :  { %v14735_v47 = vadd.f32 %v14732_v35, %v9102_v46  ;;  %v9435_v46 = vadd.f32 %v9434_v27, %v14662_v19 }
0x547d   :  { %v9115_v38 = vadd.f32 %v9112_v48, %v14735_v47 }
0x547f   :  { %12401 = vtanh.f32 %v9115_v38 }
0x548c   :  { %v12402_v13 = vpop.eup %12401 }
0x548d   :  { %12072 = vmatmul.mubr.msk.f32.vlgmr.msra.gmra.mxu0 %vm49_vm0, %v12402_v13 }
0x548e   :  { %12086 = vmatpush3.msra.mxu0 %v12639_v37  ;;  %12093 = vmatprep.mubr.msk.f32.mxu0 %vm12478_vm1, %v12477_v3 }
0x548f   :  { %12087 = vmatprep.subr.mxu0 %v12477_v3 }
0x5490   :  { %12088 = vmatpush3.msra.mxu0 %v12648_v40 }
0x5491   :  { %12089 = vmatprep.subr.mxu0 %v12477_v3 }
0x5492   :  { %12090 = vmatpush3.msra.mxu0 %v12620_v26 }
0x5493   :  { %12091 = vmatprep.subr.mxu0 %v12477_v3 }
0x5494   :  { %12092 = vmatpush3.msra.mxu0 %v12627_v31 }
0x5495   :  { %12107 = vmatprep.subr.mxu0 %v12477_v3 }
0x554d   :  { %v9186_v58 = vpop.f32.mrf.mxu0 }
0x554e   :  { %v9190_v4 = vmul.f32 %v9186_v58, %v14655_v32 }
0x554f   :  { %v12073_v0 = vpop.f32.mrf.mxu0 }
0x5550   :  { %v9191_v34 = vadd.f32 %v9190_v4, %v14735_v47 }
0x5552   :  { %v9192_v33 = vadd.f32 %v9191_v34, %v9113_v15 }
0x5554   :  { %12403 = vtanh.f32 %v9192_v33 }
0x5561   :  { %v12404_v20 = vpop.eup %12403 }
0x5562   :  { %12083 = vmatmul.mubr.msk.f32.vlgmr.msra.gmra.mxu1 %vm49_vm0, %v12404_v20 }
0x5563   :  { %12097 = vmatpush3.msra.mxu1 %v12639_v37  ;;  %12104 = vmatprep.mubr.msk.f32.mxu1 %vm12478_vm1, %v12477_v3 }
0x5564   :  { %12098 = vmatprep.subr.mxu1 %v12477_v3 }
0x5565   :  { %12099 = vmatpush3.msra.mxu1 %v12648_v40 }
0x5566   :  { %12100 = vmatprep.subr.mxu1 %v12477_v3 }
0x5567   :  { %12101 = vmatpush3.msra.mxu1 %v12620_v26 }
0x5568   :  { %12102 = vmatprep.subr.mxu1 %v12477_v3 }
0x5569   :  { %12103 = vmatpush3.msra.mxu1 %v12627_v31 }
0x556a   :  { %12118 = vmatprep.subr.mxu1 %v12477_v3 }
0x5622   :  { %v9263_v44 = vpop.f32.mrf.mxu1 }
0x5623   :  { %v9267_v57 = vmul.f32 %v9263_v44, %v14655_v32 }
0x5624   :  { %v12084_v24 = vpop.f32.mrf.mxu1 }
0x5625   :  { %v9268_v2 = vadd.f32 %v9267_v57, %v14735_v47  ;;  %v9436_v57 = vadd.f32 %v9434_v27, %v14703_v30 }
0x5627   :  { %v9269_v63 = vadd.f32 %v9268_v2, %v9113_v15 }
0x5629   :  { %12405 = vtanh.f32 %v9269_v63 }
0x5636   :  { %v12406_v61 = vpop.eup %12405 }
0x5637   :  { %12094 = vmatmul.mubr.msk.f32.vlgmr.msra.gmra.mxu0 %vm49_vm0, %v12406_v61  ;;  %v9348_v6 = vadd.f32 %v12406_v61, %v12404_v20 }
0x5638   :  { %12108 = vmatpush3.msra.mxu0 %v12639_v37  ;;  %12115 = vmatprep.mubr.msk.f32.mxu0 %vm12478_vm1, %v12477_v3 }
0x5639   :  { %12109 = vmatprep.subr.mxu0 %v12477_v3  ;;  %v9349_v28 = vmul.f32 2.0, %v9348_v6 }
0x563a   :  { %12110 = vmatpush3.msra.mxu0 %v12648_v40 }
0x563b   :  { %12111 = vmatprep.subr.mxu0 %v12477_v3  ;;  %v9350_v51 = vadd.f32 %v12402_v13, %v9349_v28 }
0x563c   :  { %12112 = vmatpush3.msra.mxu0 %v12620_v26 }
0x563d   :  { %12113 = vmatprep.subr.mxu0 %v12477_v3 }
0x563e   :  { %12114 = vmatpush3.msra.mxu0 %v12627_v31 }
0x563f   :  { %12129 = vmatprep.subr.mxu0 %v12477_v3 }
0x56f7   :  { %v9340_v1 = vpop.f32.mrf.mxu0 }
0x56f8   :  { %v9344_v12 = vmul.f32 %v9340_v1, %v14693_v39 }
0x56f9   :  { %v12095_v55 = vpop.f32.mrf.mxu0 }
0x56fa   :  { %v9345_v45 = vadd.f32 %v9344_v12, %v14735_v47 }
0x56fc   :  { %v9346_v36 = vadd.f32 %v9345_v45, %v9114_v53 }
0x56fe   :  { %12407 = vtanh.f32 %v9346_v36 }
0x570b   :  { %v12408_v41 = vpop.eup %12407 }
0x570c   :  { %v14780_v16 = vadd.f32 %v12408_v41, %v9350_v51 }
0x570e   :  { %12105 = vmatmul.mubr.msk.f32.vlgmr.msra.gmra.mxu1 %vm49_vm0, %v14780_v16  ;;  %v9428_v55 = vadd.f32 %v14780_v16, %v14710_v59  ;;  %v9751_v59 = vmul.f32 3.0, %v14699_v43 }
0x570f   :  { %12119 = vmatpush3.msra.mxu1 %v12639_v37  ;;  %12126 = vmatprep.mubr.msk.f32.mxu1 %vm12478_vm1, %v12477_v3 }
0x5710   :  { %12120 = vmatprep.subr.mxu1 %v12477_v3  ;;  %v9755_v28 = vrot.slane %v9751_v59, %v12614_v21 }
0x5711   :  { %12121 = vmatpush3.msra.mxu1 %v12648_v40 }
0x5712   :  { %12122 = vmatprep.subr.mxu1 %v12477_v3  ;;  %v9756_v18 = vadd.f32 %v9755_v28, %v14625_v50 }
0x5713   :  { %12123 = vmatpush3.msra.mxu1 %v12620_v26 }
0x5714   :  { %12124 = vmatprep.subr.mxu1 %v12477_v3 }
0x5715   :  { %12125 = vmatpush3.msra.mxu1 %v12627_v31 }
0x5716   :  { %12140 = vmatprep.subr.mxu1 %v12477_v3 }
0x57ce   :  { %v9421_v22 = vpop.f32.mrf.mxu1 }
0x57cf   :  { %v9425_v9 = vmul.f32 %v9421_v22, %v14725_v56 }
0x57d0   :  { %v12106_v54 = vpop.f32.mrf.mxu1 }
0x57d1   :  { %v9426_v42 = vadd.f32 %v9425_v9, %v14735_v47 }
0x57d3   :  { %v14799_v60 = vadd.f32 %v9426_v42, %v14732_v35 }
0x57d5   :  { %v9437_v29 = vadd.f32 %v9434_v27, %v14799_v60 }
0x57d7   :  { %12409 = vtanh.f32 %v9437_v29 }
0x57e4   :  { %v12410_v52 = vpop.eup %12409 }
0x57e5   :  { %12116 = vmatmul.mubr.msk.f32.vlgmr.msra.gmra.mxu0 %vm49_vm0, %v12410_v52 }
0x57e6   :  { %12130 = vmatpush3.msra.mxu0 %v12639_v37  ;;  %12137 = vmatprep.mubr.msk.f32.mxu0 %vm12478_vm1, %v12477_v3 }
0x57e7   :  { %12131 = vmatprep.subr.mxu0 %v12477_v3 }
0x57e8   :  { %12132 = vmatpush3.msra.mxu0 %v12648_v40 }
0x57e9   :  { %12133 = vmatprep.subr.mxu0 %v12477_v3 }
0x57ea   :  { %12134 = vmatpush3.msra.mxu0 %v12620_v26 }
0x57eb   :  { %12135 = vmatprep.subr.mxu0 %v12477_v3 }
0x57ec   :  { %12136 = vmatpush3.msra.mxu0 %v12627_v31 }
0x57ed   :  { %12151 = vmatprep.subr.mxu0 %v12477_v3 }
0x58a5   :  { %v9508_v14 = vpop.f32.mrf.mxu0 }
0x58a6   :  { %v9512_v8 = vmul.f32 %v9508_v14, %v14655_v32 }
0x58a7   :  { %v12117_v62 = vpop.f32.mrf.mxu0 }
0x58a8   :  { %v9513_v47 = vadd.f32 %v9512_v8, %v14799_v60 }
0x58aa   :  { %v9514_v48 = vadd.f32 %v9513_v47, %v9435_v46 }
0x58ac   :  { %12411 = vtanh.f32 %v9514_v48 }
0x58b9   :  { %v12412_v38 = vpop.eup %12411 }
0x58ba   :  { %12127 = vmatmul.mubr.msk.f32.vlgmr.msra.gmra.mxu1 %vm49_vm0, %v12412_v38 }
0x58bb   :  { %12141 = vmatpush3.msra.mxu1 %v12639_v37  ;;  %12148 = vmatprep.mubr.msk.f32.mxu1 %vm12478_vm1, %v12477_v3 }
0x58bc   :  { %12142 = vmatprep.subr.mxu1 %v12477_v3 }
0x58bd   :  { %12143 = vmatpush3.msra.mxu1 %v12648_v40 }
0x58be   :  { %12144 = vmatprep.subr.mxu1 %v12477_v3 }
0x58bf   :  { %12145 = vmatpush3.msra.mxu1 %v12620_v26 }
0x58c0   :  { %12146 = vmatprep.subr.mxu1 %v12477_v3 }
0x58c1   :  { %12147 = vmatpush3.msra.mxu1 %v12627_v31 }
0x58c2   :  { %12162 = vmatprep.subr.mxu1 %v12477_v3 }
0x597a   :  { %v9585_v13 = vpop.f32.mrf.mxu1 }
0x597b   :  { %v9589_v58 = vmul.f32 %v9585_v13, %v14655_v32 }
0x597c   :  { %v12128_v4 = vpop.f32.mrf.mxu1 }
0x597d   :  { %v9590_v0 = vadd.f32 %v9589_v58, %v14799_v60 }
0x597f   :  { %v9591_v15 = vadd.f32 %v9590_v0, %v9435_v46  ;;  %v10073_v46 = vstv %s10072_s1 }
0x5980   :  { %v10074_v47 = vmul.f32 %v14615_v7, %v10073_v46 }
0x5981   :  { %12413 = vtanh.f32 %v9591_v15 }
0x598e   :  { %v12414_v34 = vpop.eup %12413 }
0x598f   :  { %12138 = vmatmul.mubr.msk.f32.vlgmr.msra.gmra.mxu0 %vm49_vm0, %v12414_v34  ;;  %v9670_v63 = vadd.f32 %v12414_v34, %v12412_v38 }
0x5990   :  { %12152 = vmatpush3.msra.mxu0 %v12639_v37  ;;  %12159 = vmatprep.mubr.msk.f32.mxu0 %vm12478_vm1, %v12477_v3 }
0x5991   :  { %12153 = vmatprep.subr.mxu0 %v12477_v3  ;;  %v9671_v61 = vmul.f32 2.0, %v9670_v63 }
0x5992   :  { %12154 = vmatpush3.msra.mxu0 %v12648_v40 }
0x5993   :  { %12155 = vmatprep.subr.mxu0 %v12477_v3  ;;  %v9672_v1 = vadd.f32 %v12410_v52, %v9671_v61 }
0x5994   :  { %12156 = vmatpush3.msra.mxu0 %v12620_v26 }
0x5995   :  { %12157 = vmatprep.subr.mxu0 %v12477_v3 }
0x5996   :  { %12158 = vmatpush3.msra.mxu0 %v12627_v31 }
0x5997   :  { %12173 = vmatprep.subr.mxu0 %v12477_v3 }
0x5a4f   :  { %v9662_v33 = vpop.f32.mrf.mxu0 }
0x5a50   :  { %v9666_v20 = vmul.f32 %v9662_v33, %v14693_v39 }
0x5a51   :  { %v12139_v44 = vpop.f32.mrf.mxu0 }
0x5a52   :  { %v9667_v24 = vadd.f32 %v9666_v20, %v14799_v60 }
0x5a54   :  { %v9668_v2 = vadd.f32 %v9667_v24, %v9436_v57 }
0x5a56   :  { %12415 = vtanh.f32 %v9668_v2 }
0x5a63   :  { %v12416_v12 = vpop.eup %12415 }
0x5a64   :  { %v9673_v53 = vadd.f32 %v12416_v12, %v9672_v1 }
0x5a66   :  { %12149 = vmatmul.mubr.msk.f32.vlgmr.msra.gmra.mxu1 %vm49_vm0, %v9673_v53  ;;  %v14847_v45 = vadd.f32 %v9673_v53, %v9428_v55 }
0x5a67   :  { %12163 = vmatpush3.msra.mxu1 %v12639_v37  ;;  %12170 = vmatprep.mubr.msk.f32.mxu1 %vm12478_vm1, %v12477_v3 }
0x5a68   :  { %12164 = vmatprep.subr.mxu1 %v12477_v3 }
0x5a69   :  { %12165 = vmatpush3.msra.mxu1 %v12648_v40 }
0x5a6a   :  { %12166 = vmatprep.subr.mxu1 %v12477_v3 }
0x5a6b   :  { %12167 = vmatpush3.msra.mxu1 %v12620_v26 }
0x5a6c   :  { %12168 = vmatprep.subr.mxu1 %v12477_v3 }
0x5a6d   :  { %12169 = vmatpush3.msra.mxu1 %v12627_v31 }
0x5a6e   :  { %12184 = vmatprep.subr.mxu1 %v12477_v3 }
0x5b26   :  { %v9743_v36 = vpop.f32.mrf.mxu1 }
0x5b27   :  { %v9747_v6 = vmul.f32 %v9743_v36, %v14725_v56 }
0x5b28   :  { %v12150_v51 = vpop.f32.mrf.mxu1 }
0x5b29   :  { %v9748_v41 = vadd.f32 %v9747_v6, %v14799_v60 }
0x5b2b   :  { %v9749_v16 = vadd.f32 %v9748_v41, %v14732_v35 }
0x5b2d   :  { %v9759_v22 = vadd.f32 %v9756_v18, %v9749_v16 }
0x5b2f   :  { %12417 = vtanh.f32 %v9759_v22 }
0x5b3c   :  { %v12418_v9 = vpop.eup %12417 }
0x5b3d   :  { %12160 = vmatmul.mubr.msk.f32.vlgmr.msra.gmra.mxu0 %vm49_vm0, %v12418_v9 }
0x5b3e   :  { %12174 = vmatpush3.msra.mxu0 %v12639_v37  ;;  %12181 = vmatprep.mubr.msk.f32.mxu0 %vm12478_vm1, %v12477_v3  ;;  %v9757_v37 = vadd.f32 %v9756_v18, %v14662_v19 }
0x5b3f   :  { %12175 = vmatprep.subr.mxu0 %v12477_v3 }
0x5b40   :  { %12176 = vmatpush3.msra.mxu0 %v12648_v40 }
0x5b41   :  { %12177 = vmatprep.subr.mxu0 %v12477_v3 }
0x5b42   :  { %12178 = vmatpush3.msra.mxu0 %v12620_v26 }
0x5b43   :  { %12179 = vmatprep.subr.mxu0 %v12477_v3 }
0x5b44   :  { %12180 = vmatpush3.msra.mxu0 %v12627_v31 }
0x5bfd   :  { %v9830_v21 = vpop.f32.mrf.mxu0 }
0x5bfe   :  { %v9834_v50 = vmul.f32 %v9830_v21, %v14655_v32 }
0x5bff   :  { %v12161_v43 = vpop.f32.mrf.mxu0 }
0x5c00   :  { %v9835_v35 = vadd.f32 %v9834_v50, %v9749_v16 }
0x5c02   :  { %v9836_v11 = vadd.f32 %v9835_v35, %v9757_v37 }
0x5c04   :  { %12419 = vtanh.f32 %v9836_v11 }
0x5c11   :  { %v12420_v54 = vpop.eup %12419 }
0x5c12   :  { %12171 = vmatmul.mubr.msk.f32.vlgmr.msra.gmra.mxu1 %vm49_vm0, %v12420_v54 }
0x5c13   :  { %12185 = vmatpush3.msra.mxu1 %v14555_v49  ;;  %12192 = vmatprep.mubr.msk.f32.mxu1 %vm12478_vm1, %v12477_v3 }
0x5c14   :  { %12186 = vmatprep.subr.mxu1 %v12477_v3 }
0x5c15   :  { %12187 = vmatpush3.msra.mxu1 %v14564_v17 }
0x5c16   :  { %12188 = vmatprep.subr.mxu1 %v12477_v3 }
0x5c17   :  { %12189 = vmatpush3.msra.mxu1 %v14571_v25  ;;  %v9758_v25 = vadd.f32 %v9756_v18, %v14703_v30  ;;  %v10078_v30 = vrot.slane %v10074_v47, %v12957_v5 }
0x5c18   :  { %12190 = vmatprep.subr.mxu1 %v12477_v3 }
0x5c19   :  { %12191 = vmatpush3.msra.mxu1 %v14578_v10 }
0x5cd2   :  { %v9907_v26 = vpop.f32.mrf.mxu1 }
0x5cd3   :  { %v9911_v31 = vmul.f32 %v9907_v26, %v14655_v32 }
0x5cd4   :  { %v12172_v40 = vpop.f32.mrf.mxu1 }
0x5cd5   :  { %v9912_v49 = vadd.f32 %v9911_v31, %v9749_v16 }
0x5cd7   :  { %v9913_v19 = vadd.f32 %v9912_v49, %v9757_v37 }
0x5cd9   :  { %12421 = vtanh.f32 %v9913_v19 }
0x5ce6   :  { %v12422_v42 = vpop.eup %12421 }
0x5ce7   :  { %12182 = vmatmul.mubr.msk.f32.vlgmr.msra.gmra.mxu0 %vm49_vm0, %v12422_v42  ;;  %v9992_v10 = vadd.f32 %v12422_v42, %v12420_v54 }
0x5ce9   :  { %v9993_v52 = vmul.f32 2.0, %v9992_v10 }
0x5ceb   :  { %v9994_v32 = vadd.f32 %v12418_v9, %v9993_v52 }
0x5da7   :  { %v9984_v17 = vpop.f32.mrf.mxu0 }
0x5da8   :  { %v9988_v60 = vmul.f32 %v9984_v17, %v14693_v39 }
0x5da9   :  { %v12183_v27 = vpop.f32.mrf.mxu0 }
0x5daa   :  { %v9989_v3 = vadd.f32 %v9988_v60, %v9749_v16 }
0x5dac   :  { %v9990_v29 = vadd.f32 %v9989_v3, %v9758_v25 }
0x5dae   :  { %12423 = vtanh.f32 %v9990_v29 }
0x5dbb   :  { %v12424_v14 = vpop.eup %12423 }
0x5dbc   :  { %v9995_v8 = vadd.f32 %v12424_v14, %v9994_v32 }
0x5dbe   :  { %v9996_v62 = vadd.f32 %v9995_v8, %v14847_v45 }
0x5dc0   :  { %12193 = vmatmul.mubr.msk.f32.vlgmr.msra.gmra.mxu1 %vm49_vm0, %v9996_v62 }
0x5e80   :  { %v10066_v39 = vpop.f32.mrf.mxu1 }
0x5e81   :  { %v10070_v48 = vmul.f32 %v10066_v39, %v14725_v56 }
0x5e82   :  { %v12194_v38 = vpop.f32.mrf.mxu1 }
0x5e83   :  { %v10071_v13 = vadd.f32 %v10070_v48, %v14633_v23 }
0x5e85   :  { %v10079_v58 = vadd.f32 %v10078_v30, %v10071_v13 }
0x5e87   :  { %10081 = vst.msk [vmem:[#allocation5 + $0x38] sm:$0xff] %vm49_vm0, %v10079_v58 }
0x5e88   :  { %12463 = shalt.err (!%p12460_p9)
}
0x5e89   :  { %s12480_s14 = smov 128   ;;  %s12481_s15 = smov 8  }
0x5e8a   :  { %10093 = dma.vmem_to_hbm [thread:$0]  %s10088_s12, 1024, %s14906_s4, [#allocation3], %s12480_s14, %s12480_s14, %s12481_s15  }
0x5e8b   :  { %12474 = dma.done.wait [#allocation3], 1024  }
0x5e8c   :  { %12475 = vsyncadd [#allocation3], 4294966272 }
0x5e8d   :  { %10097 = vsyncpa [#allocation3], 1 }
0x5e8e   :  { %10098 = vsyncpa [#allocation4], 1 }

</bundles_post_ra>
